<compile_context>
chip_gen: v6e
topology: v6e:2x2x1
jax: 0.10.0
libtpu: 0.0.40
codegen_flags: <defaults>
</compile_context>

<pallas_src>
import math
from types import SimpleNamespace

import jax
import jax.numpy as jnp
from jax import lax
from jax.experimental import pallas as pl
from jax.experimental.pallas import tpu as pltpu

# ----------------------------------------------------------------------------
# separable 5-tap gaussian (sigma = 1.5), same as kornia's get_gaussian_kernel2d
# (outer product of two normalized 1-D kernels).
# ----------------------------------------------------------------------------
_WIN = 5
_SIGMA = 1.5
_g = [math.exp(-((i - (_WIN - 1) / 2.0) ** 2) / (2.0 * _SIGMA ** 2)) for i in range(_WIN)]
_G1 = tuple(v / sum(_g) for v in _g)

_C1 = (0.01 * 1.0) ** 2   # max_val = 1.0 (kornia default)
_C2 = (0.03 * 1.0) ** 2


def _round_up(v, m):
    return -(-v // m) * m


def _hfilt_coef_table(W, Wl):
    """(8, Wl) f32 table. Row (k+2), column c holds the weight that multiplies
    a[:, c+k] (obtained with a lane roll) in the horizontal reflect-padded
    5-tap Gaussian. Reflect boundaries and zeroing of padded lanes [W, Wl)
    are folded into the table, so the kernel needs no boundary fix-ups."""
    tbl = [[0.0] * Wl for _ in range(8)]
    for c in range(W):
        for j in range(_WIN):
            src = c + j - 2
            if src < 0:
                src = -src                      # reflect: -1 -> 1, -2 -> 2
            elif src >= W:
                src = 2 * W - 2 - src           # reflect: W -> W-2, W+1 -> W-3
            k = src - c                         # always in [-2, 2] for W >= 3
            tbl[k + 2][c] += _G1[j]
    return jnp.asarray(tbl, dtype=jnp.float32)


def _make_rec_loss_kernel(TB, H, W, Wl):
    """Kernel over a block of TB images of logical size (H, W), lane width Wl."""

    def kernel(coef_ref, x_ref, y_ref, out_ref, xp_ref, yp_ref):
        x = x_ref[...].astype(jnp.float32)
        y = y_ref[...].astype(jnp.float32)

        # ---------- L2 / L1 partial sums (padded lanes are zero in both) ----------
        d = x - y
        sq = jnp.sum(d * d).reshape(1, 1)
        ab = jnp.sum(jnp.abs(d)).reshape(1, 1)

        # ---------- vertical reflect halo (rows only) in VMEM scratch ----------
        def fill_vreflect(dst, src):
            dst[:, 2:2 + H, :] = src
            dst[:, 0:1, :] = src[:, 2:3, :]
            dst[:, 1:2, :] = src[:, 1:2, :]
            dst[:, 2 + H:3 + H, :] = src[:, H - 2:H - 1, :]
            dst[:, 3 + H:4 + H, :] = src[:, H - 3:H - 2, :]

        fill_vreflect(xp_ref, x)
        fill_vreflect(yp_ref, y)
        xp = xp_ref[...]
        yp = yp_ref[...]

        coef = coef_ref[...]                     # (8, Wl), rows 0..4 used

        def vfilt(a):
            # symmetric vertical 5-tap pass: 3 muls + 4 adds per element
            acc = _G1[0] * (a[:, 0:H, :] + a[:, 4:4 + H, :])
            acc = acc + _G1[1] * (a[:, 1:1 + H, :] + a[:, 3:3 + H, :])
            acc = acc + _G1[2] * a[:, 2:2 + H, :]
            return acc.reshape(TB * H, Wl)

        def hfilt(a):
            # horizontal 5-tap via XLU rolls; reflect boundary + padded-lane
            # zeroing are baked into the per-lane coefficient rows.
            acc = coef[0:1, :] * pltpu.roll(a, 2, 1)             # a[:, c-2]
            acc = acc + coef[1:2, :] * pltpu.roll(a, 1, 1)       # a[:, c-1]
            acc = acc + coef[2:3, :] * a                         # a[:, c]
            acc = acc + coef[3:4, :] * pltpu.roll(a, Wl - 1, 1)  # a[:, c+1]
            acc = acc + coef[4:5, :] * pltpu.roll(a, Wl - 2, 1)  # a[:, c+2]
            return acc

        # chain-ordered second moments: each product consumed immediately.
        mu_x = hfilt(vfilt(xp))
        mu_y = hfilt(vfilt(yp))
        mu_xx = hfilt(vfilt(xp * xp))
        mu_yy = hfilt(vfilt(yp * yp))
        mu_xy = hfilt(vfilt(xp * yp))

        # hoisted mu products reused by sigma_* and num/den
        mxx = mu_x * mu_x
        myy = mu_y * mu_y
        mxy = mu_x * mu_y
        sigma_x = mu_xx - mxx
        sigma_y = mu_yy - myy
        sigma_xy = mu_xy - mxy

        num = (2.0 * mxy + _C1) * (2.0 * sigma_xy + _C2)
        den = (mxx + myy + _C1) * (sigma_x + sigma_y + _C2)
        r = pl.reciprocal(den, approx=True)      # EUP slot
        r = r * (2.0 - den * r)                  # one Newton step -> ~f32 accurate
        ssim_map = num * r
        loss_map = jnp.clip(0.5 * (1.0 - ssim_map), 0.0, 1.0)   # kornia ssim_loss map

        if Wl > W:
            lane = lax.broadcasted_iota(jnp.int32, (TB * H, Wl), 1)
            ss = jnp.sum(jnp.where(lane < W, loss_map, 0.0)).reshape(1, 1)
        else:
            ss = jnp.sum(loss_map).reshape(1, 1)

        # ---------- single lane-dense (8,128) partial-sum tile ----------
        out_lane = lax.broadcasted_iota(jnp.int32, (8, 128), 1)
        tile = jnp.where(out_lane == 0, sq, jnp.zeros((8, 128), jnp.float32))
        tile = jnp.where(out_lane == 1, ab, tile)
        tile = jnp.where(out_lane == 2, ss, tile)
        out_ref[...] = tile

    return kernel


def _vmem_limit_bytes():
    """Generation-aware scoped-VMEM request: ~64 MiB on v5e/v6e (128 MiB phys),
    ~45 MiB on v7x (64 MiB phys); conservative 32 MiB fallback."""
    try:
        info = pltpu.get_tpu_info()
        cap = int(getattr(info, "vmem_capacity_bytes", 0)) or None
    except Exception:
        cap = None
    if cap is None:
        return 32 * 1024 * 1024
    return int(min(64 * 1024 * 1024, 0.7 * cap))


def _pick_block_b(B, H, W, Wl, budget_bytes):
    """Largest block of images that divides B, fits the live-VMEM budget, and
    (preferably) yields an even number of grid steps for v7x's 2 TensorCores."""
    per_image = 4 * Wl * (2 * (H + 4) + 11 * H)   # halos + ~live f32 value temporaries
    io_per_image = 4 * 2 * 2 * H * Wl             # double-buffered x,y blocks (f32 bound)
    cap = max(1, min(B, 8, budget_bytes // max(per_image + io_per_image, 1)))
    best_any, best_even = 1, 0
    for tb in range(1, cap + 1):
        if B % tb:
            continue
        best_any = tb
        if (B // tb) % 2 == 0:
            best_even = tb
    if best_even and best_even * 2 >= best_any:
        return best_even
    return best_any


def _run_rec_loss_kernel(x, y):
    """x, y: (B, H, W) float arrays (f32 or bf16; cast to f32 in-kernel).

    Returns (sum_sq, sum_abs, ssim_loss_sum) as f32 scalars over all elements.
    """
    B, H, W = x.shape
    assert H >= 3 and W >= 3, "reflect padding of 2 requires H, W >= 3"

    Wl = _round_up(W, 128)
    if Wl != W:
        # zero-pad lanes once in the wrapper (no-op for W % 128 == 0); padded
        # lanes contribute 0 to L1/L2 and are masked out of the SSIM sum.
        pad = ((0, 0), (0, 0), (0, Wl - W))
        x = jnp.pad(x, pad)
        y = jnp.pad(y, pad)

    vmem_limit = _vmem_limit_bytes()
    TB = _pick_block_b(B, H, W, Wl, budget_bytes=vmem_limit // 2)
    nb = B // TB
    coef = _hfilt_coef_table(W, Wl)

    kernel = _make_rec_loss_kernel(TB, H, W, Wl)
    out = pl.pallas_call(
        kernel,
        out_shape=jax.ShapeDtypeStruct((nb * 8, 128), jnp.float32),
        grid=(nb,),
        in_specs=[
            pl.BlockSpec((8, Wl), lambda b: (0, 0)),          # resident coef table
            pl.BlockSpec((TB, H, Wl), lambda b: (b, 0, 0)),
            pl.BlockSpec((TB, H, Wl), lambda b: (b, 0, 0)),
        ],
        out_specs=pl.BlockSpec((8, 128), lambda b: (b, 0)),
        scratch_shapes=[
            pltpu.VMEM((TB, H + 4, Wl), jnp.float32),          # vertical halo x
            pltpu.VMEM((TB, H + 4, Wl), jnp.float32),          # vertical halo y
        ],
        compiler_params=pltpu.CompilerParams(
            dimension_semantics=("parallel",),   # shards blocks across v7x's 2 TCs
            vmem_limit_bytes=int(vmem_limit),
        ),
    )(coef, x, y)

    totals = out.reshape(nb, 8, 128)[:, 0, :].sum(axis=0)      # partials -> totals
    return totals[0], totals[1], totals[2]


# ----------------------------------------------------------------------------
# LossClass equivalent
# ----------------------------------------------------------------------------
class LossClassPallas:
    def __init__(self, opt):
        self.opt = opt
        print('init loss class finished', flush=True)

    def calc_2d_rec_loss(self, rgb_images, rgb_gt, high_res_rgb_gt, opt,
                         loss_dict=False, mode='train'):
        opt = self.opt
        N, C, H, W = rgb_images.shape

        # Keep the incoming dtype (bf16 halves the HBM read); f32 math in-kernel.
        x = rgb_images.reshape(N * C, H, W)
        y = rgb_gt.reshape(N * C, H, W)

        sum_sq, sum_abs, ssim_sum = _run_rec_loss_kernel(x, y)
        numel = float(N * C * H * W)

        rec_loss = sum_sq / numel                 # nn.MSELoss
        mae = sum_abs / numel                     # F.l1_loss
        loss_ssim = ssim_sum / numel              # kornia.losses.ssim_loss(.., 5)
        # kornia.metrics.psnr(x/2+0.5, y/2+0.5, 1.0) == 10*log10(1 / (mse/4))
        loss_psnr = 10.0 * jnp.log10(4.0 / rec_loss)

        # TODO(synk): pretrained LPIPS(alex) has no synthetic Pallas equivalent.
        lpips_loss = jnp.float32(0.0)
        # id_lambda == 0  ->  ArcFace branch is skipped exactly as in PyTorch.
        loss_id = jnp.float32(0.0)

        loss = rec_loss * opt.l2_lambda + lpips_loss * opt.vgg_lambda + loss_id * opt.id_lambda

        if loss_dict:
            cur_encoder_dict = {
                'loss_l2': rec_loss,
                'loss_id': loss_id,
                'loss_lpips': lpips_loss,
                'loss': loss,
                'mae': mae,
                'PSNR': loss_psnr,
                'SSIM': 1.0 - loss_ssim,
                'ID_SIM': 1.0 - loss_id,
            }
            return loss, cur_encoder_dict
        return (loss, rec_loss, lpips_loss, loss_id, 0, 0)

    def __call__(self, *args, **kwargs):
        return self.calc_2d_rec_loss(*args, **kwargs)


if __name__ == "__main__":
    opt = SimpleNamespace(l2_lambda=1.0, vgg_lambda=0.8, id_lambda=0.0)
    loss_module = LossClassPallas(opt)

    key = jax.random.PRNGKey(0)
    k1, k2, k3 = jax.random.split(key, 3)
    # NCHW, values in [-1, 1] as the PyTorch pipeline implies (x/2 + 0.5 -> [0,1])
    rgb_images = jax.random.uniform(k1, (2, 3, 16, 16), minval=-1.0, maxval=1.0, dtype=jnp.float32)
    rgb_gt = jax.random.uniform(k2, (2, 3, 16, 16), minval=-1.0, maxval=1.0, dtype=jnp.float32)
    high_res_rgb_gt = jax.random.uniform(k3, (2, 3, 64, 64), minval=-1.0, maxval=1.0, dtype=jnp.float32)

    loss, ldict = loss_module(rgb_images, rgb_gt, high_res_rgb_gt, opt, loss_dict=True)
    jax.block_until_ready(loss)
    jax.block_until_ready(ldict['SSIM'])

    print("KERNEL_OK")
</pallas_src>

<mosaic_0001>
module attributes {stable_mosaic.version = 11 : i64} {
  func.func @kernel(%arg0: i32, %arg1: memref<8x128xf32, #tpu.memory_space<vmem>>, %arg2: memref<3x16x128xf32, #tpu.memory_space<vmem>>, %arg3: memref<3x16x128xf32, #tpu.memory_space<vmem>>, %arg4: memref<8x128xf32, #tpu.memory_space<vmem>>, %arg5: memref<3x20x128xf32, #tpu.memory_space<vmem>>, %arg6: memref<3x20x128xf32, #tpu.memory_space<vmem>>) attributes {dimension_semantics = [#tpu.dimension_semantics<parallel>], iteration_bounds = array<i64: 2>, scalar_prefetch = 0 : i64, scratch_operands = 2 : i64, tpu.core_type = #tpu.core_type<tc>, window_params = [{pipeline_mode = #tpu.pipeline_mode<synchronous>, transform_indices = @transform_0, window_bounds = array<i64: 8, 128>}, {transform_indices = @transform_1, window_bounds = array<i64: 3, 16, 128>}, {transform_indices = @transform_2, window_bounds = array<i64: 3, 16, 128>}, {transform_indices = @transform_3, window_bounds = array<i64: 8, 128>}]} {
    %c0 = arith.constant 0 : index
    %c0_0 = arith.constant 0 : index
    %c0_1 = arith.constant 0 : index
    %0 = vector.load %arg2[%c0, %c0_0, %c0_1] : memref<3x16x128xf32, #tpu.memory_space<vmem>>, vector<3x16x128xf32>
    %c0_2 = arith.constant 0 : index
    %c0_3 = arith.constant 0 : index
    %c0_4 = arith.constant 0 : index
    %1 = vector.load %arg3[%c0_2, %c0_3, %c0_4] : memref<3x16x128xf32, #tpu.memory_space<vmem>>, vector<3x16x128xf32>
    %2 = arith.subf %0, %1 : vector<3x16x128xf32>
    %3 = arith.mulf %2, %2 : vector<3x16x128xf32>
    %4 = vector.shape_cast %3 : vector<3x16x128xf32> to vector<1x3x16x128xf32>
    %cst = arith.constant dense<0.000000e+00> : vector<1xf32>
    %5 = vector.multi_reduction <add>, %4, %cst [1, 2, 3] : vector<1x3x16x128xf32> to vector<1xf32>
    %6 = vector.shape_cast %5 : vector<1xf32> to vector<1x1x1x1xf32>
    %7 = vector.extract %6[0, 0, 0, 0] : f32 from vector<1x1x1x1xf32>
    %8 = vector.broadcast %7 : f32 to vector<1x1xf32>
    %9 = math.absf %2 : vector<3x16x128xf32>
    %10 = vector.shape_cast %9 : vector<3x16x128xf32> to vector<1x3x16x128xf32>
    %cst_5 = arith.constant dense<0.000000e+00> : vector<1xf32>
    %11 = vector.multi_reduction <add>, %10, %cst_5 [1, 2, 3] : vector<1x3x16x128xf32> to vector<1xf32>
    %12 = vector.shape_cast %11 : vector<1xf32> to vector<1x1x1x1xf32>
    %13 = vector.extract %12[0, 0, 0, 0] : f32 from vector<1x1x1x1xf32>
    %14 = vector.broadcast %13 : f32 to vector<1x1xf32>
    %c0_6 = arith.constant 0 : index
    %c2 = arith.constant 2 : index
    %c0_7 = arith.constant 0 : index
    %15 = vector.load %arg5[%c0_6, %c2, %c0_7] : memref<3x20x128xf32, #tpu.memory_space<vmem>>, vector<3x16x128xf32>
    tpu.vector_store %arg5[%c0_6, %c2, %c0_7], %0 {strides = array<i32>} : memref<3x20x128xf32, #tpu.memory_space<vmem>>, vector<3x16x128xf32>,
    %16 = vector.extract_strided_slice %0 {offsets = [0, 2, 0], sizes = [3, 1, 128], strides = [1, 1, 1]} : vector<3x16x128xf32> to vector<3x1x128xf32>
    %c0_8 = arith.constant 0 : index
    %c0_9 = arith.constant 0 : index
    %c0_10 = arith.constant 0 : index
    %17 = vector.load %arg5[%c0_8, %c0_9, %c0_10] : memref<3x20x128xf32, #tpu.memory_space<vmem>>, vector<3x1x128xf32>
    tpu.vector_store %arg5[%c0_8, %c0_9, %c0_10], %16 {strides = array<i32>} : memref<3x20x128xf32, #tpu.memory_space<vmem>>, vector<3x1x128xf32>,
    %18 = vector.extract_strided_slice %0 {offsets = [0, 1, 0], sizes = [3, 1, 128], strides = [1, 1, 1]} : vector<3x16x128xf32> to vector<3x1x128xf32>
    %c0_11 = arith.constant 0 : index
    %c1 = arith.constant 1 : index
    %c0_12 = arith.constant 0 : index
    %19 = vector.load %arg5[%c0_11, %c1, %c0_12] : memref<3x20x128xf32, #tpu.memory_space<vmem>>, vector<3x1x128xf32>
    tpu.vector_store %arg5[%c0_11, %c1, %c0_12], %18 {strides = array<i32>} : memref<3x20x128xf32, #tpu.memory_space<vmem>>, vector<3x1x128xf32>,
    %20 = vector.extract_strided_slice %0 {offsets = [0, 14, 0], sizes = [3, 1, 128], strides = [1, 1, 1]} : vector<3x16x128xf32> to vector<3x1x128xf32>
    %c0_13 = arith.constant 0 : index
    %c18 = arith.constant 18 : index
    %c0_14 = arith.constant 0 : index
    %21 = vector.load %arg5[%c0_13, %c18, %c0_14] : memref<3x20x128xf32, #tpu.memory_space<vmem>>, vector<3x1x128xf32>
    tpu.vector_store %arg5[%c0_13, %c18, %c0_14], %20 {strides = array<i32>} : memref<3x20x128xf32, #tpu.memory_space<vmem>>, vector<3x1x128xf32>,
    %22 = vector.extract_strided_slice %0 {offsets = [0, 13, 0], sizes = [3, 1, 128], strides = [1, 1, 1]} : vector<3x16x128xf32> to vector<3x1x128xf32>
    %c0_15 = arith.constant 0 : index
    %c19 = arith.constant 19 : index
    %c0_16 = arith.constant 0 : index
    %23 = vector.load %arg5[%c0_15, %c19, %c0_16] : memref<3x20x128xf32, #tpu.memory_space<vmem>>, vector<3x1x128xf32>
    tpu.vector_store %arg5[%c0_15, %c19, %c0_16], %22 {strides = array<i32>} : memref<3x20x128xf32, #tpu.memory_space<vmem>>, vector<3x1x128xf32>,
    %c0_17 = arith.constant 0 : index
    %c2_18 = arith.constant 2 : index
    %c0_19 = arith.constant 0 : index
    %24 = vector.load %arg6[%c0_17, %c2_18, %c0_19] : memref<3x20x128xf32, #tpu.memory_space<vmem>>, vector<3x16x128xf32>
    tpu.vector_store %arg6[%c0_17, %c2_18, %c0_19], %1 {strides = array<i32>} : memref<3x20x128xf32, #tpu.memory_space<vmem>>, vector<3x16x128xf32>,
    %25 = vector.extract_strided_slice %1 {offsets = [0, 2, 0], sizes = [3, 1, 128], strides = [1, 1, 1]} : vector<3x16x128xf32> to vector<3x1x128xf32>
    %c0_20 = arith.constant 0 : index
    %c0_21 = arith.constant 0 : index
    %c0_22 = arith.constant 0 : index
    %26 = vector.load %arg6[%c0_20, %c0_21, %c0_22] : memref<3x20x128xf32, #tpu.memory_space<vmem>>, vector<3x1x128xf32>
    tpu.vector_store %arg6[%c0_20, %c0_21, %c0_22], %25 {strides = array<i32>} : memref<3x20x128xf32, #tpu.memory_space<vmem>>, vector<3x1x128xf32>,
    %27 = vector.extract_strided_slice %1 {offsets = [0, 1, 0], sizes = [3, 1, 128], strides = [1, 1, 1]} : vector<3x16x128xf32> to vector<3x1x128xf32>
    %c0_23 = arith.constant 0 : index
    %c1_24 = arith.constant 1 : index
    %c0_25 = arith.constant 0 : index
    %28 = vector.load %arg6[%c0_23, %c1_24, %c0_25] : memref<3x20x128xf32, #tpu.memory_space<vmem>>, vector<3x1x128xf32>
    tpu.vector_store %arg6[%c0_23, %c1_24, %c0_25], %27 {strides = array<i32>} : memref<3x20x128xf32, #tpu.memory_space<vmem>>, vector<3x1x128xf32>,
    %29 = vector.extract_strided_slice %1 {offsets = [0, 14, 0], sizes = [3, 1, 128], strides = [1, 1, 1]} : vector<3x16x128xf32> to vector<3x1x128xf32>
    %c0_26 = arith.constant 0 : index
    %c18_27 = arith.constant 18 : index
    %c0_28 = arith.constant 0 : index
    %30 = vector.load %arg6[%c0_26, %c18_27, %c0_28] : memref<3x20x128xf32, #tpu.memory_space<vmem>>, vector<3x1x128xf32>
    tpu.vector_store %arg6[%c0_26, %c18_27, %c0_28], %29 {strides = array<i32>} : memref<3x20x128xf32, #tpu.memory_space<vmem>>, vector<3x1x128xf32>,
    %31 = vector.extract_strided_slice %1 {offsets = [0, 13, 0], sizes = [3, 1, 128], strides = [1, 1, 1]} : vector<3x16x128xf32> to vector<3x1x128xf32>
    %c0_29 = arith.constant 0 : index
    %c19_30 = arith.constant 19 : index
    %c0_31 = arith.constant 0 : index
    %32 = vector.load %arg6[%c0_29, %c19_30, %c0_31] : memref<3x20x128xf32, #tpu.memory_space<vmem>>, vector<3x1x128xf32>
    tpu.vector_store %arg6[%c0_29, %c19_30, %c0_31], %31 {strides = array<i32>} : memref<3x20x128xf32, #tpu.memory_space<vmem>>, vector<3x1x128xf32>,
    %c0_32 = arith.constant 0 : index
    %c0_33 = arith.constant 0 : index
    %c0_34 = arith.constant 0 : index
    %33 = vector.load %arg5[%c0_32, %c0_33, %c0_34] : memref<3x20x128xf32, #tpu.memory_space<vmem>>, vector<3x20x128xf32>
    %c0_35 = arith.constant 0 : index
    %c0_36 = arith.constant 0 : index
    %c0_37 = arith.constant 0 : index
    %34 = vector.load %arg6[%c0_35, %c0_36, %c0_37] : memref<3x20x128xf32, #tpu.memory_space<vmem>>, vector<3x20x128xf32>
    %c0_38 = arith.constant 0 : index
    %c0_39 = arith.constant 0 : index
    %35 = vector.load %arg1[%c0_38, %c0_39] : memref<8x128xf32, #tpu.memory_space<vmem>>, vector<8x128xf32>
    %36 = vector.extract_strided_slice %33 {offsets = [0, 0, 0], sizes = [3, 16, 128], strides = [1, 1, 1]} : vector<3x20x128xf32> to vector<3x16x128xf32>
    %37 = vector.extract_strided_slice %33 {offsets = [0, 4, 0], sizes = [3, 16, 128], strides = [1, 1, 1]} : vector<3x20x128xf32> to vector<3x16x128xf32>
    %38 = arith.addf %36, %37 : vector<3x16x128xf32>
    %cst_40 = arith.constant 0.120078385 : f32
    %39 = vector.broadcast %cst_40 : f32 to vector<3x16x128xf32>
    %40 = arith.mulf %39, %38 : vector<3x16x128xf32>
    %41 = vector.extract_strided_slice %33 {offsets = [0, 1, 0], sizes = [3, 16, 128], strides = [1, 1, 1]} : vector<3x20x128xf32> to vector<3x16x128xf32>
    %42 = vector.extract_strided_slice %33 {offsets = [0, 3, 0], sizes = [3, 16, 128], strides = [1, 1, 1]} : vector<3x20x128xf32> to vector<3x16x128xf32>
    %43 = arith.addf %41, %42 : vector<3x16x128xf32>
    %cst_41 = arith.constant 0.233880758 : f32
    %44 = vector.broadcast %cst_41 : f32 to vector<3x16x128xf32>
    %45 = arith.mulf %44, %43 : vector<3x16x128xf32>
    %46 = arith.addf %40, %45 : vector<3x16x128xf32>
    %47 = vector.extract_strided_slice %33 {offsets = [0, 2, 0], sizes = [3, 16, 128], strides = [1, 1, 1]} : vector<3x20x128xf32> to vector<3x16x128xf32>
    %cst_42 = arith.constant 0.292081714 : f32
    %48 = vector.broadcast %cst_42 : f32 to vector<3x16x128xf32>
    %49 = arith.mulf %48, %47 : vector<3x16x128xf32>
    %50 = arith.addf %46, %49 : vector<3x16x128xf32>
    %51 = vector.shape_cast %50 : vector<3x16x128xf32> to vector<48x128xf32>
    %52 = vector.extract_strided_slice %35 {offsets = [0, 0], sizes = [1, 128], strides = [1, 1]} : vector<8x128xf32> to vector<1x128xf32>
    %c2_i32 = arith.constant 2 : i32
    %53 = tpu.dynamic_rotate %51 by %c2_i32 dim 1 : vector<48x128xf32>, i32 -> vector<48x128xf32>
    %54 = vector.broadcast %52 : vector<1x128xf32> to vector<48x128xf32>
    %55 = arith.mulf %54, %53 : vector<48x128xf32>
    %56 = vector.extract_strided_slice %35 {offsets = [1, 0], sizes = [1, 128], strides = [1, 1]} : vector<8x128xf32> to vector<1x128xf32>
    %c1_i32 = arith.constant 1 : i32
    %57 = tpu.dynamic_rotate %51 by %c1_i32 dim 1 : vector<48x128xf32>, i32 -> vector<48x128xf32>
    %58 = vector.broadcast %56 : vector<1x128xf32> to vector<48x128xf32>
    %59 = arith.mulf %58, %57 : vector<48x128xf32>
    %60 = arith.addf %55, %59 : vector<48x128xf32>
    %61 = vector.extract_strided_slice %35 {offsets = [2, 0], sizes = [1, 128], strides = [1, 1]} : vector<8x128xf32> to vector<1x128xf32>
    %62 = vector.broadcast %61 : vector<1x128xf32> to vector<48x128xf32>
    %63 = arith.mulf %62, %51 : vector<48x128xf32>
    %64 = arith.addf %60, %63 : vector<48x128xf32>
    %65 = vector.extract_strided_slice %35 {offsets = [3, 0], sizes = [1, 128], strides = [1, 1]} : vector<8x128xf32> to vector<1x128xf32>
    %c127_i32 = arith.constant 127 : i32
    %66 = tpu.dynamic_rotate %51 by %c127_i32 dim 1 : vector<48x128xf32>, i32 -> vector<48x128xf32>
    %67 = vector.broadcast %65 : vector<1x128xf32> to vector<48x128xf32>
    %68 = arith.mulf %67, %66 : vector<48x128xf32>
    %69 = arith.addf %64, %68 : vector<48x128xf32>
    %70 = vector.extract_strided_slice %35 {offsets = [4, 0], sizes = [1, 128], strides = [1, 1]} : vector<8x128xf32> to vector<1x128xf32>
    %c126_i32 = arith.constant 126 : i32
    %71 = tpu.dynamic_rotate %51 by %c126_i32 dim 1 : vector<48x128xf32>, i32 -> vector<48x128xf32>
    %72 = vector.broadcast %70 : vector<1x128xf32> to vector<48x128xf32>
    %73 = arith.mulf %72, %71 : vector<48x128xf32>
    %74 = arith.addf %69, %73 : vector<48x128xf32>
    %75 = vector.extract_strided_slice %34 {offsets = [0, 0, 0], sizes = [3, 16, 128], strides = [1, 1, 1]} : vector<3x20x128xf32> to vector<3x16x128xf32>
    %76 = vector.extract_strided_slice %34 {offsets = [0, 4, 0], sizes = [3, 16, 128], strides = [1, 1, 1]} : vector<3x20x128xf32> to vector<3x16x128xf32>
    %77 = arith.addf %75, %76 : vector<3x16x128xf32>
    %cst_43 = arith.constant 0.120078385 : f32
    %78 = vector.broadcast %cst_43 : f32 to vector<3x16x128xf32>
    %79 = arith.mulf %78, %77 : vector<3x16x128xf32>
    %80 = vector.extract_strided_slice %34 {offsets = [0, 1, 0], sizes = [3, 16, 128], strides = [1, 1, 1]} : vector<3x20x128xf32> to vector<3x16x128xf32>
    %81 = vector.extract_strided_slice %34 {offsets = [0, 3, 0], sizes = [3, 16, 128], strides = [1, 1, 1]} : vector<3x20x128xf32> to vector<3x16x128xf32>
    %82 = arith.addf %80, %81 : vector<3x16x128xf32>
    %cst_44 = arith.constant 0.233880758 : f32
    %83 = vector.broadcast %cst_44 : f32 to vector<3x16x128xf32>
    %84 = arith.mulf %83, %82 : vector<3x16x128xf32>
    %85 = arith.addf %79, %84 : vector<3x16x128xf32>
    %86 = vector.extract_strided_slice %34 {offsets = [0, 2, 0], sizes = [3, 16, 128], strides = [1, 1, 1]} : vector<3x20x128xf32> to vector<3x16x128xf32>
    %cst_45 = arith.constant 0.292081714 : f32
    %87 = vector.broadcast %cst_45 : f32 to vector<3x16x128xf32>
    %88 = arith.mulf %87, %86 : vector<3x16x128xf32>
    %89 = arith.addf %85, %88 : vector<3x16x128xf32>
    %90 = vector.shape_cast %89 : vector<3x16x128xf32> to vector<48x128xf32>
    %91 = vector.extract_strided_slice %35 {offsets = [0, 0], sizes = [1, 128], strides = [1, 1]} : vector<8x128xf32> to vector<1x128xf32>
    %c2_i32_46 = arith.constant 2 : i32
    %92 = tpu.dynamic_rotate %90 by %c2_i32_46 dim 1 : vector<48x128xf32>, i32 -> vector<48x128xf32>
    %93 = vector.broadcast %91 : vector<1x128xf32> to vector<48x128xf32>
    %94 = arith.mulf %93, %92 : vector<48x128xf32>
    %95 = vector.extract_strided_slice %35 {offsets = [1, 0], sizes = [1, 128], strides = [1, 1]} : vector<8x128xf32> to vector<1x128xf32>
    %c1_i32_47 = arith.constant 1 : i32
    %96 = tpu.dynamic_rotate %90 by %c1_i32_47 dim 1 : vector<48x128xf32>, i32 -> vector<48x128xf32>
    %97 = vector.broadcast %95 : vector<1x128xf32> to vector<48x128xf32>
    %98 = arith.mulf %97, %96 : vector<48x128xf32>
    %99 = arith.addf %94, %98 : vector<48x128xf32>
    %100 = vector.extract_strided_slice %35 {offsets = [2, 0], sizes = [1, 128], strides = [1, 1]} : vector<8x128xf32> to vector<1x128xf32>
    %101 = vector.broadcast %100 : vector<1x128xf32> to vector<48x128xf32>
    %102 = arith.mulf %101, %90 : vector<48x128xf32>
    %103 = arith.addf %99, %102 : vector<48x128xf32>
    %104 = vector.extract_strided_slice %35 {offsets = [3, 0], sizes = [1, 128], strides = [1, 1]} : vector<8x128xf32> to vector<1x128xf32>
    %c127_i32_48 = arith.constant 127 : i32
    %105 = tpu.dynamic_rotate %90 by %c127_i32_48 dim 1 : vector<48x128xf32>, i32 -> vector<48x128xf32>
    %106 = vector.broadcast %104 : vector<1x128xf32> to vector<48x128xf32>
    %107 = arith.mulf %106, %105 : vector<48x128xf32>
    %108 = arith.addf %103, %107 : vector<48x128xf32>
    %109 = vector.extract_strided_slice %35 {offsets = [4, 0], sizes = [1, 128], strides = [1, 1]} : vector<8x128xf32> to vector<1x128xf32>
    %c126_i32_49 = arith.constant 126 : i32
    %110 = tpu.dynamic_rotate %90 by %c126_i32_49 dim 1 : vector<48x128xf32>, i32 -> vector<48x128xf32>
    %111 = vector.broadcast %109 : vector<1x128xf32> to vector<48x128xf32>
    %112 = arith.mulf %111, %110 : vector<48x128xf32>
    %113 = arith.addf %108, %112 : vector<48x128xf32>
    %114 = arith.mulf %33, %33 : vector<3x20x128xf32>
    %115 = vector.extract_strided_slice %114 {offsets = [0, 0, 0], sizes = [3, 16, 128], strides = [1, 1, 1]} : vector<3x20x128xf32> to vector<3x16x128xf32>
    %116 = vector.extract_strided_slice %114 {offsets = [0, 4, 0], sizes = [3, 16, 128], strides = [1, 1, 1]} : vector<3x20x128xf32> to vector<3x16x128xf32>
    %117 = arith.addf %115, %116 : vector<3x16x128xf32>
    %cst_50 = arith.constant 0.120078385 : f32
    %118 = vector.broadcast %cst_50 : f32 to vector<3x16x128xf32>
    %119 = arith.mulf %118, %117 : vector<3x16x128xf32>
    %120 = vector.extract_strided_slice %114 {offsets = [0, 1, 0], sizes = [3, 16, 128], strides = [1, 1, 1]} : vector<3x20x128xf32> to vector<3x16x128xf32>
    %121 = vector.extract_strided_slice %114 {offsets = [0, 3, 0], sizes = [3, 16, 128], strides = [1, 1, 1]} : vector<3x20x128xf32> to vector<3x16x128xf32>
    %122 = arith.addf %120, %121 : vector<3x16x128xf32>
    %cst_51 = arith.constant 0.233880758 : f32
    %123 = vector.broadcast %cst_51 : f32 to vector<3x16x128xf32>
    %124 = arith.mulf %123, %122 : vector<3x16x128xf32>
    %125 = arith.addf %119, %124 : vector<3x16x128xf32>
    %126 = vector.extract_strided_slice %114 {offsets = [0, 2, 0], sizes = [3, 16, 128], strides = [1, 1, 1]} : vector<3x20x128xf32> to vector<3x16x128xf32>
    %cst_52 = arith.constant 0.292081714 : f32
    %127 = vector.broadcast %cst_52 : f32 to vector<3x16x128xf32>
    %128 = arith.mulf %127, %126 : vector<3x16x128xf32>
    %129 = arith.addf %125, %128 : vector<3x16x128xf32>
    %130 = vector.shape_cast %129 : vector<3x16x128xf32> to vector<48x128xf32>
    %131 = vector.extract_strided_slice %35 {offsets = [0, 0], sizes = [1, 128], strides = [1, 1]} : vector<8x128xf32> to vector<1x128xf32>
    %c2_i32_53 = arith.constant 2 : i32
    %132 = tpu.dynamic_rotate %130 by %c2_i32_53 dim 1 : vector<48x128xf32>, i32 -> vector<48x128xf32>
    %133 = vector.broadcast %131 : vector<1x128xf32> to vector<48x128xf32>
    %134 = arith.mulf %133, %132 : vector<48x128xf32>
    %135 = vector.extract_strided_slice %35 {offsets = [1, 0], sizes = [1, 128], strides = [1, 1]} : vector<8x128xf32> to vector<1x128xf32>
    %c1_i32_54 = arith.constant 1 : i32
    %136 = tpu.dynamic_rotate %130 by %c1_i32_54 dim 1 : vector<48x128xf32>, i32 -> vector<48x128xf32>
    %137 = vector.broadcast %135 : vector<1x128xf32> to vector<48x128xf32>
    %138 = arith.mulf %137, %136 : vector<48x128xf32>
    %139 = arith.addf %134, %138 : vector<48x128xf32>
    %140 = vector.extract_strided_slice %35 {offsets = [2, 0], sizes = [1, 128], strides = [1, 1]} : vector<8x128xf32> to vector<1x128xf32>
    %141 = vector.broadcast %140 : vector<1x128xf32> to vector<48x128xf32>
    %142 = arith.mulf %141, %130 : vector<48x128xf32>
    %143 = arith.addf %139, %142 : vector<48x128xf32>
    %144 = vector.extract_strided_slice %35 {offsets = [3, 0], sizes = [1, 128], strides = [1, 1]} : vector<8x128xf32> to vector<1x128xf32>
    %c127_i32_55 = arith.constant 127 : i32
    %145 = tpu.dynamic_rotate %130 by %c127_i32_55 dim 1 : vector<48x128xf32>, i32 -> vector<48x128xf32>
    %146 = vector.broadcast %144 : vector<1x128xf32> to vector<48x128xf32>
    %147 = arith.mulf %146, %145 : vector<48x128xf32>
    %148 = arith.addf %143, %147 : vector<48x128xf32>
    %149 = vector.extract_strided_slice %35 {offsets = [4, 0], sizes = [1, 128], strides = [1, 1]} : vector<8x128xf32> to vector<1x128xf32>
    %c126_i32_56 = arith.constant 126 : i32
    %150 = tpu.dynamic_rotate %130 by %c126_i32_56 dim 1 : vector<48x128xf32>, i32 -> vector<48x128xf32>
    %151 = vector.broadcast %149 : vector<1x128xf32> to vector<48x128xf32>
    %152 = arith.mulf %151, %150 : vector<48x128xf32>
    %153 = arith.addf %148, %152 : vector<48x128xf32>
    %154 = arith.mulf %34, %34 : vector<3x20x128xf32>
    %155 = vector.extract_strided_slice %154 {offsets = [0, 0, 0], sizes = [3, 16, 128], strides = [1, 1, 1]} : vector<3x20x128xf32> to vector<3x16x128xf32>
    %156 = vector.extract_strided_slice %154 {offsets = [0, 4, 0], sizes = [3, 16, 128], strides = [1, 1, 1]} : vector<3x20x128xf32> to vector<3x16x128xf32>
    %157 = arith.addf %155, %156 : vector<3x16x128xf32>
    %cst_57 = arith.constant 0.120078385 : f32
    %158 = vector.broadcast %cst_57 : f32 to vector<3x16x128xf32>
    %159 = arith.mulf %158, %157 : vector<3x16x128xf32>
    %160 = vector.extract_strided_slice %154 {offsets = [0, 1, 0], sizes = [3, 16, 128], strides = [1, 1, 1]} : vector<3x20x128xf32> to vector<3x16x128xf32>
    %161 = vector.extract_strided_slice %154 {offsets = [0, 3, 0], sizes = [3, 16, 128], strides = [1, 1, 1]} : vector<3x20x128xf32> to vector<3x16x128xf32>
    %162 = arith.addf %160, %161 : vector<3x16x128xf32>
    %cst_58 = arith.constant 0.233880758 : f32
    %163 = vector.broadcast %cst_58 : f32 to vector<3x16x128xf32>
    %164 = arith.mulf %163, %162 : vector<3x16x128xf32>
    %165 = arith.addf %159, %164 : vector<3x16x128xf32>
    %166 = vector.extract_strided_slice %154 {offsets = [0, 2, 0], sizes = [3, 16, 128], strides = [1, 1, 1]} : vector<3x20x128xf32> to vector<3x16x128xf32>
    %cst_59 = arith.constant 0.292081714 : f32
    %167 = vector.broadcast %cst_59 : f32 to vector<3x16x128xf32>
    %168 = arith.mulf %167, %166 : vector<3x16x128xf32>
    %169 = arith.addf %165, %168 : vector<3x16x128xf32>
    %170 = vector.shape_cast %169 : vector<3x16x128xf32> to vector<48x128xf32>
    %171 = vector.extract_strided_slice %35 {offsets = [0, 0], sizes = [1, 128], strides = [1, 1]} : vector<8x128xf32> to vector<1x128xf32>
    %c2_i32_60 = arith.constant 2 : i32
    %172 = tpu.dynamic_rotate %170 by %c2_i32_60 dim 1 : vector<48x128xf32>, i32 -> vector<48x128xf32>
    %173 = vector.broadcast %171 : vector<1x128xf32> to vector<48x128xf32>
    %174 = arith.mulf %173, %172 : vector<48x128xf32>
    %175 = vector.extract_strided_slice %35 {offsets = [1, 0], sizes = [1, 128], strides = [1, 1]} : vector<8x128xf32> to vector<1x128xf32>
    %c1_i32_61 = arith.constant 1 : i32
    %176 = tpu.dynamic_rotate %170 by %c1_i32_61 dim 1 : vector<48x128xf32>, i32 -> vector<48x128xf32>
    %177 = vector.broadcast %175 : vector<1x128xf32> to vector<48x128xf32>
    %178 = arith.mulf %177, %176 : vector<48x128xf32>
    %179 = arith.addf %174, %178 : vector<48x128xf32>
    %180 = vector.extract_strided_slice %35 {offsets = [2, 0], sizes = [1, 128], strides = [1, 1]} : vector<8x128xf32> to vector<1x128xf32>
    %181 = vector.broadcast %180 : vector<1x128xf32> to vector<48x128xf32>
    %182 = arith.mulf %181, %170 : vector<48x128xf32>
    %183 = arith.addf %179, %182 : vector<48x128xf32>
    %184 = vector.extract_strided_slice %35 {offsets = [3, 0], sizes = [1, 128], strides = [1, 1]} : vector<8x128xf32> to vector<1x128xf32>
    %c127_i32_62 = arith.constant 127 : i32
    %185 = tpu.dynamic_rotate %170 by %c127_i32_62 dim 1 : vector<48x128xf32>, i32 -> vector<48x128xf32>
    %186 = vector.broadcast %184 : vector<1x128xf32> to vector<48x128xf32>
    %187 = arith.mulf %186, %185 : vector<48x128xf32>
    %188 = arith.addf %183, %187 : vector<48x128xf32>
    %189 = vector.extract_strided_slice %35 {offsets = [4, 0], sizes = [1, 128], strides = [1, 1]} : vector<8x128xf32> to vector<1x128xf32>
    %c126_i32_63 = arith.constant 126 : i32
    %190 = tpu.dynamic_rotate %170 by %c126_i32_63 dim 1 : vector<48x128xf32>, i32 -> vector<48x128xf32>
    %191 = vector.broadcast %189 : vector<1x128xf32> to vector<48x128xf32>
    %192 = arith.mulf %191, %190 : vector<48x128xf32>
    %193 = arith.addf %188, %192 : vector<48x128xf32>
    %194 = arith.mulf %33, %34 : vector<3x20x128xf32>
    %195 = vector.extract_strided_slice %194 {offsets = [0, 0, 0], sizes = [3, 16, 128], strides = [1, 1, 1]} : vector<3x20x128xf32> to vector<3x16x128xf32>
    %196 = vector.extract_strided_slice %194 {offsets = [0, 4, 0], sizes = [3, 16, 128], strides = [1, 1, 1]} : vector<3x20x128xf32> to vector<3x16x128xf32>
    %197 = arith.addf %195, %196 : vector<3x16x128xf32>
    %cst_64 = arith.constant 0.120078385 : f32
    %198 = vector.broadcast %cst_64 : f32 to vector<3x16x128xf32>
    %199 = arith.mulf %198, %197 : vector<3x16x128xf32>
    %200 = vector.extract_strided_slice %194 {offsets = [0, 1, 0], sizes = [3, 16, 128], strides = [1, 1, 1]} : vector<3x20x128xf32> to vector<3x16x128xf32>
    %201 = vector.extract_strided_slice %194 {offsets = [0, 3, 0], sizes = [3, 16, 128], strides = [1, 1, 1]} : vector<3x20x128xf32> to vector<3x16x128xf32>
    %202 = arith.addf %200, %201 : vector<3x16x128xf32>
    %cst_65 = arith.constant 0.233880758 : f32
    %203 = vector.broadcast %cst_65 : f32 to vector<3x16x128xf32>
    %204 = arith.mulf %203, %202 : vector<3x16x128xf32>
    %205 = arith.addf %199, %204 : vector<3x16x128xf32>
    %206 = vector.extract_strided_slice %194 {offsets = [0, 2, 0], sizes = [3, 16, 128], strides = [1, 1, 1]} : vector<3x20x128xf32> to vector<3x16x128xf32>
    %cst_66 = arith.constant 0.292081714 : f32
    %207 = vector.broadcast %cst_66 : f32 to vector<3x16x128xf32>
    %208 = arith.mulf %207, %206 : vector<3x16x128xf32>
    %209 = arith.addf %205, %208 : vector<3x16x128xf32>
    %210 = vector.shape_cast %209 : vector<3x16x128xf32> to vector<48x128xf32>
    %211 = vector.extract_strided_slice %35 {offsets = [0, 0], sizes = [1, 128], strides = [1, 1]} : vector<8x128xf32> to vector<1x128xf32>
    %c2_i32_67 = arith.constant 2 : i32
    %212 = tpu.dynamic_rotate %210 by %c2_i32_67 dim 1 : vector<48x128xf32>, i32 -> vector<48x128xf32>
    %213 = vector.broadcast %211 : vector<1x128xf32> to vector<48x128xf32>
    %214 = arith.mulf %213, %212 : vector<48x128xf32>
    %215 = vector.extract_strided_slice %35 {offsets = [1, 0], sizes = [1, 128], strides = [1, 1]} : vector<8x128xf32> to vector<1x128xf32>
    %c1_i32_68 = arith.constant 1 : i32
    %216 = tpu.dynamic_rotate %210 by %c1_i32_68 dim 1 : vector<48x128xf32>, i32 -> vector<48x128xf32>
    %217 = vector.broadcast %215 : vector<1x128xf32> to vector<48x128xf32>
    %218 = arith.mulf %217, %216 : vector<48x128xf32>
    %219 = arith.addf %214, %218 : vector<48x128xf32>
    %220 = vector.extract_strided_slice %35 {offsets = [2, 0], sizes = [1, 128], strides = [1, 1]} : vector<8x128xf32> to vector<1x128xf32>
    %221 = vector.broadcast %220 : vector<1x128xf32> to vector<48x128xf32>
    %222 = arith.mulf %221, %210 : vector<48x128xf32>
    %223 = arith.addf %219, %222 : vector<48x128xf32>
    %224 = vector.extract_strided_slice %35 {offsets = [3, 0], sizes = [1, 128], strides = [1, 1]} : vector<8x128xf32> to vector<1x128xf32>
    %c127_i32_69 = arith.constant 127 : i32
    %225 = tpu.dynamic_rotate %210 by %c127_i32_69 dim 1 : vector<48x128xf32>, i32 -> vector<48x128xf32>
    %226 = vector.broadcast %224 : vector<1x128xf32> to vector<48x128xf32>
    %227 = arith.mulf %226, %225 : vector<48x128xf32>
    %228 = arith.addf %223, %227 : vector<48x128xf32>
    %229 = vector.extract_strided_slice %35 {offsets = [4, 0], sizes = [1, 128], strides = [1, 1]} : vector<8x128xf32> to vector<1x128xf32>
    %c126_i32_70 = arith.constant 126 : i32
    %230 = tpu.dynamic_rotate %210 by %c126_i32_70 dim 1 : vector<48x128xf32>, i32 -> vector<48x128xf32>
    %231 = vector.broadcast %229 : vector<1x128xf32> to vector<48x128xf32>
    %232 = arith.mulf %231, %230 : vector<48x128xf32>
    %233 = arith.addf %228, %232 : vector<48x128xf32>
    %234 = arith.mulf %74, %74 : vector<48x128xf32>
    %235 = arith.mulf %113, %113 : vector<48x128xf32>
    %236 = arith.mulf %74, %113 : vector<48x128xf32>
    %237 = arith.subf %153, %234 : vector<48x128xf32>
    %238 = arith.subf %193, %235 : vector<48x128xf32>
    %239 = arith.subf %233, %236 : vector<48x128xf32>
    %cst_71 = arith.constant 2.000000e+00 : f32
    %240 = vector.broadcast %cst_71 : f32 to vector<48x128xf32>
    %241 = arith.mulf %240, %236 : vector<48x128xf32>
    %cst_72 = arith.constant 9.99999974E-5 : f32
    %242 = vector.broadcast %cst_72 : f32 to vector<48x128xf32>
    %243 = arith.addf %241, %242 : vector<48x128xf32>
    %cst_73 = arith.constant 2.000000e+00 : f32
    %244 = vector.broadcast %cst_73 : f32 to vector<48x128xf32>
    %245 = arith.mulf %244, %239 : vector<48x128xf32>
    %cst_74 = arith.constant 8.99999984E-4 : f32
    %246 = vector.broadcast %cst_74 : f32 to vector<48x128xf32>
    %247 = arith.addf %245, %246 : vector<48x128xf32>
    %248 = arith.mulf %243, %247 : vector<48x128xf32>
    %249 = arith.addf %234, %235 : vector<48x128xf32>
    %cst_75 = arith.constant 9.99999974E-5 : f32
    %250 = vector.broadcast %cst_75 : f32 to vector<48x128xf32>
    %251 = arith.addf %249, %250 : vector<48x128xf32>
    %252 = arith.addf %237, %238 : vector<48x128xf32>
    %cst_76 = arith.constant 8.99999984E-4 : f32
    %253 = vector.broadcast %cst_76 : f32 to vector<48x128xf32>
    %254 = arith.addf %252, %253 : vector<48x128xf32>
    %255 = arith.mulf %251, %254 : vector<48x128xf32>
    %256 = tpu.reciprocal %255 {approx = true} : vector<48x128xf32> -> vector<48x128xf32>
    %257 = arith.mulf %255, %256 : vector<48x128xf32>
    %cst_77 = arith.constant 2.000000e+00 : f32
    %258 = vector.broadcast %cst_77 : f32 to vector<48x128xf32>
    %259 = arith.subf %258, %257 : vector<48x128xf32>
    %260 = arith.mulf %256, %259 : vector<48x128xf32>
    %261 = arith.mulf %248, %260 : vector<48x128xf32>
    %cst_78 = arith.constant 1.000000e+00 : f32
    %262 = vector.broadcast %cst_78 : f32 to vector<48x128xf32>
    %263 = arith.subf %262, %261 : vector<48x128xf32>
    %cst_79 = arith.constant 5.000000e-01 : f32
    %264 = vector.broadcast %cst_79 : f32 to vector<48x128xf32>
    %265 = arith.mulf %264, %263 : vector<48x128xf32>
    %cst_80 = arith.constant 0.000000e+00 : f32
    %cst_81 = arith.constant 1.000000e+00 : f32
    %266 = vector.broadcast %cst_80 : f32 to vector<48x128xf32>
    %267 = arith.maximumf %266, %265 : vector<48x128xf32>
    %268 = vector.broadcast %cst_81 : f32 to vector<48x128xf32>
    %269 = arith.minimumf %268, %267 : vector<48x128xf32>
    %270 = tpu.iota {dimensions = array<i32: 1>} : vector<48x128xi32>
    %c16_i32 = arith.constant 16 : i32
    %271 = vector.broadcast %c16_i32 : i32 to vector<48x128xi32>
    %272 = arith.cmpi slt, %270, %271 : vector<48x128xi32>
    %cst_82 = arith.constant 0.000000e+00 : f32
    %273 = vector.broadcast %cst_82 : f32 to vector<48x128xf32>
    %274 = arith.select %272, %269, %273 : vector<48x128xi1>, vector<48x128xf32>
    %275 = vector.shape_cast %274 : vector<48x128xf32> to vector<1x48x128xf32>
    %cst_83 = arith.constant dense<0.000000e+00> : vector<1xf32>
    %276 = vector.multi_reduction <add>, %275, %cst_83 [1, 2] : vector<1x48x128xf32> to vector<1xf32>
    %277 = vector.shape_cast %276 : vector<1xf32> to vector<1x1x1xf32>
    %278 = vector.extract %277[0, 0, 0] : f32 from vector<1x1x1xf32>
    %279 = vector.broadcast %278 : f32 to vector<1x1xf32>
    %280 = tpu.iota {dimensions = array<i32: 1>} : vector<8x128xi32>
    %c0_i32 = arith.constant 0 : i32
    %281 = vector.broadcast %c0_i32 : i32 to vector<8x128xi32>
    %282 = arith.cmpi eq, %280, %281 : vector<8x128xi32>
    %cst_84 = arith.constant 0.000000e+00 : f32
    %283 = vector.broadcast %cst_84 : f32 to vector<8x128xf32>
    %284 = vector.shape_cast %8 : vector<1x1xf32> to vector<1x1xf32>
    %285 = vector.broadcast %284 : vector<1x1xf32> to vector<8x128xf32>
    %286 = arith.select %282, %285, %283 : vector<8x128xi1>, vector<8x128xf32>
    %c1_i32_85 = arith.constant 1 : i32
    %287 = vector.broadcast %c1_i32_85 : i32 to vector<8x128xi32>
    %288 = arith.cmpi eq, %280, %287 : vector<8x128xi32>
    %289 = vector.shape_cast %14 : vector<1x1xf32> to vector<1x1xf32>
    %290 = vector.broadcast %289 : vector<1x1xf32> to vector<8x128xf32>
    %291 = arith.select %288, %290, %286 : vector<8x128xi1>, vector<8x128xf32>
    %c2_i32_86 = arith.constant 2 : i32
    %292 = vector.broadcast %c2_i32_86 : i32 to vector<8x128xi32>
    %293 = arith.cmpi eq, %280, %292 : vector<8x128xi32>
    %294 = vector.shape_cast %279 : vector<1x1xf32> to vector<1x1xf32>
    %295 = vector.broadcast %294 : vector<1x1xf32> to vector<8x128xf32>
    %296 = arith.select %293, %295, %291 : vector<8x128xi1>, vector<8x128xf32>
    %c0_87 = arith.constant 0 : index
    %c0_88 = arith.constant 0 : index
    %297 = vector.load %arg4[%c0_87, %c0_88] : memref<8x128xf32, #tpu.memory_space<vmem>>, vector<8x128xf32>
    tpu.vector_store %arg4[%c0_87, %c0_88], %296 {strides = array<i32>} : memref<8x128xf32, #tpu.memory_space<vmem>>, vector<8x128xf32>,
    return
  }
  func.func @transform_0(%arg0: i32) -> (i32, i32) {
    %c0_i32 = arith.constant 0 : i32
    %c0_i32_0 = arith.constant 0 : i32
    %c0_i32_1 = arith.constant 0 : i32
    return %c0_i32, %c0_i32_0 : i32, i32
  }
  func.func @transform_1(%arg0: i32) -> (i32, i32, i32) {
    %c0_i32 = arith.constant 0 : i32
    %c0_i32_0 = arith.constant 0 : i32
    %c0_i32_1 = arith.constant 0 : i32
    return %arg0, %c0_i32, %c0_i32_0 : i32, i32, i32
  }
  func.func @transform_2(%arg0: i32) -> (i32, i32, i32) {
    %c0_i32 = arith.constant 0 : i32
    %c0_i32_0 = arith.constant 0 : i32
    %c0_i32_1 = arith.constant 0 : i32
    return %arg0, %c0_i32, %c0_i32_0 : i32, i32, i32
  }
  func.func @transform_3(%arg0: i32) -> (i32, i32) {
    %c0_i32 = arith.constant 0 : i32
    %c0_i32_0 = arith.constant 0 : i32
    return %arg0, %c0_i32 : i32, i32
  }
}

</mosaic_0001>

<bundles_post_ra>
// kernel: tpu_custom_call.1
= control target key start
LH: loop header
LB: loop body
LE: loop exit
PB: predicated region body
PF: predicated region fallthrough
CT: control target
= control target key end

     0   :  { %8 = vsyncpa [#allocation5], 0  ;;  %s3952_s0 = inlined_call_operand.hbm [shape: f32[8,128], index: 0, kind: input, shape index: {}]   ;;  %s3953_s1 = inlined_call_operand.hbm [shape: f32[6,16,128], index: 1, kind: input, shape index: {}]   ;;  %s3954_s2 = inlined_call_operand.hbm [shape: f32[6,16,128], index: 2, kind: input, shape index: {}]   ;;  %s3955_s3 = inlined_call_operand.hbm [shape: f32[16,128], index: 3, kind: output, shape index: {}]  }
   0x1   :  { %9 = vsyncpa [#allocation8], 0 }
   0x2   :  { %11 = vsyncpa [#allocation8 + $0x1], 0 }
   0x3   :  { %12 = vsyncpa [#allocation6], 0 }
   0x4   :  { %14 = vsyncpa [#allocation6 + $0x1], 0  ;;  %s2344_s12 = smov 0   ;;  %s2346_s13 = smov 0  }
   0x5   :  { %s2348_s14 = smov 0   ;;  %s2350_s15 = smov 0  }
   0x6 LB: > { %s2365_s16 = sadd.s32 1, %s2312_s15   ;;  %s48_s17 = sadd.s32 1, %s2308_s14  ;;  %s2312_s15 = sphi %s2350_s15, %s4057_s15   ;;  %s2308_s14 = sphi %s2348_s14, %s4056_s14   ;;  %s2304_s13 = sphi %s2346_s13, %s4055_s13   ;;  %s2300_s12 = sphi %s2344_s12, %s4054_s12  }
   0x7   : > { %s45_s18 = ssub.s32 %s2312_s15, %s2365_s16  ;;  %p55_p0 = scmp.ne.s32.totalorder %s2308_s14, %s2304_s13 }
   0x8   : > { %p46_p1 = scmp.eq.s32.totalorder %s45_s18, 0  ;;  %p56_p2 = scmp.eq.s32.totalorder %s2312_s15, 0 }
   0x9   : > { %p2096_p4 = scmp.lt.s32.totalorder %s2312_s15, 2  ;;  %s148_s20 = sand.u32 1, %s2312_s15  }
   0xa   : > { %s2376_s19 = scalar_select %p46_p1, %s2308_s14, %s48_s17  }
   0xb   : > { %p57_p5 = por %p56_p2, %p55_p0  ;;  %s150_s21 = sand.u32 1, %s2308_s14  }
   0xc   : > { %s2383_s22 = smul.u32 48, %s150_s21  ;;  %s2400_s30 = scalar_lea.sflag [#allocation8], %s148_s20 }
   0xd   : > { %p2385_p6 = pnand %p2096_p4, %p57_p5  ;;  %s2059_s24 = smul.u32 768, %s2312_s15 }
   0xe   : > { %s152_s28 = scalar_lea.vmem [#allocation7], %s2383_s22  ;;  %s2167_s7 = scalar_lea.hbm %s3953_s1, 1536 }
   0xf   : > { %s2395_s27 = scalar_lea.hbm %s3953_s1, %s2059_s24  ;;  %s160_s29 = sshll.u32 %s152_s28, 4  ;;  %s2398_s29 = int_to_ptr.vmem [resolvable:$true] %s160_s29 }
  0x10   : > { %s2162_s4 = scalar_lea.hbm %s2395_s27, 768  ;;  %p2164_p8 = pneg %p2385_p6 }
  0x11   : > { %p2163_p7 = scmp.ne.s32.totalorder %s2395_s27, %s2162_s4  ;;  %p2168_p11 = scmp.lt.s32.totalorder %s2395_s27, %s3953_s1 }
  0x12   : > { %p2169_p12 = scmp.lt.s32.totalorder %s2167_s7, %s2162_s4 }
  0x13   : > { %p2165_p9 = pnand %p2164_p8, %p2163_p7 }
  0x14   : > { %p2170_p13 = por %p2169_p12, %p2168_p11 }
  0x15   : > { %p2166_p10 = pneg %p2165_p9 }
  0x17   : > { %p2171_p1 = pnand %p2170_p13, %p2166_p10 }
  0x19   : > { %2174 = shalt.err (!%p2171_p1)
}
  0x1a   : > { %s2175_s10 = scalar_lea.vmem %s2398_s29, 768  ;;  %s2314_s11 = smov [#allocation7]  }
  0x1b   : > { %p2176_p2 = scmp.ne.s32.totalorder %s2398_s29, %s2175_s10  ;;  %s2180_s17 = sshll.u32 %s2314_s11, 4  ;;  %s2181_s17 = int_to_ptr.vmem [resolvable:$false] %s2180_s17 }
  0x1c   : > { %s2182_s18 = scalar_lea.vmem %s2181_s17, 1536  ;;  %p2183_p7 = scmp.lt.s32.totalorder %s2398_s29, %s2181_s17 }
  0x1d   : > { %p2178_p4 = pnand %p2176_p2, %p2164_p8  ;;  %p2184_p9 = scmp.lt.s32.totalorder %s2182_s18, %s2175_s10 }
  0x1f   : > { %p2179_p5 = pneg %p2178_p4  ;;  %p2185_p3 = por %p2184_p9, %p2183_p7 }
  0x21   : > { %p2186_p11 = pnand %p2185_p3, %p2179_p5 }
  0x23   : > { %2189 = shalt.err (!%p2186_p11)
}
  0x24   : > { %s2315_s20 = smov 128   ;;  %s2316_s21 = smov 8  }
  0x25   : > { %2087 = dma.hbm_to_vmem [thread:$0]  (!%p2385_p6), %s2395_s27, 768, %s2398_s29, %s2400_s30, %s2315_s20, %s2315_s20, %s2316_s21  }
  0x26   : > { %s2431_s25 = sadd.s32 4294967295, %s2312_s15   ;;  %s2040_s26 = sadd.s32 4294967294, %s2312_s15  }
  0x27   : > { %p61_p3 = scmp.ne.s32.totalorder %s2304_s13, %s2300_s12  ;;  %p3956_p10 = scmp.eq.s32.totalorder %s2431_s25, 0 }
  0x28   : > { %p111_p12 = scmp.eq.s32.totalorder %s2431_s25, 1  ;;  %p117_p13 = scmp.eq.s32.totalorder %s2040_s26, 1 }
  0x29   : > { %p2440_p1 = por %p3956_p10, %p61_p3  ;;  %p2041_p2 = scmp.ge.s32.totalorder %s2312_s15, 1 }
  0x2a   : > { %p2448_p4 = por %p111_p12, %p55_p0  ;;  %p2452_p5 = por %p117_p13, %p61_p3 }
  0x2b   : > { %s3980_s28 = scalar_select %p2440_p1, 1, 0 }
  0x2c   : > { %s3981_s27 = scalar_select %p2448_p4, 1, 0 }
  0x2d   : > { %s3982_s29 = scalar_select %p2452_p5, 1, 0 }
  0x2e   : > { %p124_p7 = scmp.lt.s32.totalorder %s2312_s15, 3  ;;  %s2317_s5 = smov [#allocation4]  }
  0x2f   : > { %s137_s6 = sshll.u32 %s2317_s5, 4  ;;  %s2466_s9 = scalar_lea.hbm %s3954_s2, %s2059_s24  ;;  %s2473_s6 = int_to_ptr.vmem [resolvable:$true] %s137_s6 }
  0x30   : > { %p2457_p9 = pnand %p2041_p2, %p124_p7  ;;  %s174_s10 = scalar_lea.vmem [#allocation9], %s2383_s22 }
  0x31   : > { %s182_s11 = sshll.u32 %s174_s10, 4  ;;  %s2190_s18 = scalar_lea.hbm %s2466_s9, 768  ;;  %s2471_s11 = int_to_ptr.vmem [resolvable:$true] %s182_s11 }
  0x32   : > { %s3983_s4 = scalar_select %p2457_p9, 1, 0 }
  0x33   : > { %p2080_p0 = pneg %p2457_p9  ;;  %p2191_p3 = scmp.ne.s32.totalorder %s2466_s9, %s2190_s18 }
  0x34   : > { %s2195_s22 = scalar_lea.hbm %s3954_s2, 1536  ;;  %p2196_p2 = scmp.lt.s32.totalorder %s2466_s9, %s3954_s2 }
  0x35   : > { %p2477_p11 = pnand %p2080_p0, %p3956_p10  ;;  %p2193_p12 = pnand %p2191_p3, %p2164_p8 }
  0x36   : > { %p2197_p7 = scmp.lt.s32.totalorder %s2195_s22, %s2190_s18 }
  0x37   : > { %p2194_p13 = pneg %p2193_p12 }
  0x38   : > { %p2198_p5 = por %p2197_p7, %p2196_p2 }
  0x3a   : > { %p2199_p0 = pnand %p2198_p5, %p2194_p13 }
  0x3c   : > { %2202 = shalt.err (!%p2199_p0)
}
  0x3d   : > { %s2203_s8 = scalar_lea.vmem %s2471_s11, 768  ;;  %s2318_s10 = smov [#allocation9]  }
  0x3e   : > { %p2204_p10 = scmp.ne.s32.totalorder %s2471_s11, %s2203_s8  ;;  %s2208_s24 = sshll.u32 %s2318_s10, 4  ;;  %s2209_s24 = int_to_ptr.vmem [resolvable:$false] %s2208_s24 }
  0x3f   : > { %s2210_s26 = scalar_lea.vmem %s2209_s24, 1536  ;;  %p2211_p4 = scmp.lt.s32.totalorder %s2471_s11, %s2209_s24 }
  0x40   : > { %p2206_p3 = pnand %p2204_p10, %p2164_p8  ;;  %p2212_p1 = scmp.lt.s32.totalorder %s2210_s26, %s2203_s8 }
  0x42   : > { %p2207_p12 = pneg %p2206_p3  ;;  %p2213_p9 = por %p2212_p1, %p2211_p4 }
  0x44   : > { %p2214_p2 = pnand %p2213_p9, %p2207_p12 }
  0x46   : > { %2217 = shalt.err (!%p2214_p2)
}
  0x47   : > { %2090 = dma.hbm_to_vmem [thread:$0]  (!%p2385_p6), %s2466_s9, 768, %s2471_s11, %s2400_s30, %s2315_s20, %s2315_s20, %s2316_s21  }
  0x48   : > { %p2220_p8 = pneg %p2477_p11  ;;  %s2229_s18 = scalar_lea.vmem %s2473_s6, 128 }
  0x49   : > { %p2230_p10 = scmp.ne.s32.totalorder %s2473_s6, %s2229_s18  ;;  %p2237_p5 = scmp.lt.s32.totalorder %s2473_s6, %s2473_s6 }
  0x4a   : > { %p2238_p9 = scmp.lt.s32.totalorder %s2229_s18, %s2229_s18 }
  0x4b   : > { %p2232_p1 = pnand %p2230_p10, %p2220_p8 }
  0x4c   : > { %p2239_p13 = por %p2238_p9, %p2237_p5 }
  0x4d   : > { %p2233_p4 = pneg %p2232_p1 }
  0x4f   : > { %p2240_p7 = pnand %p2239_p13, %p2233_p4 }
  0x51   : > { %2243 = shalt.err (!%p2240_p7)
}
  0x52   : > { %2083 = dma.hbm_to_vmem [thread:$0]  (!%p2477_p11), %s3952_s0, 128, %s2473_s6, [#allocation5]  }
  0x53   : > { %p3985_p6 = scmp.ne.s32.totalorder %s3983_s4, 0 }
  0x55   : > { %194 = sbr.rel (%p3985_p6) target bundleno = 732 (0x2dc), region = 32 }
  0x5a   : > { %p3986_p0 = scmp.eq.s32.totalorder %s2431_s25, 0 }
  0x5c   : > { %2287 = dma.done.wait (%p3986_p0), [#allocation5], 128   ;;  %p3987_p3 = pmov %p3986_p0 }
  0x5d   : > { %s200_s30 = sand.u32 1, %s2431_s25   ;;  %s2527_s20 = sand.u32 1, %s2304_s13  }
  0x5e   : > { %2289 = vsyncadd (%p3987_p3), [#allocation5], 4294967168  ;;  %s2063_s21 = smul.u32 48, %s2527_s20  ;;  %s201_s9 = scalar_lea.sflag [#allocation8], %s200_s30 }
  0x5f   : > { %p3988_p11 = scmp.ne.s32.totalorder %s3980_s28, 0 }
  0x60   : > { %s204_s11 = scalar_lea.vmem [#allocation7], %s2063_s21 }
  0x61   : > { %2291 = dma.done.wait (%p3988_p11), %s201_s9, 1536  }
  0x62   : > { %2293 = vsyncadd (%p3988_p11), %s201_s9, 4294965760  ;;  %v243_v0 = vld [vmem:[%s204_s11] sm:$0xff]  ;;  %v244_v1 = vld [vmem:[%s204_s11 + $0x8] sm:$0xff]  ;;  %s213_s4 = scalar_lea.vmem [#allocation9], %s2063_s21  ;;  %vm365_vm0 = vcmask 1043456   ;;  %vm399_vm1 = vcmask 1045504  }
  0x63   : > { %v245_v2 = vld [vmem:[%s204_s11 + $0x10] sm:$0xff]  ;;  %v246_v3 = vld [vmem:[%s204_s11 + $0x18] sm:$0xff]  ;;  %v247_v4 = vld [vmem:[%s204_s11 + $0x20] sm:$0xff]  ;;  %301 = vst [vmem:[#allocation2 + $0x2] sm:$0xff] %v243_v0  ;;  %vm451_vm2 = vcmask 1046528   ;;  %s2319_s28 = smov 2  }
  0x64   : > { %v248_v5 = vld [vmem:[%s204_s11 + $0x28] sm:$0xff]  ;;  %302 = vst [vmem:[#allocation2 + $0xa] sm:$0xff] %v244_v1  ;;  %303 = vst [vmem:[#allocation2 + $0x1a] sm:$0xff] %v245_v2  ;;  %v249_v6 = vld [vmem:[%s213_s4] sm:$0xff]  ;;  %s2320_s6 = smov 1   ;;  %s2321_s17 = smov 127  }
  0x65   : > { %307 = vst [vmem:[#allocation2 - $0x2] sm:$0x4] %v243_v0  ;;  %308 = vst [vmem:[#allocation2 + $0x16] sm:$0x4] %v245_v2  ;;  %v250_v7 = vld [vmem:[%s213_s4 + $0x8] sm:$0xff]  ;;  %v251_v8 = vld [vmem:[%s213_s4 + $0x10] sm:$0xff]  ;;  %v255_v12 = vsub.f32 %v243_v0, %v249_v6 }
  0x66   : > { %310 = vst [vmem:[#allocation2] sm:$0x2] %v243_v0  ;;  %311 = vst [vmem:[#allocation2 + $0x18] sm:$0x2] %v245_v2  ;;  %v252_v9 = vld [vmem:[%s213_s4 + $0x18] sm:$0xff]  ;;  %v253_v10 = vld [vmem:[%s213_s4 + $0x20] sm:$0xff]  ;;  %v256_v13 = vsub.f32 %v244_v1, %v250_v7  ;;  %v257_v14 = vsub.f32 %v245_v2, %v251_v8 }
  0x67   : > { %313 = vst [vmem:[#allocation2 + $0xc] sm:$0x40] %v244_v1  ;;  %316 = vst [vmem:[#allocation2 + $0xe] sm:$0x20] %v244_v1  ;;  %v254_v11 = vld [vmem:[%s213_s4 + $0x28] sm:$0xff]  ;;  %v258_v15 = vsub.f32 %v246_v3, %v252_v9  ;;  %v259_v16 = vsub.f32 %v247_v4, %v253_v10  ;;  %v261_v18 = vmul.f32 %v255_v12, %v255_v12  ;;  %s2322_s5 = smov 126  }
  0x68   : > { %304 = vst [vmem:[#allocation2 + $0x22] sm:$0xff] %v246_v3  ;;  %305 = vst [vmem:[#allocation2 + $0x32] sm:$0xff] %v247_v4  ;;  %v260_v17 = vsub.f32 %v248_v5, %v254_v11  ;;  %v262_v19 = vmul.f32 %v256_v13, %v256_v13  ;;  %v263_v20 = vmul.f32 %v257_v14, %v257_v14  ;;  %v281_v21 = vand.u32 2147483647, %v255_v12  ;;  %s2050_s7 = sshll.u32 %s2527_s20, 3  ;;  %s2052_s24 = sshll.u32 %s2431_s25, 7 }
  0x69   : > { %306 = vst [vmem:[#allocation2 + $0x3a] sm:$0xff] %v248_v5  ;;  %309 = vst [vmem:[#allocation2 + $0x2e] sm:$0x4] %v247_v4  ;;  %v264_v22 = vmul.f32 %v258_v15, %v258_v15  ;;  %v282_v23 = vand.u32 2147483647, %v256_v13  ;;  %v265_v28 = vmul.f32 %v259_v16, %v259_v16  ;;  %s240_s26 = scalar_lea.vmem [#allocation10], %s2050_s7  ;;  %s3915_s21 = scalar_lea.hbm %s3955_s3, %s2052_s24 }
  0x6a   : > { %312 = vst [vmem:[#allocation2 + $0x30] sm:$0x2] %v247_v4  ;;  %314 = vst [vmem:[#allocation2 + $0x24] sm:$0x40] %v246_v3  ;;  %v267_v24 = vadd.f32 %v262_v19, %v261_v18  ;;  %v283_v25 = vand.u32 2147483647, %v257_v14  ;;  %v266_v29 = vmul.f32 %v260_v17, %v260_v17 }
  0x6b   : > { %315 = vst [vmem:[#allocation2 + $0x3c] sm:$0x40] %v248_v5  ;;  %317 = vst [vmem:[#allocation2 + $0x26] sm:$0x20] %v246_v3  ;;  %v284_v26 = vand.u32 2147483647, %v258_v15  ;;  %v287_v31 = vadd.f32 %v282_v23, %v281_v21 }
  0x6c   : > { %318 = vst [vmem:[#allocation2 + $0x3e] sm:$0x20] %v248_v5  ;;  %319 = vst [vmem:[#allocation3 + $0x2] sm:$0xff] %v249_v6  ;;  %v285_v27 = vand.u32 2147483647, %v259_v16  ;;  %v2536_v33 = vld [vmem:[#allocation2 + $0x8] sm:$0xff]  ;;  %v268_v35 = vadd.f32 %v267_v24, %v263_v20 }
  0x6d   : > { %320 = vst [vmem:[#allocation3 + $0xa] sm:$0xff] %v250_v7  ;;  %321 = vst [vmem:[#allocation3 + $0x1a] sm:$0xff] %v251_v8  ;;  %v286_v30 = vand.u32 2147483647, %v260_v17  ;;  %v2534_v32 = vld [vmem:[#allocation2] sm:$0xff]  ;;  %v367_v37 = vrot.slane %v2536_v33, 4  ;;  %v288_v39 = vadd.f32 %v287_v31, %v283_v25 }
  0x6e   : > { %325 = vst [vmem:[#allocation3 - $0x2] sm:$0x4] %v249_v6  ;;  %326 = vst [vmem:[#allocation3 + $0x16] sm:$0x4] %v251_v8  ;;  %v2538_v34 = vld [vmem:[#allocation2 + $0x10] sm:$0xf]  ;;  %v269_v43 = vadd.f32 %v268_v35, %v264_v22 }
  0x6f   : > { %328 = vst [vmem:[#allocation3] sm:$0x2] %v249_v6  ;;  %329 = vst [vmem:[#allocation3 + $0x18] sm:$0x2] %v251_v8  ;;  %v366_v36 = vrot.slane %v2534_v32, 4  ;;  %v400_v38 = vrot.slane %v2534_v32, 2  ;;  %v289_v47 = vadd.f32 %v288_v39, %v284_v26 }
  0x70   : > { %331 = vst [vmem:[#allocation3 + $0xc] sm:$0x40] %v250_v7  ;;  %334 = vst [vmem:[#allocation3 + $0xe] sm:$0x20] %v250_v7  ;;  %v401_v40 = vrot.slane %v2536_v33, 2  ;;  %v403_v41 = vrot.slane %v2538_v34, 2  ;;  %v270_v51 = vadd.f32 %v269_v43, %v265_v28 }
  0x71   : > { %322 = vst [vmem:[#allocation3 + $0x22] sm:$0xff] %v252_v9  ;;  %323 = vst [vmem:[#allocation3 + $0x32] sm:$0xff] %v253_v10  ;;  %v479_v42 = vmul.f32 0.2920817, %v2534_v32  ;;  %v368_v44 = vsel %vm365_vm0, %v366_v36, %v367_v37  ;;  %v480_v45 = vmul.f32 0.2920817, %v2536_v33  ;;  %v290_v55 = vadd.f32 %v289_v47, %v285_v27 }
  0x72   : > { %324 = vst [vmem:[#allocation3 + $0x3a] sm:$0xff] %v254_v11  ;;  %327 = vst [vmem:[#allocation3 + $0x2e] sm:$0x4] %v253_v10  ;;  %v369_v46 = vrot.slane %v2538_v34, 4  ;;  %v387_v48 = vadd.f32 %v368_v44, %v2534_v32  ;;  %v402_v49 = vsel %vm399_vm1, %v400_v38, %v401_v40  ;;  %v404_v50 = vsel %vm399_vm1, %v401_v40, %v403_v41  ;;  %s1938_s18 = sshll.u32 %s240_s26, 4  ;;  %s1925_s9 = scalar_lea.sflag [#allocation6], %s2527_s20  ;;  %s1939_s18 = int_to_ptr.vmem [resolvable:$true] %s1938_s18 }
  0x73   : > { %330 = vst [vmem:[#allocation3 + $0x30] sm:$0x2] %v253_v10  ;;  %332 = vst [vmem:[#allocation3 + $0x24] sm:$0x40] %v252_v9  ;;  %v424_v52 = vadd.f32 %v402_v49, %v2534_v32  ;;  %v425_v53 = vadd.f32 %v404_v50, %v2536_v33  ;;  %v497_v54 = vrot.slane %v479_v42, 2  ;;  %v498_v57 = vrot.slane %v480_v45, 2 }
  0x74   : > { %333 = vst [vmem:[#allocation3 + $0x3c] sm:$0x40] %v254_v11  ;;  %335 = vst [vmem:[#allocation3 + $0x26] sm:$0x20] %v252_v9  ;;  %v393_v56 = vmul.f32 0.120078385, %v387_v48  ;;  %v370_v58 = vsel %vm365_vm0, %v367_v37, %v369_v46  ;;  %v271_v59 = vadd.f32 %v270_v51, %v266_v29  ;;  %v291_v0 = vadd.f32 %v290_v55, %v286_v30 }
  0x75   : > { %336 = vst [vmem:[#allocation3 + $0x3e] sm:$0x20] %v254_v11  ;;  %v433_v60 = vmul.f32 0.23388076, %v424_v52  ;;  %v434_v61 = vmul.f32 0.23388076, %v425_v53  ;;  %v388_v62 = vadd.f32 %v370_v58, %v2536_v33  ;;  %v499_v1 = vsel %vm399_vm1, %v497_v54, %v498_v57 }
  0x76   : > { %v2556_v63 = vld [vmem:[#allocation3] sm:$0xff]  ;;  %v426_v2 = vadd.f32 %v403_v41, %v2538_v34  ;;  %v481_v3 = vmul.f32 0.2920817, %v2538_v34  ;;  %v2561_v4 = vld [vmem:[#allocation3 + $0x8] sm:$0xff]  ;;  %272 = vadd.xlane.f32.xlu0 %v271_v59  ;;  %v2587_v41 = vld [vmem:[#allocation2 + $0x18] sm:$0xff]  ;;  %s2244_s11 = scalar_lea.vmem %s1939_s18, 128 }
  0x77   : > { %v2563_v5 = vld [vmem:[#allocation3 + $0x10] sm:$0xf]  ;;  %v452_v6 = vrot.slane %v433_v60, 1  ;;  %v453_v7 = vrot.slane %v434_v61, 1  ;;  %v394_v8 = vmul.f32 0.120078385, %v388_v62  ;;  %p2245_p12 = scmp.ne.s32.totalorder %s1939_s18, %s2244_s11 }
  0x78   : > { %v655_v9 = vrot.slane %v2556_v63, 4  ;;  %v435_v10 = vmul.f32 0.23388076, %v426_v2  ;;  %v500_v11 = vrot.slane %v481_v3, 2  ;;  %v656_v12 = vrot.slane %v2561_v4, 4  ;;  %v2593_v45 = vld [vmem:[#allocation2 + $0x20] sm:$0xff] }
  0x79   : > { %v688_v13 = vrot.slane %v2556_v63, 2  ;;  %v454_v14 = vsel %vm451_vm2, %v452_v6, %v453_v7  ;;  %v689_v15 = vrot.slane %v2561_v4, 2  ;;  %v691_v16 = vrot.slane %v2563_v5, 2  ;;  %v2595_v46 = vld [vmem:[#allocation2 + $0x28] sm:$0xf]  ;;  %p4051_p2 = scmp.ne.s32.totalorder %s3981_s27, 0 }
  0x7a   : > { %v766_v17 = vmul.f32 0.2920817, %v2556_v63  ;;  %v473_v18 = vadd.f32 %v454_v14, %v393_v56  ;;  %v455_v19 = vrot.slane %v435_v10, 1  ;;  %v501_v20 = vsel %vm399_vm1, %v498_v57, %v500_v11  ;;  %292 = vadd.xlane.f32.xlu0 %v291_v0  ;;  %v2621_v11 = vld [vmem:[#allocation3 + $0x18] sm:$0xff]  ;;  %s2323_s25 = smov [#allocation10]  }
  0x7b   : > { %v657_v21 = vsel %vm365_vm0, %v655_v9, %v656_v12  ;;  %v690_v23 = vsel %vm399_vm1, %v688_v13, %v689_v15  ;;  %v692_v24 = vsel %vm399_vm1, %v689_v15, %v691_v16  ;;  %v767_v25 = vmul.f32 0.2920817, %v2561_v4  ;;  %v2625_v13 = vld [vmem:[#allocation3 + $0x28] sm:$0xf]  ;;  %p2246_p8 = pnand %p2245_p12, %p4051_p2  ;;  %s2248_s4 = sshll.u32 %s2323_s25, 4  ;;  %s2249_s4 = int_to_ptr.vmem [resolvable:$false] %s2248_s4 }
  0x7c   : > { %v676_v22 = vadd.f32 %v657_v21, %v2556_v63  ;;  %v2578_v26 = vadd.f32 %v499_v1, %v473_v18  ;;  %v456_v27 = vsel %vm451_vm2, %v453_v7, %v455_v19  ;;  %v712_v28 = vadd.f32 %v690_v23, %v2556_v63  ;;  %p2251_p1 = scmp.lt.s32.totalorder %s1939_s18, %s2249_s4 }
  0x7d   : > { %v713_v29 = vadd.f32 %v692_v24, %v2561_v4  ;;  %v474_v30 = vadd.f32 %v456_v27, %v394_v8  ;;  %v784_v35 = vrot.slane %v766_v17, 2  ;;  %v785_v36 = vrot.slane %v767_v25, 2  ;;  %p2247_p10 = pneg %p2246_p8 }
  0x7e   : > { %v682_v31 = vmul.f32 0.120078385, %v676_v22  ;;  %524 = vrot.lane.b32.xlu1 %v2578_v26, %s2319_s28  ;;  %v721_v37 = vmul.f32 0.23388076, %v712_v28  ;;  %v658_v39 = vrot.slane %v2563_v5, 4  ;;  %v714_v40 = vadd.f32 %v691_v16, %v2563_v5 }
  0x7f   : > { %v722_v38 = vmul.f32 0.23388076, %v713_v29  ;;  %v2589_v42 = vadd.f32 %v501_v20, %v474_v30  ;;  %v786_v43 = vsel %vm399_vm1, %v784_v35, %v785_v36  ;;  %v768_v44 = vmul.f32 0.2920817, %v2563_v5 }
  0x80   : > { %v371_v47 = vrot.slane %v2587_v41, 4  ;;  %v739_v48 = vrot.slane %v721_v37, 1  ;;  %v659_v50 = vsel %vm365_vm0, %v656_v12, %v658_v39  ;;  %v723_v51 = vmul.f32 0.23388076, %v714_v40  ;;  %v2623_v12 = vld [vmem:[#allocation3 + $0x20] sm:$0xff] }
  0x81   : > { %v740_v49 = vrot.slane %v722_v38, 1  ;;  %v677_v52 = vadd.f32 %v659_v50, %v2561_v4  ;;  %v787_v53 = vrot.slane %v768_v44, 2  ;;  %v372_v54 = vrot.slane %v2593_v45, 4 }
  0x82   : > { %v405_v55 = vrot.slane %v2587_v41, 2  ;;  %526 = vrot.lane.b32.xlu1 %v2589_v42, %s2319_s28  ;;  %v742_v57 = vrot.slane %v723_v51, 1  ;;  %v406_v58 = vrot.slane %v2593_v45, 2  ;;  %v408_v59 = vrot.slane %v2595_v46, 2 }
  0x83   : > { %v741_v56 = vsel %vm451_vm2, %v739_v48, %v740_v49  ;;  %v683_v61 = vmul.f32 0.120078385, %v677_v52  ;;  %v788_v62 = vsel %vm399_vm1, %v785_v36, %v787_v53  ;;  %v373_v0 = vsel %vm365_vm0, %v371_v47, %v372_v54 }
  0x84   : > { %v760_v60 = vadd.f32 %v741_v56, %v682_v31  ;;  %v743_v1 = vsel %vm451_vm2, %v740_v49, %v742_v57  ;;  %v389_v2 = vadd.f32 %v373_v0, %v2587_v41  ;;  %v407_v3 = vsel %vm399_vm1, %v405_v55, %v406_v58 }
  0x85   : > { %v409_v6 = vsel %vm399_vm1, %v406_v58, %v408_v59  ;;  %v761_v8 = vadd.f32 %v743_v1, %v683_v61  ;;  %v427_v9 = vadd.f32 %v407_v3, %v2587_v41  ;;  %v482_v15 = vmul.f32 0.2920817, %v2587_v41 }
  0x86   : > { %v2617_v7 = vadd.f32 %v786_v43, %v760_v60  ;;  %v428_v10 = vadd.f32 %v409_v6, %v2593_v45  ;;  %548 = vrot.lane.b32.xlu1 %v2589_v42, %s2320_s6  ;;  %v395_v14 = vmul.f32 0.120078385, %v389_v2  ;;  %v2631_v16 = vmul.f32 0.2920817, %v2593_v45 }
  0x87   : > { %v2635_v17 = vmul.f32 %v2536_v33, %v2536_v33  ;;  %v2637_v18 = vadd.f32 %v788_v62, %v761_v8  ;;  %v436_v19 = vmul.f32 0.23388076, %v427_v9  ;;  %v660_v21 = vrot.slane %v2621_v11, 4 }
  0x88   : > { %v2639_v20 = vmul.f32 0.23388076, %v428_v10  ;;  %v502_v22 = vrot.slane %v482_v15, 2  ;;  %v503_v23 = vrot.slane %v2631_v16, 2  ;;  %v661_v24 = vrot.slane %v2623_v12, 4 }
  0x89   : > { %v693_v25 = vrot.slane %v2621_v11, 2  ;;  %v457_v27 = vrot.slane %v436_v19, 1  ;;  %v694_v33 = vrot.slane %v2623_v12, 2  ;;  %v696_v29 = vrot.slane %v2625_v13, 2 }
  0x8a   : > { %v458_v28 = vrot.slane %v2639_v20, 1  ;;  %811 = vrot.lane.b32.xlu1 %v2617_v7, %s2319_s28  ;;  %v504_v30 = vsel %vm399_vm1, %v502_v22, %v503_v23  ;;  %v662_v31 = vsel %vm365_vm0, %v660_v21, %v661_v24  ;;  %v769_v35 = vmul.f32 0.2920817, %v2621_v11 }
  0x8b   : > { %v2658_v36 = vmul.f32 0.2920817, %v2623_v12  ;;  %v678_v38 = vadd.f32 %v662_v31, %v2621_v11  ;;  %v695_v39 = vsel %vm399_vm1, %v693_v25, %v694_v33  ;;  %v697_v40 = vsel %vm399_vm1, %v694_v33, %v696_v29 }
  0x8c   : > { %v459_v37 = vsel %vm451_vm2, %v457_v27, %v458_v28  ;;  %v715_v44 = vadd.f32 %v695_v39, %v2621_v11  ;;  %v716_v47 = vadd.f32 %v697_v40, %v2623_v12  ;;  %v789_v48 = vrot.slane %v769_v35, 2 }
  0x8d   : > { %v475_v43 = vadd.f32 %v459_v37, %v395_v14  ;;  %v684_v49 = vmul.f32 0.120078385, %v678_v38  ;;  %v790_v50 = vrot.slane %v2658_v36, 2  ;;  %v915_v51 = vmul.f32 %v2538_v34, %v2538_v34 }
  0x8e   : > { %v932_v52 = vrot.slane %v2635_v17, 4  ;;  %813 = vrot.lane.b32.xlu1 %v2637_v18, %s2319_s28  ;;  %v724_v55 = vmul.f32 0.23388076, %v715_v44  ;;  %v2678_v56 = vmul.f32 0.23388076, %v716_v47  ;;  %v965_v57 = vrot.slane %v2635_v17, 2 }
  0x8f   : > { %v2676_v53 = vadd.f32 %v504_v30, %v475_v43  ;;  %v791_v58 = vsel %vm399_vm1, %v789_v48, %v790_v50  ;;  %v934_v60 = vrot.slane %v915_v51, 4  ;;  %v967_v61 = vrot.slane %v915_v51, 2 }
  0x90   : > { %v1043_v34 = vmul.f32 0.2920817, %v2635_v17  ;;  %v744_v62 = vrot.slane %v724_v55, 1  ;;  %v745_v0 = vrot.slane %v2678_v56, 1  ;;  %v1044_v1 = vmul.f32 0.2920817, %v915_v51  ;;  %546 = vrot.lane.b32.xlu0 %v2578_v26, %s2320_s6 }
  0x91   : > { %3989 = vst [vmem:[#allocation14_spill] sm:$0xff] %v2676_v53  ;;  %v913_v2 = vmul.f32 %v2534_v32, %v2534_v32  ;;  %v935_v3 = vsel %vm365_vm0, %v932_v52, %v934_v60  ;;  %v968_v6 = vsel %vm399_vm1, %v965_v57, %v967_v61  ;;  %v990_v8 = vadd.f32 %v967_v61, %v915_v51 }
  0x92   : > { %v1061_v9 = vrot.slane %v1043_v34, 2  ;;  %829 = vrot.lane.b32.xlu1 %v2617_v7, %s2320_s6  ;;  %v746_v10 = vsel %vm451_vm2, %v744_v62, %v745_v0  ;;  %v953_v14 = vadd.f32 %v935_v3, %v2635_v17  ;;  %v989_v32 = vadd.f32 %v968_v6, %v2635_v17 }
  0x93   : > { %v1063_v15 = vrot.slane %v1044_v1, 2  ;;  %v762_v19 = vadd.f32 %v746_v10, %v684_v49  ;;  %v999_v21 = vmul.f32 0.23388076, %v990_v8  ;;  %v931_v22 = vrot.slane %v913_v2, 4 }
  0x94   : > { %v964_v25 = vrot.slane %v913_v2, 2  ;;  %v959_v27 = vmul.f32 0.120078385, %v953_v14  ;;  %v998_v33 = vmul.f32 0.23388076, %v989_v32  ;;  %550 = vrot.lane.b32.xlu0 %v2676_v53, %s2320_s6  ;;  %v1190_v47 = vmul.f32 %v2561_v4, %v2561_v4 }
  0x95   : > { %v1064_v30 = vsel %vm399_vm1, %v1061_v9, %v1063_v15  ;;  %v1042_v31 = vmul.f32 0.2920817, %v913_v2  ;;  %v2702_v35 = vadd.f32 %v791_v58, %v762_v19  ;;  %v1018_v37 = vrot.slane %v999_v21, 1 }
  0x96   : > { %v933_v38 = vsel %vm365_vm0, %v931_v22, %v932_v52  ;;  %v966_v17 = vsel %vm399_vm1, %v964_v25, %v965_v57  ;;  %831 = vrot.lane.b32.xlu1 %v2637_v18, %s2320_s6  ;;  %v1016_v39 = vrot.slane %v998_v33, 1  ;;  %v1191_v48 = vmul.f32 %v2563_v5, %v2563_v5 }
  0x97   : > { %3990 = vst [vmem:[#allocation15_spill] sm:$0xff] %v2702_v35  ;;  %v952_v40 = vadd.f32 %v933_v38, %v913_v2  ;;  %v988_v43 = vadd.f32 %v966_v17, %v913_v2  ;;  %v1060_v44 = vrot.slane %v1042_v31, 2  ;;  %v1189_v49 = vmul.f32 %v2556_v63, %v2556_v63 }
  0x98   : > { %v374_v51 = vrot.slane %v2595_v46, 4  ;;  %v1019_v52 = vsel %vm451_vm2, %v1016_v39, %v1018_v37  ;;  %833 = vrot.lane.b32.xlu0 %v2702_v35, %s2320_s6  ;;  %v1208_v61 = vrot.slane %v1190_v47, 4  ;;  %v1210_v4 = vrot.slane %v1191_v48, 4 }
  0x99   : > { %v958_v55 = vmul.f32 0.120078385, %v952_v40  ;;  %v997_v57 = vmul.f32 0.23388076, %v988_v43  ;;  %v1062_v58 = vsel %vm399_vm1, %v1060_v44, %v1061_v9  ;;  %v1037_v60 = vadd.f32 %v1019_v52, %v959_v27 }
  0x9a   : > { %v1241_v34 = vrot.slane %v1190_v47, 2  ;;  %528 = vrot.lane.b32.xlu1 %v2676_v53, %s2319_s28  ;;  %v1243_v63 = vrot.slane %v1191_v48, 2  ;;  %v1319_v62 = vmul.f32 0.2920817, %v1190_v47  ;;  %v1320_v1 = vmul.f32 0.2920817, %v1191_v48 }
  0x9b   : > { %v1015_v5 = vrot.slane %v997_v57, 1  ;;  %v2721_v2 = vadd.f32 %v1064_v30, %v1037_v60  ;;  %v1211_v3 = vsel %vm365_vm0, %v1208_v61, %v1210_v4  ;;  %v1207_v6 = vrot.slane %v1189_v49, 4 }
  0x9c   : > { %v1240_v8 = vrot.slane %v1189_v49, 2  ;;  %v1229_v10 = vadd.f32 %v1211_v3, %v1190_v47  ;;  %v1244_v14 = vsel %vm399_vm1, %v1241_v34, %v1243_v63  ;;  %v1266_v32 = vadd.f32 %v1243_v63, %v1191_v48 }
  0x9d   : > { %3991 = vst [vmem:[#allocation16_spill] sm:$0xff] %v2721_v2  ;;  %v1017_v9 = vsel %vm451_vm2, %v1015_v5, %v1016_v39  ;;  %1089 = vrot.lane.b32.xlu0 %v2721_v2, %s2319_s28  ;;  %v1265_v19 = vadd.f32 %v1244_v14, %v1190_v47  ;;  %v1337_v21 = vrot.slane %v1319_v62, 2  ;;  %v1339_v22 = vrot.slane %v1320_v1, 2 }
  0x9e   : > { %v1036_v15 = vadd.f32 %v1017_v9, %v958_v55  ;;  %815 = vrot.lane.b32.xlu1 %v2702_v35, %s2319_s28  ;;  %v1235_v25 = vmul.f32 0.120078385, %v1229_v10  ;;  %v1275_v27 = vmul.f32 0.23388076, %v1266_v32  ;;  %v1209_v33 = vsel %vm365_vm0, %v1207_v6, %v1208_v61 }
  0x9f   : > { %v1242_v30 = vsel %vm399_vm1, %v1240_v8, %v1241_v34  ;;  %v1274_v37 = vmul.f32 0.23388076, %v1265_v19  ;;  %v1340_v38 = vsel %vm399_vm1, %v1337_v21, %v1339_v22  ;;  %v1228_v17 = vadd.f32 %v1209_v33, %v1189_v49 }
  0xa0   : > { %v2732_v31 = vadd.f32 %v1062_v58, %v1036_v15  ;;  %v1294_v39 = vrot.slane %v1275_v27, 1  ;;  %v1264_v40 = vadd.f32 %v1242_v30, %v1189_v49  ;;  %v1318_v43 = vmul.f32 0.2920817, %v1189_v49 }
  0xa1   : > { %v375_v44 = vsel %vm365_vm0, %v372_v54, %v374_v51  ;;  %1107 = vrot.lane.b32.xlu0 %v2721_v2, %s2320_s6  ;;  %v1292_v47 = vrot.slane %v1274_v37, 1  ;;  %v1234_v48 = vmul.f32 0.120078385, %v1228_v17  ;;  %v429_v55 = vadd.f32 %v408_v59, %v2595_v46 }
  0xa2   : > { %3992 = vst [vmem:[#allocation17_spill] sm:$0xff] %v2732_v31  ;;  %v390_v52 = vadd.f32 %v375_v44, %v2593_v45  ;;  %1087 = vrot.lane.b32.xlu1 %v2732_v31, %s2319_s28  ;;  %v1273_v57 = vmul.f32 0.23388076, %v1264_v40  ;;  %v1336_v49 = vrot.slane %v1318_v43, 2  ;;  %v484_v58 = vmul.f32 0.2920817, %v2595_v46 }
  0xa3   : > { %v663_v54 = vrot.slane %v2625_v13, 4  ;;  %v1295_v51 = vsel %vm451_vm2, %v1292_v47, %v1294_v39  ;;  %v438_v61 = vmul.f32 0.23388076, %v429_v55  ;;  %v717_v4 = vadd.f32 %v696_v29, %v2625_v13 }
  0xa4   : > { %v396_v60 = vmul.f32 0.120078385, %v390_v52  ;;  %v1313_v34 = vadd.f32 %v1295_v51, %v1235_v25  ;;  %v1291_v5 = vrot.slane %v1273_v57, 1  ;;  %v1338_v59 = vsel %vm399_vm1, %v1336_v49, %v1337_v21 }
  0xa5   : > { %v505_v63 = vrot.slane %v484_v58, 2  ;;  %v460_v62 = vrot.slane %v438_v61, 1  ;;  %v664_v1 = vsel %vm365_vm0, %v661_v24, %v663_v54  ;;  %v726_v3 = vmul.f32 0.23388076, %v717_v4 }
  0xa6   : > { %v771_v6 = vmul.f32 0.2920817, %v2625_v13  ;;  %1105 = vrot.lane.b32.xlu1 %v2732_v31, %s2320_s6  ;;  %v2759_v8 = vadd.f32 %v1340_v38, %v1313_v34  ;;  %v1293_v29 = vsel %vm451_vm2, %v1291_v5, %v1292_v47  ;;  %v679_v10 = vadd.f32 %v664_v1, %v2623_v12 }
  0xa7   : > { %v506_v9 = vsel %vm399_vm1, %v503_v23, %v505_v63  ;;  %v1312_v14 = vadd.f32 %v1293_v29, %v1234_v48  ;;  %v461_v24 = vsel %vm451_vm2, %v458_v28, %v460_v62  ;;  %v747_v32 = vrot.slane %v726_v3, 1 }
  0xa8   : > { %3993 = vst [vmem:[#allocation18_spill] sm:$0xff] %v2759_v8  ;;  %v792_v15 = vrot.slane %v771_v6, 2  ;;  %1365 = vrot.lane.b32.xlu0 %v2759_v8, %s2319_s28  ;;  %v476_v19 = vadd.f32 %v461_v24, %v396_v60  ;;  %v685_v21 = vmul.f32 0.120078385, %v679_v10  ;;  %v916_v22 = vmul.f32 %v2587_v41, %v2587_v41  ;;  %v2832_v60 = vld [vmem:[#allocation2 + $0x30] sm:$0xff] }
  0xa9   : > { %v2775_v16 = vmul.f32 %v2593_v45, %v2593_v45  ;;  %v2777_v23 = vadd.f32 %v1338_v59, %v1312_v14  ;;  %v748_v20 = vsel %vm451_vm2, %v745_v0, %v747_v32  ;;  %v2787_v25 = vmul.f32 %v2595_v46, %v2595_v46 }
  0xaa   : > { %v793_v28 = vsel %vm399_vm1, %v790_v50, %v792_v15  ;;  %v2789_v27 = vadd.f32 %v506_v9, %v476_v19  ;;  %v763_v41 = vadd.f32 %v748_v20, %v685_v21  ;;  %v936_v33 = vrot.slane %v916_v22, 4  ;;  %v2850_v9 = vld [vmem:[#allocation2 + $0x38] sm:$0xff]  ;;  %v2859_v15 = vld [vmem:[#allocation2 + $0x40] sm:$0xf] }
  0xab   : > { %3994 = vst [vmem:[#allocation19_spill] sm:$0xff] %v2777_v23  ;;  %v937_v45 = vrot.slane %v2775_v16, 4  ;;  %1363 = vrot.lane.b32.xlu1 %v2777_v23, %s2319_s28  ;;  %v969_v56 = vrot.slane %v916_v22, 2  ;;  %v970_v0 = vrot.slane %v2775_v16, 2  ;;  %v972_v36 = vrot.slane %v2787_v25, 2 }
  0xac   : > { %3995 = vst [vmem:[#allocation20_spill] sm:$0xff] %v2789_v27  ;;  %v1045_v30 = vmul.f32 0.2920817, %v916_v22  ;;  %1383 = vrot.lane.b32.xlu0 %v2759_v8, %s2320_s6  ;;  %v2798_v46 = vadd.f32 %v793_v28, %v763_v41  ;;  %v2804_v37 = vmul.f32 0.2920817, %v2775_v16  ;;  %v1192_v38 = vmul.f32 %v2621_v11, %v2621_v11 }
  0xad   : > { %v938_v50 = vsel %vm365_vm0, %v936_v33, %v937_v45  ;;  %v971_v39 = vsel %vm399_vm1, %v969_v56, %v970_v0  ;;  %v973_v40 = vsel %vm399_vm1, %v970_v0, %v972_v36  ;;  %v2816_v52 = vmul.f32 %v2623_v12, %v2623_v12 }
  0xae   : > { %3996 = vst [vmem:[#allocation21_spill] sm:$0xff] %v2798_v46  ;;  %v954_v17 = vadd.f32 %v938_v50, %v916_v22  ;;  %v1065_v43 = vrot.slane %v1045_v30, 2  ;;  %v991_v44 = vadd.f32 %v971_v39, %v916_v22  ;;  %v992_v47 = vadd.f32 %v973_v40, %v2775_v16 }
  0xaf   : > { %v1066_v48 = vrot.slane %v2804_v37, 2  ;;  %1381 = vrot.lane.b32.xlu1 %v2777_v23, %s2320_s6  ;;  %v2822_v55 = vmul.f32 %v2625_v13, %v2625_v13  ;;  %v1212_v57 = vrot.slane %v1192_v38, 4  ;;  %v1245_v49 = vrot.slane %v1192_v38, 2 }
  0xb0   : > { %v960_v11 = vmul.f32 0.120078385, %v954_v17  ;;  %552 = vrot.lane.b32.xlu0 %v2789_v27, %s2320_s6  ;;  %v1000_v58 = vmul.f32 0.23388076, %v991_v44  ;;  %v2826_v54 = vmul.f32 0.23388076, %v992_v47 }
  0xb1   : > { %v1067_v12 = vsel %vm399_vm1, %v1065_v43, %v1066_v48  ;;  %v1213_v51 = vrot.slane %v2816_v52, 4  ;;  %v1246_v61 = vrot.slane %v2816_v52, 2  ;;  %v1248_v13 = vrot.slane %v2822_v55, 2 }
  0xb2   : > { %v1321_v4 = vmul.f32 0.2920817, %v1192_v38  ;;  %v2837_v34 = vmul.f32 0.2920817, %v2816_v52  ;;  %v1020_v5 = vrot.slane %v1000_v58, 1  ;;  %v1021_v59 = vrot.slane %v2826_v54, 1 }
  0xb3   : > { %v1214_v63 = vsel %vm365_vm0, %v1212_v57, %v1213_v51  ;;  %v376_v62 = vrot.slane %v2832_v60, 4  ;;  %530 = vrot.lane.b32.xlu1 %v2789_v27, %s2319_s28  ;;  %v1247_v3 = vsel %vm399_vm1, %v1245_v49, %v1246_v61  ;;  %v1249_v6 = vsel %vm399_vm1, %v1246_v61, %v1248_v13  ;;  %v2890_v57 = vld [vmem:[#allocation3 + $0x30] sm:$0xff]  ;;  %v2892_v49 = vld [vmem:[#allocation3 + $0x38] sm:$0xff]  ;;  %v2894_v58 = vld [vmem:[#allocation3 + $0x40] sm:$0xf] }
  0xb4   : > { %v1230_v1 = vadd.f32 %v1214_v63, %v1192_v38  ;;  %v1341_v29 = vrot.slane %v1321_v4, 2  ;;  %592 = vrot.lane.b32.xlu0 %v2589_v42, %s2321_s17  ;;  %v1022_v10 = vsel %vm451_vm2, %v1020_v5, %v1021_v59  ;;  %v1267_v14 = vadd.f32 %v1247_v3, %v1192_v38 }
  0xb5   : > { %v1268_v24 = vadd.f32 %v1249_v6, %v2816_v52  ;;  %v1342_v32 = vrot.slane %v2837_v34, 2  ;;  %v1038_v19 = vadd.f32 %v1022_v10, %v960_v11  ;;  %v377_v22 = vrot.slane %v2850_v9, 4 }
  0xb6   : > { %v1236_v21 = vmul.f32 0.120078385, %v1230_v1  ;;  %v410_v20 = vrot.slane %v2832_v60, 2  ;;  %v1276_v28 = vmul.f32 0.23388076, %v1267_v14  ;;  %v411_v33 = vrot.slane %v2850_v9, 2 }
  0xb7   : > { %v2863_v41 = vmul.f32 0.23388076, %v1268_v24  ;;  %590 = vrot.lane.b32.xlu1 %v2578_v26, %s2321_s17  ;;  %v1343_v56 = vsel %vm399_vm1, %v1341_v29, %v1342_v32  ;;  %v378_v0 = vsel %vm365_vm0, %v376_v62, %v377_v22  ;;  %v413_v30 = vrot.slane %v2859_v15, 2 }
  0xb8   : > { %v485_v50 = vmul.f32 0.2920817, %v2832_v60  ;;  %835 = vrot.lane.b32.xlu0 %v2798_v46, %s2320_s6  ;;  %v2878_v38 = vadd.f32 %v1067_v12, %v1038_v19  ;;  %v1296_v17 = vrot.slane %v1276_v28, 1  ;;  %v412_v40 = vsel %vm399_vm1, %v410_v20, %v411_v33 }
  0xb9   : > { %v1297_v39 = vrot.slane %v2863_v41, 1  ;;  %v391_v43 = vadd.f32 %v378_v0, %v2832_v60  ;;  %v414_v44 = vsel %vm399_vm1, %v411_v33, %v413_v30  ;;  %v430_v47 = vadd.f32 %v412_v40, %v2832_v60 }
  0xba   : > { %3997 = vst [vmem:[#allocation22_spill] sm:$0xff] %v2878_v38  ;;  %v2888_v11 = vmul.f32 0.2920817, %v2850_v9  ;;  %v431_v61 = vadd.f32 %v414_v44, %v2850_v9  ;;  %v507_v4 = vrot.slane %v485_v50, 2  ;;  %v665_v5 = vrot.slane %v2890_v57, 4 }
  0xbb   : > { %v1298_v12 = vsel %vm451_vm2, %v1296_v17, %v1297_v39  ;;  %817 = vrot.lane.b32.xlu1 %v2798_v46, %s2319_s28  ;;  %v439_v62 = vmul.f32 0.23388076, %v430_v47  ;;  %v666_v3 = vrot.slane %v2892_v49, 4  ;;  %v698_v29 = vrot.slane %v2890_v57, 2 }
  0xbc   : > { %v1314_v63 = vadd.f32 %v1298_v12, %v1236_v21  ;;  %v508_v1 = vrot.slane %v2888_v11, 2  ;;  %867 = vrot.lane.b32.xlu0 %v2637_v18, %s2321_s17  ;;  %v2907_v6 = vmul.f32 0.23388076, %v431_v61  ;;  %v699_v10 = vrot.slane %v2892_v49, 2 }
  0xbd   : > { %v701_v14 = vrot.slane %v2894_v58, 2  ;;  %v397_v24 = vmul.f32 0.120078385, %v391_v43  ;;  %v462_v19 = vrot.slane %v439_v62, 1  ;;  %v667_v21 = vsel %vm365_vm0, %v665_v5, %v666_v3 }
  0xbe   : > { %v463_v20 = vrot.slane %v2907_v6, 1  ;;  %v700_v28 = vsel %vm399_vm1, %v698_v29, %v699_v10  ;;  %v2922_v0 = vadd.f32 %v1343_v56, %v1314_v63  ;;  %v509_v43 = vsel %vm399_vm1, %v507_v4, %v508_v1 }
  0xbf   : > { %v702_v33 = vsel %vm399_vm1, %v699_v10, %v701_v14  ;;  %865 = vrot.lane.b32.xlu1 %v2617_v7, %s2321_s17  ;;  %v718_v50 = vadd.f32 %v700_v28, %v2890_v57  ;;  %v680_v44 = vadd.f32 %v667_v21, %v2890_v57  ;;  %v772_v56 = vmul.f32 0.2920817, %v2890_v57 }
  0xc0   : > { %3998 = vst [vmem:[#allocation23_spill] sm:$0xff] %v2922_v0  ;;  %v719_v17 = vadd.f32 %v702_v33, %v2892_v49  ;;  %1109 = vrot.lane.b32.xlu0 %v2878_v38, %s2320_s6  ;;  %v464_v40 = vsel %vm451_vm2, %v462_v19, %v463_v20  ;;  %v2939_v5 = vmul.f32 0.2920817, %v2892_v49  ;;  %v939_v10 = vrot.slane %v2787_v25, 4 }
  0xc1   : > { %v477_v47 = vadd.f32 %v464_v40, %v397_v24  ;;  %v727_v12 = vmul.f32 0.23388076, %v718_v50  ;;  %v686_v29 = vmul.f32 0.120078385, %v680_v44  ;;  %v794_v19 = vrot.slane %v772_v56, 2 }
  0xc2   : > { %v2936_v61 = vmul.f32 0.23388076, %v719_v17  ;;  %v795_v21 = vrot.slane %v2939_v5, 2  ;;  %v993_v28 = vadd.f32 %v972_v36, %v2787_v25  ;;  %v940_v17 = vsel %vm365_vm0, %v937_v45, %v939_v10 }
  0xc3   : > { %1091 = vrot.lane.b32.xlu1 %v2878_v38, %s2319_s28  ;;  %v749_v63 = vrot.slane %v727_v12, 1  ;;  %v2946_v4 = vadd.f32 %v509_v43, %v477_v47  ;;  %v955_v43 = vadd.f32 %v940_v17, %v2775_v16  ;;  %v1047_v56 = vmul.f32 0.2920817, %v2787_v25 }
  0xc4   : > { %v750_v62 = vrot.slane %v2936_v61, 1  ;;  %1385 = vrot.lane.b32.xlu0 %v2922_v0, %s2320_s6  ;;  %v796_v50 = vsel %vm399_vm1, %v794_v19, %v795_v21  ;;  %v1002_v40 = vmul.f32 0.23388076, %v993_v28  ;;  %v1215_v47 = vrot.slane %v2822_v55, 4 }
  0xc5   : > { %3999 = vst [vmem:[#allocation24_spill] sm:$0xff] %v2946_v4  ;;  %v1269_v45 = vadd.f32 %v1248_v13, %v2822_v55  ;;  %v961_v12 = vmul.f32 0.120078385, %v955_v43  ;;  %v379_v19 = vrot.slane %v2859_v15, 4  ;;  %v3021_v17 = vmul.f32 %v2859_v15, %v2859_v15 }
  0xc6   : > { %v751_v24 = vsel %vm451_vm2, %v749_v63, %v750_v62  ;;  %v1023_v44 = vrot.slane %v1002_v40, 1  ;;  %v1068_v63 = vrot.slane %v1047_v56, 2  ;;  %v1216_v25 = vsel %vm365_vm0, %v1213_v51, %v1215_v47 }
  0xc7   : > { %1367 = vrot.lane.b32.xlu1 %v2922_v0, %s2319_s28  ;;  %v764_v33 = vadd.f32 %v751_v24, %v686_v29  ;;  %v1278_v29 = vmul.f32 0.23388076, %v1269_v45  ;;  %v1231_v10 = vadd.f32 %v1216_v25, %v2816_v52  ;;  %v1323_v24 = vmul.f32 0.2920817, %v2822_v55 }
  0xc8   : > { %554 = vrot.lane.b32.xlu0 %v2946_v4, %s2320_s6  ;;  %v1024_v16 = vsel %vm451_vm2, %v1021_v59, %v1023_v44  ;;  %v1069_v54 = vsel %vm399_vm1, %v1066_v48, %v1068_v63  ;;  %v432_v51 = vadd.f32 %v413_v30, %v2859_v15  ;;  %v380_v28 = vsel %vm365_vm0, %v377_v22, %v379_v19 }
  0xc9   : > { %v2970_v36 = vadd.f32 %v796_v50, %v764_v33  ;;  %v1039_v13 = vadd.f32 %v1024_v16, %v961_v12  ;;  %v1299_v59 = vrot.slane %v1278_v29, 1  ;;  %v1237_v55 = vmul.f32 0.120078385, %v1231_v10 }
  0xca   : > { %v1344_v48 = vrot.slane %v1323_v24, 2  ;;  %v441_v33 = vmul.f32 0.23388076, %v432_v51  ;;  %v919_v30 = vmul.f32 %v2832_v60, %v2832_v60  ;;  %v3017_v50 = vmul.f32 %v2850_v9, %v2850_v9 }
  0xcb   : > { %532 = vrot.lane.b32.xlu1 %v2946_v4, %s2319_s28  ;;  %4000 = vst [vmem:[#allocation25_spill] sm:$0xff] %v2970_v36  ;;  %v3005_v52 = vadd.f32 %v1069_v54, %v1039_v13  ;;  %v1300_v37 = vsel %vm451_vm2, %v1297_v39, %v1299_v59  ;;  %v487_v41 = vmul.f32 0.2920817, %v2859_v15  ;;  %v392_v39 = vadd.f32 %v380_v28, %v2850_v9 }
  0xcc   : > { %618 = vrot.lane.b32.xlu0 %v2578_v26, %s2322_s5  ;;  %v1315_v22 = vadd.f32 %v1300_v37, %v1237_v55  ;;  %v668_v40 = vrot.slane %v2894_v58, 4  ;;  %v720_v43 = vadd.f32 %v701_v14, %v2894_v58  ;;  %v1345_v44 = vsel %vm399_vm1, %v1342_v32, %v1344_v48 }
  0xcd   : > { %4001 = vst [vmem:[#allocation26_spill] sm:$0xff] %v3005_v52  ;;  %v465_v56 = vrot.slane %v441_v33, 1  ;;  %v974_v47 = vrot.slane %v919_v30, 2  ;;  %v975_v45 = vrot.slane %v3017_v50, 2  ;;  %v977_v12 = vrot.slane %v3021_v17, 2 }
  0xce   : > { %v510_v16 = vrot.slane %v487_v41, 2  ;;  %v3042_v63 = vadd.f32 %v1345_v44, %v1315_v22  ;;  %v398_v14 = vmul.f32 0.120078385, %v392_v39  ;;  %v669_v34 = vsel %vm365_vm0, %v666_v3, %v668_v40 }
  0xcf   : > { %594 = vrot.lane.b32.xlu1 %v2676_v53, %s2321_s17  ;;  %v729_v32 = vmul.f32 0.23388076, %v720_v43  ;;  %v466_v25 = vsel %vm451_vm2, %v463_v20, %v465_v56  ;;  %v1195_v29 = vmul.f32 %v2890_v57, %v2890_v57  ;;  %v976_v13 = vsel %vm399_vm1, %v974_v47, %v975_v45 }
  0xd0   : > { %819 = vrot.lane.b32.xlu0 %v2970_v36, %s2319_s28  ;;  %4002 = vst [vmem:[#allocation27_spill] sm:$0xff] %v3042_v63  ;;  %v978_v10 = vsel %vm399_vm1, %v975_v45, %v977_v12  ;;  %v3058_v24 = vmul.f32 %v2892_v49, %v2892_v49  ;;  %v3062_v3 = vmul.f32 %v2894_v58, %v2894_v58  ;;  %v774_v20 = vmul.f32 0.2920817, %v2894_v58 }
  0xd1   : > { %v681_v6 = vadd.f32 %v669_v34, %v2892_v49  ;;  %v478_v54 = vadd.f32 %v466_v25, %v398_v14  ;;  %v511_v59 = vsel %vm399_vm1, %v508_v1, %v510_v16  ;;  %v752_v19 = vrot.slane %v729_v32, 1 }
  0xd2   : > { %v941_v51 = vrot.slane %v919_v30, 4  ;;  %v942_v55 = vrot.slane %v3017_v50, 4  ;;  %v994_v37 = vadd.f32 %v976_v13, %v919_v30  ;;  %v995_v48 = vadd.f32 %v978_v10, %v3017_v50 }
  0xd3   : > { %620 = vrot.lane.b32.xlu1 %v2589_v42, %s2322_s5  ;;  %v1250_v28 = vrot.slane %v1195_v29, 2  ;;  %v1251_v33 = vrot.slane %v3058_v24, 2  ;;  %v1253_v41 = vrot.slane %v3062_v3, 2  ;;  %v687_v22 = vmul.f32 0.120078385, %v681_v6 }
  0xd4   : > { %869 = vrot.lane.b32.xlu0 %v2702_v35, %s2321_s17  ;;  %v797_v39 = vrot.slane %v774_v20, 2  ;;  %v3081_v11 = vadd.f32 %v511_v59, %v478_v54  ;;  %v753_v1 = vsel %vm451_vm2, %v750_v62, %v752_v19  ;;  %v943_v40 = vsel %vm365_vm0, %v941_v51, %v942_v55 }
  0xd5   : > { %v1003_v43 = vmul.f32 0.23388076, %v994_v37  ;;  %v3089_v44 = vmul.f32 0.23388076, %v995_v48  ;;  %v1252_v56 = vsel %vm399_vm1, %v1250_v28, %v1251_v33  ;;  %v1254_v47 = vsel %vm399_vm1, %v1251_v33, %v1253_v41 }
  0xd6   : > { %v765_v45 = vadd.f32 %v753_v1, %v687_v22  ;;  %v798_v61 = vsel %vm399_vm1, %v795_v21, %v797_v39  ;;  %v1048_v62 = vmul.f32 0.2920817, %v919_v30  ;;  %v956_v16 = vadd.f32 %v943_v40, %v919_v30 }
  0xd7   : > { %837 = vrot.lane.b32.xlu1 %v2970_v36, %s2320_s6  ;;  %v3103_v14 = vmul.f32 0.2920817, %v3017_v50  ;;  %v1217_v34 = vrot.slane %v1195_v29, 4  ;;  %v1218_v32 = vrot.slane %v3058_v24, 4  ;;  %v1025_v25 = vrot.slane %v1003_v43, 1 }
  0xd8   : > { %891 = vrot.lane.b32.xlu0 %v2637_v18, %s2322_s5  ;;  %v1026_v13 = vrot.slane %v3089_v44, 1  ;;  %v1270_v10 = vadd.f32 %v1252_v56, %v1195_v29  ;;  %v1271_v6 = vadd.f32 %v1254_v47, %v3058_v24  ;;  %v3114_v21 = vadd.f32 %v798_v61, %v765_v45 }
  0xd9   : > { %v962_v30 = vmul.f32 0.120078385, %v956_v16  ;;  %v1070_v20 = vrot.slane %v1048_v62, 2  ;;  %v1071_v54 = vrot.slane %v3103_v14, 2  ;;  %v1219_v19 = vsel %vm365_vm0, %v1217_v34, %v1218_v32 }
  0xda   : > { %v1027_v59 = vsel %vm451_vm2, %v1025_v25, %v1026_v13  ;;  %v1279_v51 = vmul.f32 0.23388076, %v1270_v10  ;;  %v3123_v37 = vmul.f32 0.23388076, %v1271_v6  ;;  %v1232_v22 = vadd.f32 %v1219_v19, %v1195_v29 }
  0xdb   : > { %889 = vrot.lane.b32.xlu1 %v2617_v7, %s2322_s5  ;;  %v1040_v28 = vadd.f32 %v1027_v59, %v962_v30  ;;  %v1072_v33 = vsel %vm399_vm1, %v1070_v20, %v1071_v54  ;;  %v1324_v40 = vmul.f32 0.2920817, %v1195_v29  ;;  %v3136_v43 = vmul.f32 0.2920817, %v3058_v24 }
  0xdc   : > { %1111 = vrot.lane.b32.xlu0 %v3005_v52, %s2320_s6  ;;  %v1301_v39 = vrot.slane %v1279_v51, 1  ;;  %v1302_v1 = vrot.slane %v3123_v37, 1  ;;  %v1238_v45 = vmul.f32 0.120078385, %v1232_v22  ;;  %v944_v59 = vrot.slane %v3021_v17, 4 }
  0xdd   : > { %v3144_v47 = vadd.f32 %v1072_v33, %v1040_v28  ;;  %v1346_v62 = vrot.slane %v1324_v40, 2  ;;  %v3960_v29 = vrot.slane %v3136_v43, 2  ;;  %v996_v19 = vadd.f32 %v977_v12, %v3021_v17 }
  0xde   : > { %v1303_v61 = vsel %vm451_vm2, %v1301_v39, %v1302_v1  ;;  %v945_v40 = vsel %vm365_vm0, %v942_v55, %v944_v59 }
  0xdf   : > { %1093 = vrot.lane.b32.xlu1 %v3005_v52, %s2319_s28  ;;  %v1316_v34 = vadd.f32 %v1303_v61, %v1238_v45  ;;  %v1348_v25 = vsel %vm399_vm1, %v1346_v62, %v3960_v29  ;;  %v1005_v45 = vmul.f32 0.23388076, %v996_v19 }
  0xe0   : > { %1143 = vrot.lane.b32.xlu0 %v2721_v2, %s2321_s17 }
  0xe1   : > { %v3165_v30 = vadd.f32 %v1348_v25, %v1316_v34  ;;  %v957_v25 = vadd.f32 %v945_v40, %v3017_v50  ;;  %v1028_v19 = vrot.slane %v1005_v45, 1 }
  0xe3   : > { %1141 = vrot.lane.b32.xlu1 %v2732_v31, %s2321_s17  ;;  %v963_v50 = vmul.f32 0.120078385, %v957_v25 }
  0xe4   : > { %1387 = vrot.lane.b32.xlu0 %v3042_v63, %s2320_s6 }
  0xe7   : > { %1369 = vrot.lane.b32.xlu1 %v3042_v63, %s2319_s28 }
  0xe8   : > { %1419 = vrot.lane.b32.xlu0 %v2759_v8, %s2321_s17 }
  0xeb   : > { %1417 = vrot.lane.b32.xlu1 %v2777_v23, %s2321_s17 }
  0xec   : > { %556 = vrot.lane.b32.xlu0 %v3081_v11, %s2320_s6 }
  0xef   : > { %534 = vrot.lane.b32.xlu1 %v3081_v11, %s2319_s28 }
  0xf0   : > { %v3110_v5 = vpop.permute.xlu1 %524  ;;  %622 = vrot.lane.b32.xlu0 %v2676_v53, %s2322_s5 }
  0xf3   : > { %596 = vrot.lane.b32.xlu1 %v2789_v27, %s2321_s17 }
  0xf4   : > { %v3127_v48 = vpop.permute.xlu1 %526  ;;  %839 = vrot.lane.b32.xlu0 %v3114_v21, %s2320_s6 }
  0xf7   : > { %821 = vrot.lane.b32.xlu1 %v3114_v21, %s2319_s28 }
  0xf8   : > { %v3140_v56 = vpop.permute.xlu1 %548  ;;  %893 = vrot.lane.b32.xlu0 %v2702_v35, %s2322_s5 }
  0xfb   : > { %871 = vrot.lane.b32.xlu1 %v2798_v46, %s2321_s17 }
  0xfc   : > { %v3152_v16 = vpop.permute.xlu1 %811  ;;  %1113 = vrot.lane.b32.xlu0 %v3144_v47, %s2320_s6 }
  0xff   : > { %1095 = vrot.lane.b32.xlu1 %v3144_v47, %s2319_s28  ;;  %v273_v10 = vpop.xlane.xlu0 %272 }
 0x100   : > { %v3161_v6 = vpop.permute.xlu1 %813  ;;  %1165 = vrot.lane.b32.xlu0 %v2732_v31, %s2322_s5  ;;  %v274_v20 = vrot.slane %v273_v10, 4 }
 0x102   : > { %v275_v51 = vadd.f32 %v274_v20, %v273_v10  ;;  %v1050_v10 = vmul.f32 0.2920817, %v3021_v17  ;;  %v1220_v20 = vrot.slane %v3062_v3, 4 }
 0x103   : > { %1145 = vrot.lane.b32.xlu1 %v2878_v38, %s2321_s17  ;;  %v293_v28 = vpop.xlane.xlu0 %292 }
 0x104   : > { %v3173_v33 = vpop.permute.xlu1 %829  ;;  %1371 = vrot.lane.b32.xlu0 %v3165_v30, %s2319_s28  ;;  %v294_v22 = vrot.slane %v293_v28, 4  ;;  %v276_v39 = vrot.slane %v275_v51, 2  ;;  %v1073_v17 = vrot.slane %v1050_v10, 2  ;;  %v1221_v45 = vsel %vm365_vm0, %v1218_v32, %v1220_v20 }
 0x105   : > { %v1233_v44 = vadd.f32 %v1221_v45, %v3058_v24  ;;  %v1326_v10 = vmul.f32 0.2920817, %v3062_v3  ;;  %v2150_v45 = vld [vmem:[#allocation2 + $0x8] sm:$0xff] }
 0x106   : > { %v295_v61 = vadd.f32 %v294_v22, %v293_v28  ;;  %v277_v12 = vadd.f32 %v276_v39, %v275_v51  ;;  %v1272_v51 = vadd.f32 %v1253_v41, %v3062_v3  ;;  %v1029_v41 = vsel %vm451_vm2, %v1026_v13, %v1028_v19 }
 0x107   : > { %1167 = vrot.lane.b32.xlu1 %v2721_v2, %s2322_s5  ;;  %v3182_v62 = vpop.permute.xlu0 %546  ;;  %v1041_v25 = vadd.f32 %v1029_v41, %v963_v50  ;;  %v1074_v32 = vsel %vm399_vm1, %v1071_v54, %v1073_v17  ;;  %v1239_v24 = vmul.f32 0.120078385, %v1233_v44  ;;  %v1349_v54 = vrot.slane %v1326_v10, 2  ;;  %v2161_v2 = vld [vmem:[#allocation3 + $0x28] sm:$0xf] }
 0x108   : > { %v3184_v34 = vpop.permute.xlu1 %831  ;;  %1421 = vrot.lane.b32.xlu0 %v2922_v0, %s2321_s17  ;;  %v278_v55 = vrot.slane %v277_v12, 1  ;;  %v296_v59 = vrot.slane %v295_v61, 2  ;;  %v4009_v50 = vrot.slane %v3136_v43, 2  ;;  %v3961_v41 = vlaneseq  ;;  %v2152_v43 = vld [vmem:[#allocation2 + $0x10] sm:$0xf] }
 0x10a   : > { %v279_v28 = vadd.f32 %v278_v55, %v277_v12  ;;  %v297_v22 = vadd.f32 %v296_v59, %v295_v61  ;;  %v1281_v61 = vmul.f32 0.23388076, %v1272_v51  ;;  %v3229_v51 = vadd.f32 %v1074_v32, %v1041_v25  ;;  %v2153_v25 = vld [vmem:[#allocation3 + $0x10] sm:$0xf] }
 0x10b   : > { %1389 = vrot.lane.b32.xlu1 %v3165_v30, %s2320_s6  ;;  %v3196_v39 = vpop.permute.xlu0 %550  ;;  %v1350_v17 = vsel %vm399_vm1, %v4009_v50, %v1349_v54  ;;  %v1467_v44 = vmul.f32 %v2153_v25, %v2152_v43  ;;  %v3266_v10 = vshrl.u32 %v3961_v41, 7  ;;  %v2155_v50 = vld [vmem:[#allocation3] sm:$0xff]  ;;  %v3279_v25 = vld [vmem:[#allocation4] sm:$0xff] }
 0x10c   : > { %v3198_v29 = vpop.permute.xlu1 %528  ;;  %1443 = vrot.lane.b32.xlu0 %v2759_v8, %s2322_s5  ;;  %2064 = vpush %v279_v28  ;;  %v298_v40 = vrot.slane %v297_v22, 1  ;;  %v1304_v13 = vrot.slane %v1281_v61, 1  ;;  %v2151_v61 = vld [vmem:[#allocation3 + $0x8] sm:$0xff] }
 0x10d   : > { %v560_v41 = vsub.s32 1, %v3266_v10  ;;  %v1486_v8 = vrot.slane %v1467_v44, 4  ;;  %v604_v35 = vsub.s32 3, %v3266_v10 }
 0x10e   : > { %v299_v12 = vadd.f32 %v298_v40, %v297_v22  ;;  %v1305_v14 = vsel %vm451_vm2, %v1302_v1, %v1304_v13 }
 0x10f   : > { %1441 = vrot.lane.b32.xlu1 %v2777_v23, %s2322_s5  ;;  %v3210_v55 = vpop.permute.xlu0 %833  ;;  %v1317_v22 = vadd.f32 %v1305_v14, %v1239_v24  ;;  %v1519_v14 = vrot.slane %v1467_v44, 2 }
 0x110   : > { %4003 = vst [vmem:[#allocation28_spill] sm:$0xff] %v3210_v55  ;;  %v3212_v59 = vpop.permute.xlu1 %815  ;;  %624 = vrot.lane.b32.xlu0 %v2789_v27, %s2322_s5  ;;  %2066 = vpush %v299_v12  ;;  %v3255_v12 = vmul.f32 %v2151_v61, %v2150_v45  ;;  %v538_v61 = vsub.s32 0, %v3266_v10  ;;  %v576_v27 = vsub.s32 2, %v3266_v10 }
 0x111   : > { %4004 = vst [vmem:[#allocation29_spill] sm:$0xff] %v3212_v59  ;;  %v3251_v1 = vadd.f32 %v1350_v17, %v1317_v22  ;;  %v2154_v22 = vld [vmem:[#allocation2] sm:$0xff]  ;;  %v1542_v31 = vadd.f32 %v1519_v14, %v1467_v44 }
 0x112   : > { %v1517_v24 = vrot.slane %v3255_v12, 2  ;;  %v1465_v17 = vmul.f32 %v2155_v50, %v2154_v22  ;;  %v1484_v23 = vrot.slane %v3255_v12, 4  ;;  %v2156_v50 = vld [vmem:[#allocation2 + $0x18] sm:$0xff] }
 0x113   : > { %598 = vrot.lane.b32.xlu1 %v2946_v4, %s2321_s17  ;;  %v3223_v20 = vpop.permute.xlu0 %1089 }
 0x114   : > { %4005 = vst [vmem:[#allocation30_spill] sm:$0xff] %v3223_v20  ;;  %v3225_v19 = vpop.permute.xlu1 %1087  ;;  %895 = vrot.lane.b32.xlu0 %v2798_v46, %s2322_s5  ;;  %v1520_v43 = vsel %vm399_vm1, %v1517_v24, %v1519_v14  ;;  %v1516_v22 = vrot.slane %v1465_v17, 2  ;;  %v1596_v46 = vmul.f32 0.2920817, %v1467_v44 }
 0x115   : > { %4006 = vst [vmem:[#allocation31_spill] sm:$0xff] %v3225_v19  ;;  %v1541_v20 = vadd.f32 %v1520_v43, %v3255_v12  ;;  %v1483_v19 = vrot.slane %v1465_v17, 4 }
 0x117   : > { %873 = vrot.lane.b32.xlu1 %v2970_v36, %s2321_s17  ;;  %v3236_v3 = vpop.permute.xlu0 %1107 }
 0x118   : > { %4007 = vst [vmem:[#allocation32_spill] sm:$0xff] %v3236_v3  ;;  %v3238_v28 = vpop.permute.xlu1 %1105  ;;  %1115 = vrot.lane.b32.xlu0 %v3229_v51, %s2320_s6 }
 0x119   : > { %4008 = vst [vmem:[#allocation33_spill] sm:$0xff] %v3238_v28  ;;  %v3321_v28 = vmul.f32 0.23388076, %v1541_v20 }
 0x11b   : > { %1097 = vrot.lane.b32.xlu1 %v3229_v51, %s2319_s28  ;;  %v3247_v37 = vpop.permute.xlu0 %1365 }
 0x11c   : > { %4010 = vst [vmem:[#allocation34_spill] sm:$0xff] %v3247_v37  ;;  %1169 = vrot.lane.b32.xlu0 %v2878_v38, %s2322_s5  ;;  %v2160_v37 = vld [vmem:[#allocation2 + $0x28] sm:$0xf] }
 0x11d   : > { %v3253_v40 = vpop.permute.xlu1 %1363  ;;  %v3294_v38 = vmul.f32 %v2161_v2, %v2160_v37  ;;  %v1487_v2 = vsel %vm365_vm0, %v1484_v23, %v1486_v8  ;;  %v1551_v8 = vmul.f32 0.23388076, %v1542_v31  ;;  %v3334_v31 = vmul.f32 0.2920817, %v1465_v17 }
 0x11e   : > { %4011 = vst [vmem:[#allocation35_spill] sm:$0xff] %v3253_v40  ;;  %v1505_v20 = vadd.f32 %v1487_v2, %v3255_v12 }
 0x11f   : > { %1147 = vrot.lane.b32.xlu1 %v3005_v52, %s2321_s17  ;;  %v3259_v32 = vpop.permute.xlu0 %1383  ;;  %v1570_v2 = vrot.slane %v1551_v8, 1 }
 0x120   : > { %4012 = vst [vmem:[#allocation36_spill] sm:$0xff] %v3259_v32  ;;  %1391 = vrot.lane.b32.xlu0 %v3251_v1, %s2320_s6 }
 0x121   : > { %v3263_v13 = vpop.permute.xlu1 %1381 }
 0x122   : > { %4013 = vst [vmem:[#allocation37_spill] sm:$0xff] %v3263_v13  ;;  %v2159_v13 = vld [vmem:[#allocation3 + $0x20] sm:$0xff] }
 0x123   : > { %1373 = vrot.lane.b32.xlu1 %v3251_v1, %s2319_s28  ;;  %v3271_v54 = vpop.permute.xlu0 %552 }
 0x124   : > { %4014 = vst [vmem:[#allocation38_spill] sm:$0xff] %v3271_v54  ;;  %1445 = vrot.lane.b32.xlu0 %v2922_v0, %s2322_s5  ;;  %v2158_v0 = vld [vmem:[#allocation2 + $0x20] sm:$0xff] }
 0x125   : > { %v3275_v45 = vpop.permute.xlu1 %530  ;;  %v3292_v32 = vmul.f32 %v2159_v13, %v2158_v0  ;;  %v3312_v0 = vmul.f32 0.2920817, %v3255_v12  ;;  %v1518_v13 = vsel %vm399_vm1, %v1516_v22, %v1517_v24  ;;  %v1485_v24 = vsel %vm365_vm0, %v1483_v19, %v1484_v23 }
 0x126   : > { %4015 = vst [vmem:[#allocation39_spill] sm:$0xff] %v3275_v45  ;;  %v2157_v45 = vld [vmem:[#allocation3 + $0x18] sm:$0xff]  ;;  %v1568_v12 = vrot.slane %v3321_v28, 1 }
 0x127   : > { %1423 = vrot.lane.b32.xlu1 %v3042_v63, %s2321_s17  ;;  %v3286_v54 = vpop.permute.xlu0 %592  ;;  %v3290_v40 = vmul.f32 %v2157_v45, %v2156_v50  ;;  %v3303_v45 = vrot.slane %v3279_v25, %v560_v41  ;;  %v3306_v50 = vrot.slane %v3279_v25, %v576_v27  ;;  %v1522_v14 = vrot.slane %v3292_v32, 2 }
 0x128   : > { %626 = vrot.lane.b32.xlu0 %v2946_v4, %s2322_s5  ;;  %v3300_v4 = vrot.slane %v3279_v25, %v538_v61  ;;  %v1524_v27 = vrot.slane %v3294_v38, 2 }
 0x129   : > { %v3296_v3 = vpop.permute.xlu1 %590  ;;  %4016 = vst [vmem:[#allocation40_spill] sm:$0xff] %v3306_v50  ;;  %v1521_v41 = vrot.slane %v3290_v40, 2  ;;  %v3329_v22 = vmul.f32 %v3306_v50, %v2589_v42  ;;  %v1488_v23 = vrot.slane %v3290_v40, 4 }
 0x12a   : > { %v1525_v19 = vsel %vm399_vm1, %v1522_v14, %v1524_v27 }
 0x12b   : > { %600 = vrot.lane.b32.xlu1 %v3081_v11, %s2321_s17  ;;  %v836_v37 = vpop.permute.xlu0 %835  ;;  %v1523_v42 = vsel %vm399_vm1, %v1521_v41, %v1522_v14  ;;  %v1489_v41 = vrot.slane %v3292_v32, 4  ;;  %v3359_v14 = vmul.f32 %v2637_v18, %v3306_v50  ;;  %v1511_v18 = vmul.f32 0.120078385, %v1505_v20 }
 0x12c   : > { %897 = vrot.lane.b32.xlu0 %v2970_v36, %s2322_s5  ;;  %v844_v61 = vmul.f32 %v836_v37, %v3303_v45  ;;  %v632_v36 = vsub.s32 4, %v3266_v10  ;;  %v1540_v37 = vadd.f32 %v1518_v13, %v1465_v17  ;;  %v1615_v13 = vrot.slane %v1596_v46, 2 }
 0x12d   : > { %v818_v43 = vpop.permute.xlu1 %817  ;;  %v1543_v28 = vadd.f32 %v1523_v42, %v3290_v40  ;;  %v1571_v42 = vsel %vm451_vm2, %v1568_v12, %v1570_v2 }
 0x12e   : > { %v826_v59 = vmul.f32 %v818_v43, %v3300_v4  ;;  %v1504_v43 = vadd.f32 %v1485_v24, %v1465_v17  ;;  %v1549_v46 = vmul.f32 0.23388076, %v1540_v37  ;;  %v3372_v8 = vrot.slane %v3279_v25, %v632_v36 }
 0x12f   : > { %875 = vrot.lane.b32.xlu1 %v3114_v21, %s2321_s17  ;;  %v3338_v55 = vpop.permute.xlu0 %867  ;;  %v1612_v24 = vrot.slane %v3334_v31, 2  ;;  %v1597_v36 = vmul.f32 0.2920817, %v3290_v40  ;;  %v1552_v31 = vmul.f32 0.23388076, %v1543_v28  ;;  %v3401_v28 = vmul.f32 %v2890_v57, %v2832_v60 }
 0x130   : > { %v3336_v44 = vadd.f32 %v844_v61, %v826_v59  ;;  %1171 = vrot.lane.b32.xlu0 %v3005_v52, %s2322_s5  ;;  %v3349_v59 = vrot.slane %v3279_v25, %v604_v35  ;;  %v3353_v61 = vmul.f32 %v3306_v50, %v2578_v26  ;;  %v1544_v35 = vadd.f32 %v1525_v19, %v3292_v32 }
 0x131   : > { %v3345_v10 = vpop.permute.xlu1 %865  ;;  %v3367_v26 = vmul.f32 %v2617_v7, %v3306_v50  ;;  %v4018_v19 = vrot.slane %v3312_v0, 2  ;;  %v3384_v25 = vmul.f32 0.2920817, %v3292_v32  ;;  %v1567_v20 = vrot.slane %v1549_v46, 1 }
 0x132   : > { %4017 = vst [vmem:[#allocation41_spill] sm:$0xff] %v3336_v44  ;;  %v1510_v44 = vmul.f32 0.120078385, %v1504_v43  ;;  %v3388_v2 = vmul.f32 0.23388076, %v1544_v35  ;;  %v1589_v43 = vadd.f32 %v1571_v42, %v1511_v18  ;;  %v3405_v35 = vmul.f32 %v2892_v49, %v2850_v9 }
 0x133   : > { %1149 = vrot.lane.b32.xlu1 %v3144_v47, %s2321_s17  ;;  %v1110_v17 = vpop.permute.xlu0 %1109  ;;  %v1616_v7 = vsel %vm399_vm1, %v4018_v19, %v1615_v13  ;;  %v541_v13 = vmul.f32 %v3300_v4, %v3127_v48  ;;  %v1545_v19 = vadd.f32 %v1524_v27, %v3294_v38  ;;  %v3409_v48 = vmul.f32 %v2894_v58, %v2859_v15 }
 0x134   : > { %1447 = vrot.lane.b32.xlu0 %v3042_v63, %s2322_s5  ;;  %v1119_v37 = vmul.f32 %v1110_v17, %v3303_v45  ;;  %v1490_v63 = vsel %vm365_vm0, %v1488_v23, %v1489_v41  ;;  %v1491_v17 = vrot.slane %v3294_v38, 4  ;;  %v1617_v27 = vrot.slane %v1597_v36, 2 }
 0x135   : > { %v1092_v52 = vpop.permute.xlu1 %1091  ;;  %v1506_v18 = vadd.f32 %v1490_v63, %v3290_v40  ;;  %v1569_v60 = vsel %vm451_vm2, %v1567_v20, %v1568_v12  ;;  %v1572_v57 = vrot.slane %v1552_v31, 1  ;;  %v1573_v9 = vrot.slane %v3388_v2, 1 }
 0x136   : > { %v1101_v50 = vmul.f32 %v1092_v52, %v3300_v4  ;;  %v1492_v49 = vsel %vm365_vm0, %v1489_v41, %v1491_v17  ;;  %v563_v15 = vmul.f32 %v3303_v45, %v3140_v56  ;;  %v1554_v63 = vmul.f32 0.23388076, %v1545_v19 }
 0x137   : > { %1425 = vrot.lane.b32.xlu1 %v3165_v30, %s2321_s17  ;;  %v1386_v23 = vpop.permute.xlu0 %1385  ;;  %v1599_v40 = vmul.f32 0.2920817, %v3294_v38  ;;  %v1527_v20 = vrot.slane %v3405_v35, 2  ;;  %v1529_v41 = vrot.slane %v3409_v48, 2  ;;  %v1512_v31 = vmul.f32 0.120078385, %v1506_v18 }
 0x138   : > { %v3393_v52 = vadd.f32 %v1119_v37, %v1101_v50  ;;  %899 = vrot.lane.b32.xlu0 %v3114_v21, %s2322_s5  ;;  %v1395_v53 = vmul.f32 %v1386_v23, %v3303_v45  ;;  %v1618_v37 = vrot.slane %v3384_v25, 2  ;;  %v1526_v25 = vrot.slane %v3401_v28, 2 }
 0x139   : > { %v1368_v46 = vpop.permute.xlu1 %1367  ;;  %v1507_v2 = vadd.f32 %v1492_v49, %v3292_v32  ;;  %v540_v17 = vmul.f32 %v3300_v4, %v3110_v5  ;;  %v3436_v38 = vadd.f32 %v1616_v7, %v1589_v43  ;;  %v4019_v23 = vrot.slane %v3312_v0, 2 }
 0x13a   : > { %v1377_v50 = vmul.f32 %v1368_v46, %v3300_v4  ;;  %v1574_v46 = vsel %vm451_vm2, %v1572_v57, %v1573_v9  ;;  %v1619_v5 = vsel %vm399_vm1, %v1617_v27, %v1618_v37  ;;  %v1575_v32 = vrot.slane %v1554_v63, 1 }
 0x13b   : > { %628 = vrot.lane.b32.xlu1 %v3081_v11, %s2322_s5  ;;  %v555_v42 = vpop.permute.xlu0 %554  ;;  %v1614_v19 = vsel %vm399_vm1, %v1612_v24, %v4019_v23  ;;  %v562_v7 = vmul.f32 %v3303_v45, %v3182_v62  ;;  %v1620_v0 = vrot.slane %v1599_v40, 2  ;;  %v1528_v24 = vsel %vm399_vm1, %v1526_v25, %v1527_v20 }
 0x13c   : > { %v3421_v58 = vadd.f32 %v1395_v53, %v1377_v50  ;;  %1173 = vrot.lane.b32.xlu0 %v3144_v47, %s2322_s5  ;;  %v566_v36 = vmul.f32 %v3303_v45, %v555_v42  ;;  %v1588_v53 = vadd.f32 %v1569_v60, %v1510_v44  ;;  %v569_v50 = vadd.f32 %v563_v15, %v541_v13 }
 0x13d   : > { %v533_v12 = vpop.permute.xlu1 %532  ;;  %v1530_v13 = vsel %vm399_vm1, %v1527_v20, %v1529_v41  ;;  %v607_v18 = vmul.f32 %v3349_v59, %v3286_v54  ;;  %v1590_v57 = vadd.f32 %v1574_v46, %v1512_v31  ;;  %v1513_v27 = vmul.f32 0.120078385, %v1507_v2  ;;  %s2065_s8 = spop %2064 }
 0x13e   : > { %v544_v56 = vmul.f32 %v3300_v4, %v533_v12  ;;  %v3457_v60 = vadd.f32 %v1614_v19, %v1588_v53  ;;  %v841_v49 = vmul.f32 %v3173_v33, %v3303_v45  ;;  %v842_v62 = vmul.f32 %v3184_v34, %v3303_v45 }
 0x13f   : > { %1151 = vrot.lane.b32.xlu1 %v3229_v51, %s2321_s17  ;;  %v619_v44 = vpop.permute.xlu0 %618  ;;  %v1493_v15 = vrot.slane %v3401_v28, 4  ;;  %v1494_v63 = vrot.slane %v3405_v35, 4  ;;  %v585_v40 = vadd.f32 %v3329_v22, %v569_v50  ;;  %v1546_v33 = vadd.f32 %v1528_v24, %v3401_v28 }
 0x140   : > { %v3442_v42 = vadd.f32 %v566_v36, %v544_v56  ;;  %1449 = vrot.lane.b32.xlu0 %v3165_v30, %s2322_s5  ;;  %v1576_v36 = vsel %vm451_vm2, %v1573_v9, %v1575_v32  ;;  %v1547_v12 = vadd.f32 %v1530_v13, %v3405_v35  ;;  %v823_v34 = vmul.f32 %v3152_v16, %v3300_v4 }
 0x141   : > { %v3449_v43 = vpop.permute.xlu1 %594  ;;  %v824_v25 = vmul.f32 %v3161_v6, %v3300_v4  ;;  %v568_v20 = vadd.f32 %v562_v7, %v540_v17  ;;  %v1621_v22 = vsel %vm399_vm1, %v1618_v37, %v1620_v0  ;;  %v613_v53 = vadd.f32 %v607_v18, %v585_v40  ;;  %s2067_s10 = spop %2066 }
 0x142   : > { %v3479_v2 = vadd.f32 %v1619_v5, %v1590_v57  ;;  %v3482_v9 = vmul.f32 0.2920817, %v3401_v28  ;;  %v847_v23 = vadd.f32 %v841_v49, %v823_v34  ;;  %v1591_v16 = vadd.f32 %v1576_v36, %v1513_v27 }
 0x143   : > { %1427 = vrot.lane.b32.xlu1 %v3251_v1, %s2321_s17  ;;  %v820_v54 = vpop.permute.xlu0 %819  ;;  %v848_v19 = vadd.f32 %v842_v62, %v824_v25  ;;  %v1495_v6 = vsel %vm365_vm0, %v1493_v15, %v1494_v63  ;;  %v606_v17 = vmul.f32 %v3349_v59, %v3296_v3  ;;  %v1555_v50 = vmul.f32 0.23388076, %v1546_v33 }
 0x144   : > { %1451 = vrot.lane.b32.xlu0 %v3251_v1, %s2322_s5  ;;  %v3493_v5 = vmul.f32 0.23388076, %v1547_v12  ;;  %v584_v32 = vadd.f32 %v3353_v61, %v568_v20  ;;  %v878_v7 = vmul.f32 %v3338_v55, %v3349_v59  ;;  %v3499_v24 = vmul.f32 0.2920817, %v3405_v35 }
 0x145   : > { %v621_v56 = vpop.permute.xlu1 %620  ;;  %v1496_v3 = vrot.slane %v3409_v48, 4  ;;  %v877_v13 = vmul.f32 %v3345_v10, %v3349_v59  ;;  %v634_v18 = vmul.f32 %v3372_v8, %v619_v44  ;;  %v827_v57 = vmul.f32 %v820_v54, %v3300_v4 }
 0x146   : > { %v635_v31 = vmul.f32 %v3372_v8, %v621_v56  ;;  %v860_v61 = vadd.f32 %v3359_v14, %v848_v19  ;;  %v859_v49 = vadd.f32 %v3367_v26, %v847_v23  ;;  %v1508_v55 = vadd.f32 %v1495_v6, %v3401_v28 }
 0x147   : > { %1175 = vrot.lane.b32.xlu1 %v3229_v51, %s2322_s5  ;;  %v3489_v46 = vpop.permute.xlu0 %869  ;;  %v1548_v62 = vadd.f32 %v1529_v41, %v3409_v48  ;;  %v612_v10 = vadd.f32 %v606_v17, %v584_v32  ;;  %v1577_v40 = vrot.slane %v1555_v50, 1  ;;  %v1578_v14 = vrot.slane %v3493_v5, 1 }
 0x148   : > { %v641_v37 = vadd.f32 %v635_v31, %v613_v53  ;;  %1641 = vrot.lane.b32.xlu0 %v3436_v38, %s2319_s28  ;;  %v884_v26 = vadd.f32 %v878_v7, %v860_v61  ;;  %v883_v33 = vadd.f32 %v877_v13, %v859_v49  ;;  %v3522_v34 = vadd.f32 %v1621_v22, %v1591_v16 }
 0x149   : > { %v838_v0 = vpop.permute.xlu1 %837  ;;  %v640_v28 = vadd.f32 %v634_v18, %v612_v10  ;;  %v1622_v25 = vrot.slane %v3482_v9, 2  ;;  %v1623_v20 = vrot.slane %v3499_v24, 2  ;;  %v1497_v56 = vsel %vm365_vm0, %v1494_v63, %v1496_v3 }
 0x14a   : > { %v845_v27 = vmul.f32 %v838_v0, %v3303_v45  ;;  %v1514_v23 = vmul.f32 0.120078385, %v1508_v55  ;;  %v1579_v19 = vsel %vm451_vm2, %v1577_v40, %v1578_v14  ;;  %v1557_v22 = vmul.f32 0.23388076, %v1548_v62 }
 0x14b   : > { %1639 = vrot.lane.b32.xlu1 %v3457_v60, %s2319_s28  ;;  %v892_v44 = vpop.permute.xlu0 %891  ;;  %v3532_v16 = vmul.f32 %v641_v37, %v641_v37  ;;  %v3539_v5 = vmul.f32 %v640_v28, %v640_v28  ;;  %v1509_v18 = vadd.f32 %v1497_v56, %v3405_v35  ;;  %v1602_v49 = vmul.f32 0.2920817, %v3409_v48  ;;  %v4021_v56 = vld [vmem:[#allocation40_spill] sm:$0xff] }
 0x14c   : > { %v3515_v15 = vadd.f32 %v845_v27, %v827_v57  ;;  %1659 = vrot.lane.b32.xlu0 %v3436_v38, %s2320_s6  ;;  %v902_v54 = vmul.f32 %v892_v44, %v3372_v8  ;;  %v1592_v13 = vadd.f32 %v1579_v19, %v1514_v23  ;;  %v1624_v27 = vsel %vm399_vm1, %v1622_v25, %v1623_v20 }
 0x14d   : > { %v890_v36 = vpop.permute.xlu1 %889  ;;  %v1580_v61 = vrot.slane %v1557_v22, 1  ;;  %v1515_v10 = vmul.f32 0.120078385, %v1509_v18  ;;  %v564_v48 = vmul.f32 %v3303_v45, %v3196_v39  ;;  %v4020_v39 = vld [vmem:[#allocation14_spill] sm:$0xff]  ;;  %v608_v23 = vmul.f32 %v3349_v59, %v3449_v43 }
 0x14e   : > { %v901_v12 = vmul.f32 %v890_v36, %v3372_v8  ;;  %v908_v41 = vadd.f32 %v902_v54, %v884_v26  ;;  %v3571_v62 = vadd.f32 %v1624_v27, %v1592_v13  ;;  %v1625_v26 = vrot.slane %v1602_v49, 2 }
 0x14f   : > { %1657 = vrot.lane.b32.xlu1 %v3457_v60, %s2320_s6  ;;  %v1112_v31 = vpop.permute.xlu0 %1111  ;;  %v1581_v40 = vsel %vm451_vm2, %v1578_v14, %v1580_v61  ;;  %v542_v36 = vmul.f32 %v3300_v4, %v3198_v29 }
 0x150   : > { %v907_v53 = vadd.f32 %v901_v12, %v883_v33  ;;  %1661 = vrot.lane.b32.xlu0 %v3479_v2, %s2320_s6  ;;  %v3534_v6 = vmul.f32 %v908_v41, %v908_v41  ;;  %v3536_v17 = vmul.f32 %v908_v41, %v641_v37  ;;  %v1120_v9 = vmul.f32 %v1112_v31, %v3303_v45 }
 0x151   : > { %v1094_v50 = vpop.permute.xlu1 %1093  ;;  %v1593_v14 = vadd.f32 %v1581_v40, %v1515_v10  ;;  %v1626_v41 = vsel %vm399_vm1, %v1623_v20, %v1625_v26  ;;  %v570_v25 = vadd.f32 %v564_v48, %v542_v36 }
 0x152   : > { %v3541_v63 = vmul.f32 %v907_v53, %v907_v53  ;;  %v3543_v32 = vmul.f32 %v907_v53, %v640_v28  ;;  %v1102_v7 = vmul.f32 %v1094_v50, %v3300_v4  ;;  %v3548_v0 = vadd.f32 %v3534_v6, %v3532_v16 }
 0x153   : > { %1643 = vrot.lane.b32.xlu1 %v3479_v2, %s2319_s28  ;;  %v3558_v3 = vpop.permute.xlu0 %1143  ;;  %v580_v53 = vmul.f32 %v4021_v56, %v4020_v39  ;;  %v3597_v31 = vadd.f32 %v1626_v41, %v1593_v14  ;;  %v4026_v41 = vld [vmem:[#allocation21_spill] sm:$0xff] }
 0x154   : > { %v3554_v37 = vadd.f32 %v3541_v63, %v3539_v5  ;;  %v3556_v24 = vadd.f32 %v1120_v9, %v1102_v7  ;;  %1663 = vrot.lane.b32.xlu0 %v3522_v34, %s2320_s6  ;;  %v4023_v9 = vld [vmem:[#allocation28_spill] sm:$0xff]  ;;  %v4024_v7 = vld [vmem:[#allocation29_spill] sm:$0xff] }
 0x155   : > { %v3563_v57 = vpop.permute.xlu1 %1141  ;;  %4022 = vst [vmem:[#allocation14_spill] sm:$0xff] %v3597_v31  ;;  %v843_v50 = vmul.f32 %v4023_v9, %v3303_v45  ;;  %v825_v13 = vmul.f32 %v4024_v7, %v3300_v4  ;;  %v586_v18 = vadd.f32 %v580_v53, %v570_v25  ;;  %v856_v25 = vmul.f32 %v4026_v41, %v4021_v56  ;;  %v4027_v39 = vld [vmem:[#allocation33_spill] sm:$0xff] }
 0x156   : > { %v1117_v53 = vmul.f32 %v4027_v39, %v3303_v45  ;;  %v4029_v7 = vld [vmem:[#allocation41_spill] sm:$0xff] }
 0x157   : > { %1645 = vrot.lane.b32.xlu1 %v3522_v34, %s2319_s28  ;;  %v1388_v55 = vpop.permute.xlu0 %1387  ;;  %v614_v43 = vadd.f32 %v608_v23, %v586_v18  ;;  %v849_v10 = vadd.f32 %v843_v50, %v825_v13  ;;  %v862_v13 = vadd.f32 %v856_v25, %v4029_v7 }
 0x158   : > { %1695 = vrot.lane.b32.xlu0 %v3436_v38, %s2321_s17  ;;  %v1396_v44 = vmul.f32 %v1388_v55, %v3303_v45 }
 0x159   : > { %v1370_v35 = vpop.permute.xlu1 %1369 }
 0x15a   : > { %v1378_v54 = vmul.f32 %v1370_v35, %v3300_v4 }
 0x15b   : > { %1693 = vrot.lane.b32.xlu1 %v3457_v60, %s2321_s17  ;;  %v3584_v28 = vpop.permute.xlu0 %1419 }
 0x15c   : > { %v3582_v33 = vadd.f32 %v1396_v44, %v1378_v54  ;;  %1665 = vrot.lane.b32.xlu0 %v3571_v62, %s2320_s6  ;;  %v4025_v44 = vld [vmem:[#allocation15_spill] sm:$0xff]  ;;  %v879_v54 = vmul.f32 %v3489_v46, %v3349_v59 }
 0x15d   : > { %v3588_v12 = vpop.permute.xlu1 %1417  ;;  %v855_v35 = vmul.f32 %v4025_v44, %v4021_v56  ;;  %v4028_v46 = vld [vmem:[#allocation31_spill] sm:$0xff]  ;;  %v4031_v44 = vld [vmem:[#allocation30_spill] sm:$0xff] }
 0x15f   : > { %1647 = vrot.lane.b32.xlu1 %v3571_v62, %s2319_s28  ;;  %v557_v29 = vpop.permute.xlu0 %556 }
 0x160   : > { %1717 = vrot.lane.b32.xlu0 %v3457_v60, %s2322_s5  ;;  %v567_v19 = vmul.f32 %v3303_v45, %v557_v29  ;;  %v861_v29 = vadd.f32 %v855_v35, %v849_v10  ;;  %v1100_v35 = vmul.f32 %v4031_v44, %v3300_v4 }
 0x161   : > { %v535_v22 = vpop.permute.xlu1 %534 }
 0x162   : > { %v545_v20 = vmul.f32 %v3300_v4, %v535_v22  ;;  %v1099_v22 = vmul.f32 %v4028_v46, %v3300_v4  ;;  %v4033_v46 = vld [vmem:[#allocation22_spill] sm:$0xff] }
 0x163   : > { %1697 = vrot.lane.b32.xlu1 %v3479_v2, %s2321_s17  ;;  %v623_v61 = vpop.permute.xlu0 %622 }
 0x164   : > { %v3609_v27 = vadd.f32 %v567_v19, %v545_v20  ;;  %1649 = vrot.lane.b32.xlu0 %v3597_v31, %s2319_s28  ;;  %v636_v49 = vmul.f32 %v3372_v8, %v623_v61  ;;  %v885_v20 = vadd.f32 %v879_v54, %v861_v29  ;;  %v1123_v61 = vadd.f32 %v1117_v53, %v1099_v22  ;;  %s2250_s28 = scalar_lea.vmem %s2249_s4, 256 }
 0x165   : > { %v3614_v55 = vpop.permute.xlu1 %596  ;;  %v1133_v22 = vmul.f32 %v3144_v47, %v4021_v56  ;;  %p2252_p4 = scmp.lt.s32.totalorder %s2250_s28, %s2244_s11 }
 0x166   : > { %v642_v40 = vadd.f32 %v636_v49, %v614_v43  ;;  %v4030_v43 = vld [vmem:[#allocation17_spill] sm:$0xff] }
 0x167   : > { %1719 = vrot.lane.b32.xlu1 %v3436_v38, %s2322_s5  ;;  %v840_v26 = vpop.permute.xlu0 %839  ;;  %v1129_v49 = vmul.f32 %v4030_v43, %v4021_v56  ;;  %p2253_p5 = por %p2252_p4, %p2251_p1 }
 0x168   : > { %1699 = vrot.lane.b32.xlu0 %v3522_v34, %s2321_s17  ;;  %v846_v48 = vmul.f32 %v840_v26, %v3303_v45  ;;  %v4032_v26 = vld [vmem:[#allocation32_spill] sm:$0xff]  ;;  %v3655_v41 = vmul.f32 %v642_v40, %v642_v40 }
 0x169   : > { %v822_v36 = vpop.permute.xlu1 %821  ;;  %v1118_v54 = vmul.f32 %v4032_v26, %v3303_v45  ;;  %v4035_v26 = vld [vmem:[#allocation34_spill] sm:$0xff]  ;;  %p2254_p9 = pnand %p2253_p5, %p2247_p10 }
 0x16a   : > { %v828_v14 = vmul.f32 %v822_v36, %v3300_v4 }
 0x16b   : > { %1667 = vrot.lane.b32.xlu1 %v3597_v31, %s2320_s6  ;;  %v894_v19 = vpop.permute.xlu0 %893 }
 0x16c   : > { %v3632_v23 = vadd.f32 %v846_v48, %v828_v14  ;;  %1701 = vrot.lane.b32.xlu0 %v3571_v62, %s2321_s17  ;;  %v903_v9 = vmul.f32 %v894_v19, %v3372_v8  ;;  %v1153_v48 = vmul.f32 %v3563_v57, %v3349_v59  ;;  %v1131_v57 = vmul.f32 %v4033_v46, %v4021_v56 }
 0x16d   : > { %v872_v50 = vpop.permute.xlu1 %871 }
 0x16e   : > { %v880_v18 = vmul.f32 %v872_v50, %v3349_v59  ;;  %v909_v10 = vadd.f32 %v903_v9, %v885_v20  ;;  %v1135_v20 = vadd.f32 %v1129_v49, %v1123_v61  ;;  %v4034_v50 = vld [vmem:[#allocation16_spill] sm:$0xff]  ;;  %v1154_v49 = vmul.f32 %v3558_v3, %v3349_v59 }
 0x16f   : > { %1721 = vrot.lane.b32.xlu1 %v3479_v2, %s2322_s5  ;;  %v1114_v14 = vpop.permute.xlu0 %1113  ;;  %v1130_v7 = vmul.f32 %v4034_v50, %v4021_v56 }
 0x170   : > { %v3651_v36 = vadd.f32 %v880_v18, %v862_v13  ;;  %1703 = vrot.lane.b32.xlu0 %v3597_v31, %s2321_s17  ;;  %v3657_v25 = vmul.f32 %v909_v10, %v909_v10  ;;  %v3659_v39 = vmul.f32 %v909_v10, %v642_v40  ;;  %v1121_v53 = vmul.f32 %v1114_v14, %v3303_v45  ;;  %v4036_v14 = vld [vmem:[#allocation36_spill] sm:$0xff] }
 0x171   : > { %v1096_v29 = vpop.permute.xlu1 %1095  ;;  %v1124_v40 = vadd.f32 %v1118_v54, %v1100_v35  ;;  %v1159_v43 = vadd.f32 %v1153_v48, %v1135_v20  ;;  %v1137_v10 = vadd.f32 %v1131_v57, %v3393_v52  ;;  %v1376_v54 = vmul.f32 %v4035_v26, %v3300_v4  ;;  %v4037_v48 = vld [vmem:[#allocation37_spill] sm:$0xff]  ;;  %v4038_v20 = vld [vmem:[#allocation23_spill] sm:$0xff]  ;;  %v4040_v26 = vld [vmem:[#allocation38_spill] sm:$0xff] }
 0x172   : > { %v1103_v19 = vmul.f32 %v1096_v29, %v3300_v4  ;;  %v3669_v9 = vadd.f32 %v3657_v25, %v3655_v41  ;;  %v1407_v50 = vmul.f32 %v4038_v20, %v4021_v56 }
 0x173   : > { %1723 = vrot.lane.b32.xlu1 %v3522_v34, %s2322_s5  ;;  %v1166_v18 = vpop.permute.xlu0 %1165  ;;  %v1136_v3 = vadd.f32 %v1130_v7, %v1124_v40  ;;  %v4041_v40 = vld [vmem:[#allocation39_spill] sm:$0xff] }
 0x174   : > { %v1127_v13 = vadd.f32 %v1121_v53, %v1103_v19  ;;  %1727 = vrot.lane.b32.xlu0 %v3597_v31, %s2322_s5  ;;  %v1177_v47 = vmul.f32 %v1166_v18, %v3372_v8  ;;  %v1394_v53 = vmul.f32 %v4036_v14, %v3303_v45  ;;  %v1393_v19 = vmul.f32 %v4037_v48, %v3303_v45 }
 0x175   : > { %v1146_v61 = vpop.permute.xlu1 %1145  ;;  %v565_v14 = vmul.f32 %v3303_v45, %v4040_v26  ;;  %v543_v7 = vmul.f32 %v3300_v4, %v4041_v40 }
 0x176   : > { %v1155_v44 = vmul.f32 %v1146_v61, %v3349_v59  ;;  %v3682_v35 = vadd.f32 %v1133_v22, %v1127_v13  ;;  %v1183_v29 = vadd.f32 %v1177_v47, %v1159_v43  ;;  %v4039_v13 = vld [vmem:[#allocation35_spill] sm:$0xff]  ;;  %v1160_v43 = vadd.f32 %v1154_v49, %v1136_v3 }
 0x177   : > { %1725 = vrot.lane.b32.xlu1 %v3571_v62, %s2322_s5  ;;  %v1372_v52 = vpop.permute.xlu0 %1371  ;;  %v1375_v18 = vmul.f32 %v4039_v13, %v3300_v4  ;;  %v1400_v61 = vadd.f32 %v1394_v53, %v1376_v54  ;;  %v1430_v49 = vmul.f32 %v3584_v28, %v3349_v59  ;;  %v1413_v54 = vadd.f32 %v1407_v50, %v3421_v58  ;;  %v4044_v28 = vld [vmem:[#allocation20_spill] sm:$0xff] }
 0x178   : > { %v3692_v46 = vadd.f32 %v1155_v44, %v1137_v10  ;;  %v1759_v57 = vsub.f32 %v1183_v29, %v3539_v5  ;;  %v4042_v10 = vld [vmem:[#allocation18_spill] sm:$0xff]  ;;  %v4043_v29 = vld [vmem:[#allocation19_spill] sm:$0xff]  ;;  %v1429_v13 = vmul.f32 %v3588_v12, %v3349_v59  ;;  %v581_v58 = vmul.f32 %v4021_v56, %v4044_v28 }
 0x179   : > { %v1168_v22 = vpop.permute.xlu1 %1167  ;;  %v1406_v5 = vmul.f32 %v4042_v10, %v4021_v56  ;;  %v1399_v44 = vadd.f32 %v1393_v19, %v1375_v18  ;;  %v1405_v48 = vmul.f32 %v4043_v29, %v4021_v56  ;;  %v1379_v19 = vmul.f32 %v1372_v52, %v3300_v4 }
 0x17a   : > { %v1178_v47 = vmul.f32 %v1168_v22, %v3372_v8  ;;  %v1409_v22 = vmul.f32 %v3165_v30, %v4021_v56  ;;  %v609_v12 = vmul.f32 %v3349_v59, %v3614_v55 }
 0x17b   : > { %v1422_v31 = vpop.permute.xlu0 %1421  ;;  %v1412_v26 = vadd.f32 %v1406_v5, %v1400_v61 }
 0x17c   : > { %v1184_v20 = vadd.f32 %v1178_v47, %v1160_v43  ;;  %v1431_v53 = vmul.f32 %v1422_v31, %v3349_v59  ;;  %v571_v47 = vadd.f32 %v565_v14, %v543_v7  ;;  %v1411_v31 = vadd.f32 %v1405_v48, %v1399_v44  ;;  %v4045_v14 = vld [vmem:[#allocation24_spill] sm:$0xff] }
 0x17d   : > { %v1390_v3 = vpop.permute.xlu1 %1389  ;;  %v1436_v30 = vadd.f32 %v1430_v49, %v1412_v26  ;;  %v582_v61 = vmul.f32 %v4021_v56, %v4045_v14  ;;  %v4046_v26 = vld [vmem:[#allocation25_spill] sm:$0xff] }
 0x17e   : > { %v1760_v18 = vsub.f32 %v1184_v20, %v3532_v16  ;;  %v1397_v43 = vmul.f32 %v1390_v3, %v3303_v45  ;;  %v3721_v50 = vadd.f32 %v1431_v53, %v1413_v54  ;;  %v1435_v16 = vadd.f32 %v1429_v13, %v1411_v31 }
 0x17f   : > { %v1444_v10 = vpop.permute.xlu0 %1443  ;;  %v587_v5 = vadd.f32 %v581_v58, %v571_v47  ;;  %v588_v13 = vadd.f32 %v582_v61, %v3442_v42 }
 0x180   : > { %v1403_v40 = vadd.f32 %v1397_v43, %v1379_v19  ;;  %v1454_v52 = vmul.f32 %v1444_v10, %v3372_v8  ;;  %v1814_v10 = vadd.f32 0.0001, %v3548_v0 }
 0x181   : > { %v1442_v29 = vpop.permute.xlu1 %1441  ;;  %v615_v53 = vadd.f32 %v609_v12, %v587_v5 }
 0x182   : > { %v1453_v20 = vmul.f32 %v1442_v29, %v3372_v8  ;;  %v3729_v7 = vadd.f32 %v1409_v22, %v1403_v40  ;;  %v1460_v54 = vadd.f32 %v1454_v52, %v1436_v30  ;;  %v857_v22 = vmul.f32 %v4046_v26, %v4021_v56 }
 0x183   : > { %v625_v48 = vpop.permute.xlu0 %624 }
 0x184   : > { %v1459_v44 = vadd.f32 %v1453_v20, %v1435_v16  ;;  %v1766_v49 = vsub.f32 %v1460_v54, %v3534_v6  ;;  %v637_v55 = vmul.f32 %v3372_v8, %v625_v48  ;;  %v863_v42 = vadd.f32 %v857_v22, %v3515_v15 }
 0x185   : > { %v599_v3 = vpop.permute.xlu1 %598 }
 0x186   : > { %v1765_v19 = vsub.f32 %v1459_v44, %v3541_v63  ;;  %v610_v43 = vmul.f32 %v3349_v59, %v599_v3  ;;  %v1820_v28 = vadd.f32 %v1766_v49, %v1760_v18  ;;  %v643_v47 = vadd.f32 %v637_v55, %v615_v53  ;;  %v4047_v44 = vld [vmem:[#allocation26_spill] sm:$0xff] }
 0x187   : > { %v896_v40 = vpop.permute.xlu0 %895  ;;  %v1813_v63 = vadd.f32 0.0001, %v3554_v37  ;;  %v1132_v48 = vmul.f32 %v4047_v44, %v4021_v56 }
 0x188   : > { %v1819_v58 = vadd.f32 %v1765_v19, %v1759_v57  ;;  %v616_v31 = vadd.f32 %v610_v43, %v588_v13  ;;  %v1826_v6 = vadd.f32 0.0009, %v1820_v28  ;;  %v904_v30 = vmul.f32 %v896_v40, %v3372_v8 }
 0x189   : > { %v874_v12 = vpop.permute.xlu1 %873  ;;  %v3748_v0 = vmul.f32 %v643_v47, %v643_v47  ;;  %v1138_v13 = vadd.f32 %v1132_v48, %v3556_v24 }
 0x18a   : > { %v1825_v52 = vadd.f32 0.0009, %v1819_v58  ;;  %v881_v29 = vmul.f32 %v874_v12, %v3349_v59  ;;  %v3743_v16 = vmul.f32 %v1826_v6, %v1814_v10  ;;  %v910_v18 = vadd.f32 %v904_v30, %v3651_v36 }
 0x18b   : > { %v1116_v14 = vpop.permute.xlu0 %1115  ;;  %v1134_v36 = vmul.f32 %v3229_v51, %v4021_v56 }
 0x18c   : > { %v3746_v57 = vmul.f32 %v1825_v52, %v1813_v63  ;;  %v887_v20 = vadd.f32 %v881_v29, %v863_v42  ;;  %v3750_v61 = vmul.f32 %v910_v18, %v910_v18  ;;  %v3752_v5 = vmul.f32 %v910_v18, %v643_v47 }
 0x18d   : > { %v1122_v37 = vmul.f32 %v1116_v14, %v3303_v45  ;;  %v1098_v54 = vpop.permute.xlu1 %1097 }
 0x18e   : > { %v1104_v15 = vmul.f32 %v1098_v54, %v3300_v4  ;;  %v3762_v53 = vadd.f32 %v3750_v61, %v3748_v0  ;;  %2138 = vrcp.f32 %v3746_v57 }
 0x18f   : > { %v1170_v55 = vpop.permute.xlu0 %1169  ;;  %2140 = vrcp.f32 %v3743_v16 }
 0x190   : > { %v1128_v49 = vadd.f32 %v1122_v37, %v1104_v15  ;;  %v1179_v3 = vmul.f32 %v1170_v55, %v3372_v8  ;;  %v4048_v15 = vld [vmem:[#allocation27_spill] sm:$0xff] }
 0x191   : > { %v1148_v19 = vpop.permute.xlu1 %1147 }
 0x192   : > { %v1156_v43 = vmul.f32 %v1148_v19, %v3349_v59  ;;  %v3767_v26 = vadd.f32 %v1134_v36, %v1128_v49  ;;  %v1185_v22 = vadd.f32 %v1179_v3, %v3692_v46  ;;  %v1815_v46 = vadd.f32 0.0001, %v3669_v9 }
 0x193   : > { %v1392_v47 = vpop.permute.xlu0 %1391 }
 0x194   : > { %v1162_v28 = vadd.f32 %v1156_v43, %v1138_v13  ;;  %v1761_v51 = vsub.f32 %v1185_v22, %v3655_v41  ;;  %v583_v43 = vmul.f32 %v4021_v56, %v3081_v11 }
 0x195   : > { %v1374_v58 = vpop.permute.xlu1 %1373 }
 0x197   : > { %v1446_v40 = vpop.permute.xlu0 %1445 }
 0x198   : > { %v1455_v10 = vmul.f32 %v1446_v40, %v3372_v8 }
 0x199   : > { %v1424_v6 = vpop.permute.xlu1 %1423 }
 0x19a   : > { %v1461_v30 = vadd.f32 %v1455_v10, %v3721_v50  ;;  %v1408_v50 = vmul.f32 %v4048_v15, %v4021_v56 }
 0x19b   : > { %v627_v12 = vpop.permute.xlu0 %626 }
 0x19c   : > { %v1767_v24 = vsub.f32 %v1461_v30, %v3657_v25  ;;  %v638_v63 = vmul.f32 %v3372_v8, %v627_v12  ;;  %v1432_v25 = vmul.f32 %v1424_v6, %v3349_v59  ;;  %v1414_v3 = vadd.f32 %v1408_v50, %v3582_v33 }
 0x19d   : > { %v601_v52 = vpop.permute.xlu1 %600 }
 0x19e   : > { %v1821_v42 = vadd.f32 %v1767_v24, %v1761_v51  ;;  %v644_v14 = vadd.f32 %v638_v63, %v616_v31  ;;  %v1438_v51 = vadd.f32 %v1432_v25, %v1414_v3  ;;  %v611_v33 = vmul.f32 %v3349_v59, %v601_v52 }
 0x19f   : > { %v898_v29 = vpop.permute.xlu0 %897  ;;  %v1410_v3 = vmul.f32 %v3251_v1, %v4021_v56 }
 0x1a0   : > { %v1827_v18 = vadd.f32 0.0009, %v1821_v42  ;;  %v905_v41 = vmul.f32 %v898_v29, %v3372_v8  ;;  %v3782_v36 = vmul.f32 %v644_v14, %v644_v14 }
 0x1a1   : > { %v876_v37 = vpop.permute.xlu1 %875 }
 0x1a2   : > { %v3777_v54 = vmul.f32 %v1827_v18, %v1815_v46  ;;  %v911_v44 = vadd.f32 %v905_v41, %v887_v20  ;;  %v858_v20 = vmul.f32 %v3114_v21, %v4021_v56  ;;  %v882_v40 = vmul.f32 %v876_v37, %v3349_v59 }
 0x1a3   : > { %v1172_v48 = vpop.permute.xlu0 %1171  ;;  %v589_v21 = vadd.f32 %v583_v43, %v3609_v27  ;;  %v1380_v18 = vmul.f32 %v1374_v58, %v3300_v4  ;;  %v1816_v27 = vadd.f32 0.0001, %v3762_v53 }
 0x1a4   : > { %v3784_v49 = vmul.f32 %v911_v44, %v911_v44  ;;  %v3786_v55 = vmul.f32 %v911_v44, %v644_v14  ;;  %v1180_v9 = vmul.f32 %v1172_v48, %v3372_v8  ;;  %v864_v12 = vadd.f32 %v858_v20, %v3632_v23 }
 0x1a5   : > { %v1150_v31 = vpop.permute.xlu1 %1149  ;;  %v617_v14 = vadd.f32 %v611_v33, %v589_v21  ;;  %2142 = vrcp.f32 %v3777_v54 }
 0x1a6   : > { %v1811_v19 = vadd.f32 %v3784_v49, %v3782_v36  ;;  %v1186_v13 = vadd.f32 %v1180_v9, %v1162_v28  ;;  %v1157_v28 = vmul.f32 %v1150_v31, %v3349_v59  ;;  %v888_v11 = vadd.f32 %v882_v40, %v864_v12 }
 0x1a7   : > { %v1448_v22 = vpop.permute.xlu0 %1447 }
 0x1a8   : > { %v1762_v10 = vsub.f32 %v1186_v13, %v3748_v0  ;;  %v1456_v6 = vmul.f32 %v1448_v22, %v3372_v8  ;;  %v1398_v0 = vmul.f32 %v1392_v47, %v3303_v45  ;;  %v1163_v37 = vadd.f32 %v1157_v28, %v3682_v35 }
 0x1a9   : > { %v1426_v30 = vpop.permute.xlu1 %1425 }
 0x1aa   : > { %v1462_v24 = vadd.f32 %v1456_v6, %v1438_v51  ;;  %v1404_v9 = vadd.f32 %v1398_v0, %v1380_v18 }
 0x1ab   : > { %v900_v63 = vpop.permute.xlu0 %899 }
 0x1ac   : > { %v1768_v42 = vsub.f32 %v1462_v24, %v3750_v61  ;;  %v906_v29 = vmul.f32 %v900_v63, %v3372_v8  ;;  %v1433_v61 = vmul.f32 %v1426_v30, %v3349_v59  ;;  %v1416_v6 = vadd.f32 %v1410_v3, %v1404_v9 }
 0x1ad   : > { %v629_v46 = vpop.permute.xlu1 %628  ;;  %v1681_v3 = vmul.f32 %v3457_v60, %v4021_v56 }
 0x1ae   : > { %v639_v52 = vmul.f32 %v3372_v8, %v629_v46  ;;  %v1822_v23 = vadd.f32 %v1768_v42, %v1762_v10  ;;  %v912_v41 = vadd.f32 %v906_v29, %v888_v11  ;;  %v1439_v43 = vadd.f32 %v1433_v61, %v3729_v7 }
 0x1af   : > { %v1174_v50 = vpop.permute.xlu0 %1173  ;;  %v1817_v46 = vadd.f32 0.0001, %v1811_v19 }
 0x1b0   : > { %v645_v15 = vadd.f32 %v639_v52, %v617_v14  ;;  %v1828_v44 = vadd.f32 0.0009, %v1822_v23  ;;  %v1752_v25 = vmul.f32 %v912_v41, %v912_v41  ;;  %v1181_v48 = vmul.f32 %v1174_v50, %v3372_v8 }
 0x1b1   : > { %v1152_v47 = vpop.permute.xlu1 %1151 }
 0x1b2   : > { %v1746_v58 = vmul.f32 %v645_v15, %v645_v15  ;;  %v3812_v31 = vmul.f32 %v912_v41, %v645_v15  ;;  %v3816_v20 = vmul.f32 %v1828_v44, %v1816_v27  ;;  %v1187_v53 = vadd.f32 %v1181_v48, %v1163_v37 }
 0x1b3   : > { %v1450_v13 = vpop.permute.xlu0 %1449  ;;  %v1158_v10 = vmul.f32 %v1152_v47, %v3349_v59 }
 0x1b4   : > { %v1812_v35 = vadd.f32 %v1752_v25, %v1746_v58  ;;  %v1763_v22 = vsub.f32 %v1187_v53, %v3782_v36  ;;  %v1457_v51 = vmul.f32 %v1450_v13, %v3372_v8  ;;  %2144 = vrcp.f32 %v3816_v20 }
 0x1b5   : > { %v1428_v40 = vpop.permute.xlu1 %1427  ;;  %v1164_v7 = vadd.f32 %v1158_v10, %v3767_v26 }
 0x1b6   : > { %v1434_v30 = vmul.f32 %v1428_v40, %v3349_v59  ;;  %v1463_v33 = vadd.f32 %v1457_v51, %v1439_v43  ;;  %v1818_v37 = vadd.f32 0.0001, %v1812_v35  ;;  %v2139_v51 = vpop.eup %2138 }
 0x1b7   : > { %v1452_v1 = vpop.permute.xlu0 %1451 }
 0x1b8   : > { %v1440_v12 = vadd.f32 %v1434_v30, %v1416_v6  ;;  %v1769_v24 = vsub.f32 %v1463_v33, %v3784_v49  ;;  %v1458_v21 = vmul.f32 %v1452_v1, %v3372_v8  ;;  %v1682_v6 = vmul.f32 %v3436_v38, %v4021_v56  ;;  %v2141_v1 = vpop.eup %2140 }
 0x1b9   : > { %v1176_v28 = vpop.permute.xlu1 %1175 }
 0x1ba   : > { %v1182_v36 = vmul.f32 %v1176_v28, %v3372_v8  ;;  %v1823_v63 = vadd.f32 %v1769_v24, %v1763_v22  ;;  %v1464_v11 = vadd.f32 %v1458_v21, %v1440_v12  ;;  %v1843_v24 = vmul.f32 %v2139_v51, %v3746_v57 }
 0x1bb   : > { %v1642_v29 = vpop.permute.xlu0 %1641  ;;  %v4049_v28 = vlaneseq  ;;  %v1844_v57 = vmul.f32 %v2141_v1, %v3743_v16 }
 0x1bc   : > { %v1188_v42 = vadd.f32 %v1182_v36, %v1164_v7  ;;  %v1829_v0 = vadd.f32 0.0009, %v1823_v63  ;;  %v1770_v18 = vsub.f32 %v1464_v11, %v1752_v25  ;;  %v1652_v53 = vmul.f32 %v1642_v29, %v3300_v4 }
 0x1bd   : > { %v1640_v14 = vpop.permute.xlu1 %1639  ;;  %v3848_v7 = vand.u32 127, %v4049_v28  ;;  %v1778_v36 = vmul.f32 2.0, %v3536_v17  ;;  %v1683_v29 = vmul.f32 %v3479_v2, %v4021_v56 }
 0x1be   : > { %v1764_v52 = vsub.f32 %v1188_v42, %v1746_v58  ;;  %v3827_v23 = vmul.f32 %v1829_v0, %v1817_v46  ;;  %v1651_v47 = vmul.f32 %v1640_v14, %v3300_v4  ;;  %v1777_v0 = vmul.f32 2.0, %v3543_v32 }
 0x1bf   : > { %v1660_v49 = vpop.permute.xlu0 %1659  ;;  %vm1893_vm3 = vcmp.lt.s32.totalorder %v3848_v7, 16  ;;  %vm1914_vm4 = vcmp.eq.s32.totalorder %v3848_v7, 0  ;;  %vm1917_vm5 = vcmp.eq.s32.totalorder %v3848_v7, 1  ;;  %vm1920_vm6 = vcmp.eq.s32.totalorder %v3848_v7, 2 }
 0x1c0   : > { %v1824_v41 = vadd.f32 %v1770_v18, %v1764_v52  ;;  %v1670_v35 = vmul.f32 %v1660_v49, %v3303_v45  ;;  %v1684_v52 = vmul.f32 %v3522_v34, %v4021_v56  ;;  %2146 = vrcp.f32 %v3827_v23 }
 0x1c1   : > { %v1658_v27 = vpop.permute.xlu1 %1657 }
 0x1c2   : > { %v1830_v15 = vadd.f32 0.0009, %v1824_v41  ;;  %v1669_v25 = vmul.f32 %v1658_v27, %v3303_v45  ;;  %v1676_v10 = vadd.f32 %v1670_v35, %v1652_v53  ;;  %v1849_v41 = vsub.f32 2.0, %v1843_v24 }
 0x1c3   : > { %v1662_v26 = vpop.permute.xlu0 %1661  ;;  %v1850_v35 = vsub.f32 2.0, %v1844_v57 }
 0x1c4   : > { %v3829_v50 = vmul.f32 %v1830_v15, %v1818_v37  ;;  %v1675_v58 = vadd.f32 %v1669_v25, %v1651_v47  ;;  %v1671_v38 = vmul.f32 %v1662_v26, %v3303_v45  ;;  %v1688_v42 = vadd.f32 %v1682_v6, %v1676_v10  ;;  %v2143_v25 = vpop.eup %2142 }
 0x1c5   : > { %v1644_v44 = vpop.permute.xlu1 %1643  ;;  %v1784_v37 = vadd.f32 0.0001, %v1778_v36  ;;  %v1685_v15 = vmul.f32 %v3571_v62, %v4021_v56  ;;  %v1779_v47 = vmul.f32 2.0, %v3659_v39  ;;  %v2145_v36 = vpop.eup %2144 }
 0x1c6   : > { %v1687_v40 = vadd.f32 %v1681_v3, %v1675_v58  ;;  %v1653_v11 = vmul.f32 %v1644_v44, %v3300_v4  ;;  %2148 = vrcp.f32 %v3829_v50  ;;  %v4050_v3 = vld [vmem:[#allocation14_spill] sm:$0xff] }
 0x1c7   : > { %v1664_v61 = vpop.permute.xlu0 %1663  ;;  %v1686_v53 = vmul.f32 %v4050_v3, %v4021_v56  ;;  %v1785_v56 = vadd.f32 0.0001, %v1779_v47 }
 0x1c8   : > { %v1677_v16 = vadd.f32 %v1671_v38, %v1653_v11  ;;  %v1856_v11 = vmul.f32 %v2141_v1, %v1850_v35 }
 0x1c9   : > { %v1646_v19 = vpop.permute.xlu1 %1645 }
 0x1ca   : > { %v1654_v26 = vmul.f32 %v1646_v19, %v3300_v4 }
 0x1cb   : > { %v1696_v48 = vpop.permute.xlu0 %1695 }
 0x1cc   : > { %v1706_v21 = vmul.f32 %v1696_v48, %v3349_v59  ;;  %v1783_v48 = vadd.f32 0.0001, %v1777_v0 }
 0x1cd   : > { %v1694_v9 = vpop.permute.xlu1 %1693 }
 0x1ce   : > { %v1705_v43 = vmul.f32 %v1694_v9, %v3349_v59  ;;  %v1712_v49 = vadd.f32 %v1706_v21, %v1688_v42 }
 0x1cf   : > { %v1666_v13 = vpop.permute.xlu0 %1665 }
 0x1d0   : > { %v1711_v60 = vadd.f32 %v1705_v43, %v1687_v40  ;;  %v1855_v43 = vmul.f32 %v2139_v51, %v1849_v41  ;;  %v1780_v51 = vmul.f32 2.0, %v3752_v5 }
 0x1d1   : > { %v1648_v22 = vpop.permute.xlu1 %1647 }
 0x1d2   : > { %v1655_v19 = vmul.f32 %v1648_v22, %v3300_v4 }
 0x1d3   : > { %v1718_v30 = vpop.permute.xlu0 %1717 }
 0x1d4   : > { %v1729_v33 = vmul.f32 %v1718_v30, %v3372_v8  ;;  %v1845_v30 = vmul.f32 %v2143_v25, %v3777_v54 }
 0x1d5   : > { %v1698_v12 = vpop.permute.xlu1 %1697 }
 0x1d6   : > { %v1735_v63 = vadd.f32 %v1729_v33, %v1711_v60  ;;  %v1707_v62 = vmul.f32 %v1698_v12, %v3349_v59  ;;  %v1689_v33 = vadd.f32 %v1683_v29, %v1677_v16  ;;  %v1851_v29 = vsub.f32 2.0, %v1845_v30 }
 0x1d7   : > { %v1650_v46 = vpop.permute.xlu0 %1649 }
 0x1d8   : > { %v1771_v18 = vsub.f32 %v1735_v63, %v3543_v32  ;;  %v1672_v32 = vmul.f32 %v1664_v61, %v3303_v45  ;;  %v1673_v61 = vmul.f32 %v1666_v13, %v3303_v45  ;;  %v1656_v12 = vmul.f32 %v1650_v46, %v3300_v4 }
 0x1d9   : > { %v1720_v14 = vpop.permute.xlu1 %1719  ;;  %v1713_v13 = vadd.f32 %v1707_v62, %v1689_v33  ;;  %v1846_v4 = vmul.f32 %v2145_v36, %v3816_v20 }
 0x1da   : > { %v1730_v27 = vmul.f32 %v1720_v14, %v3372_v8  ;;  %v1789_v2 = vmul.f32 2.0, %v1771_v18  ;;  %v1678_v60 = vadd.f32 %v1672_v32, %v1654_v26  ;;  %v1679_v38 = vadd.f32 %v1673_v61, %v1655_v19 }
 0x1db   : > { %v1700_v34 = vpop.permute.xlu0 %1699  ;;  %v1852_v35 = vsub.f32 2.0, %v1846_v4 }
 0x1dc   : > { %v1736_v44 = vadd.f32 %v1730_v27, %v1712_v49  ;;  %v1795_v9 = vadd.f32 0.0009, %v1789_v2  ;;  %v1708_v22 = vmul.f32 %v1700_v34, %v3349_v59  ;;  %v1690_v57 = vadd.f32 %v1684_v52, %v1678_v60 }
 0x1dd   : > { %v1668_v58 = vpop.permute.xlu1 %1667  ;;  %v1786_v52 = vadd.f32 0.0001, %v1780_v51  ;;  %v1782_v51 = vmul.f32 2.0, %v3812_v31 }
 0x1de   : > { %v1772_v40 = vsub.f32 %v1736_v44, %v3536_v17  ;;  %v1801_v10 = vmul.f32 %v1795_v9, %v1783_v48  ;;  %v1674_v6 = vmul.f32 %v1668_v58, %v3303_v45  ;;  %v1714_v16 = vadd.f32 %v1708_v22, %v1690_v57 }
 0x1df   : > { %v1702_v21 = vpop.permute.xlu0 %1701  ;;  %v1691_v44 = vadd.f32 %v1685_v15, %v1679_v38  ;;  %v1857_v9 = vmul.f32 %v2143_v25, %v1851_v29 }
 0x1e0   : > { %v1790_v24 = vmul.f32 2.0, %v1772_v40  ;;  %v1861_v28 = vmul.f32 %v1855_v43, %v1801_v10  ;;  %v1680_v42 = vadd.f32 %v1674_v6, %v1656_v12  ;;  %v1709_v41 = vmul.f32 %v1702_v21, %v3349_v59 }
 0x1e1   : > { %v1722_v17 = vpop.permute.xlu1 %1721  ;;  %v1781_v21 = vmul.f32 2.0, %v3786_v55 }
 0x1e2   : > { %v1796_v63 = vadd.f32 0.0009, %v1790_v24  ;;  %v1731_v45 = vmul.f32 %v1722_v17, %v3372_v8  ;;  %v1867_v54 = vsub.f32 1.0, %v1861_v28  ;;  %v1692_v34 = vadd.f32 %v1686_v53, %v1680_v42 }
 0x1e3   : > { %v1704_v14 = vpop.permute.xlu0 %1703  ;;  %v1858_v28 = vmul.f32 %v2145_v36, %v1852_v35  ;;  %v1788_v36 = vadd.f32 0.0001, %v1782_v51  ;;  %v1787_v42 = vadd.f32 0.0001, %v1781_v21 }
 0x1e4   : > { %v1802_v0 = vmul.f32 %v1796_v63, %v1784_v37  ;;  %v1737_v18 = vadd.f32 %v1731_v45, %v1713_v13  ;;  %v1873_v46 = vmul.f32 0.5, %v1867_v54  ;;  %v1710_v49 = vmul.f32 %v1704_v14, %v3349_v59  ;;  %v2147_v37 = vpop.eup %2146 }
 0x1e5   : > { %v1724_v27 = vpop.permute.xlu1 %1723  ;;  %v2149_v48 = vpop.eup %2148  ;;  %v1715_v59 = vadd.f32 %v1709_v41, %v1691_v44  ;;  %v1847_v15 = vmul.f32 %v2147_v37, %v3827_v23 }
 0x1e6   : > { %v1862_v2 = vmul.f32 %v1856_v11, %v1802_v0  ;;  %v1773_v1 = vsub.f32 %v1737_v18, %v3659_v39  ;;  %v1732_v32 = vmul.f32 %v1724_v27, %v3372_v8  ;;  %v1879_v26 = vmax.f32 %v1873_v46, 0.0 }
 0x1e7   : > { %v1728_v3 = vpop.permute.xlu0 %1727  ;;  %v1716_v43 = vadd.f32 %v1710_v49, %v1692_v34  ;;  %v1848_v53 = vmul.f32 %v2149_v48, %v3829_v50  ;;  %v1853_v13 = vsub.f32 2.0, %v1847_v15 }
 0x1e8   : > { %v1868_v47 = vsub.f32 1.0, %v1862_v2  ;;  %v1791_v20 = vmul.f32 2.0, %v1773_v1  ;;  %v1738_v58 = vadd.f32 %v1732_v32, %v1714_v16  ;;  %v1734_v62 = vmul.f32 %v1728_v3, %v3372_v8 }
 0x1e9   : > { %v1726_v40 = vpop.permute.xlu1 %1725  ;;  %v1885_v6 = vmin.f32 %v1879_v26, 1.0  ;;  %v1854_v50 = vsub.f32 2.0, %v1848_v53  ;;  %v1859_v41 = vmul.f32 %v2147_v37, %v1853_v13 }
 0x1ea   : > { %v1874_v39 = vmul.f32 0.5, %v1868_v47  ;;  %v1797_v61 = vadd.f32 0.0009, %v1791_v20  ;;  %v1774_v19 = vsub.f32 %v1738_v58, %v3752_v5  ;;  %v1733_v10 = vmul.f32 %v1726_v40, %v3372_v8 }
 0x1eb   : > { %v1740_v25 = vadd.f32 %v1734_v62, %v1716_v43  ;;  %v1860_v18 = vmul.f32 %v2149_v48, %v1854_v50 }
 0x1ec   : > { %v1880_v30 = vmax.f32 %v1874_v39, 0.0  ;;  %v1803_v60 = vmul.f32 %v1797_v61, %v1785_v56  ;;  %v1792_v33 = vmul.f32 2.0, %v1774_v19  ;;  %v1739_v24 = vadd.f32 %v1733_v10, %v1715_v59 }
 0x1ed   : > { %v1776_v12 = vsub.f32 %v1740_v25, %v3812_v31  ;;  %v1894_v56 = vsel %vm1893_vm3, %v1885_v6, 0.0  ;;  %v1915_v25 = vstv %s2065_s8 }
 0x1ee   : > { %v1886_v5 = vmin.f32 %v1880_v30, 1.0  ;;  %v1863_v17 = vmul.f32 %v1857_v9, %v1803_v60  ;;  %v1798_v8 = vadd.f32 0.0009, %v1792_v33  ;;  %v1775_v23 = vsub.f32 %v1739_v24, %v3786_v55 }
 0x1ef   : > { %v1794_v63 = vmul.f32 2.0, %v1776_v12  ;;  %v1918_v30 = vstv %s2067_s10  ;;  %v1916_v60 = vsel %vm1914_vm4, %v1915_v25, 0.0 }
 0x1f0   : > { %v1869_v22 = vsub.f32 1.0, %v1863_v17  ;;  %v1804_v45 = vmul.f32 %v1798_v8, %v1786_v52  ;;  %v1793_v38 = vmul.f32 2.0, %v1775_v23  ;;  %v1895_v54 = vsel %vm1893_vm3, %v1886_v5, 0.0 }
 0x1f1   : > { %v1800_v11 = vadd.f32 0.0009, %v1794_v63  ;;  %v1900_v31 = vadd.f32 %v1895_v54, %v1894_v56  ;;  %v1919_v33 = vsel %vm1917_vm5, %v1918_v30, %v1916_v60 }
 0x1f2   : > { %v1875_v29 = vmul.f32 0.5, %v1869_v22  ;;  %v1864_v0 = vmul.f32 %v1858_v28, %v1804_v45  ;;  %v1799_v57 = vadd.f32 0.0009, %v1793_v38 }
 0x1f3   : > { %v1806_v55 = vmul.f32 %v1800_v11, %v1788_v36 }
 0x1f4   : > { %v1881_v14 = vmax.f32 %v1875_v29, 0.0  ;;  %v1870_v4 = vsub.f32 1.0, %v1864_v0  ;;  %v1805_v46 = vmul.f32 %v1799_v57, %v1787_v42 }
 0x1f5   : > { %v1866_v49 = vmul.f32 %v1860_v18, %v1806_v55 }
 0x1f6   : > { %v1887_v27 = vmin.f32 %v1881_v14, 1.0  ;;  %v1876_v2 = vmul.f32 0.5, %v1870_v4  ;;  %v1865_v16 = vmul.f32 %v1859_v41, %v1805_v46 }
 0x1f7   : > { %v1872_v1 = vsub.f32 1.0, %v1866_v49 }
 0x1f8   : > { %v1882_v32 = vmax.f32 %v1876_v2, 0.0  ;;  %v1871_v52 = vsub.f32 1.0, %v1865_v16  ;;  %v1896_v26 = vsel %vm1893_vm3, %v1887_v27, 0.0 }
 0x1f9   : > { %v1878_v44 = vmul.f32 0.5, %v1872_v1  ;;  %v1901_v34 = vadd.f32 %v1900_v31, %v1896_v26 }
 0x1fa   : > { %v1877_v47 = vmul.f32 0.5, %v1871_v52  ;;  %v1888_v20 = vmin.f32 %v1882_v32, 1.0 }
 0x1fb   : > { %v1884_v9 = vmax.f32 %v1878_v44, 0.0 }
 0x1fc   : > { %v1883_v48 = vmax.f32 %v1877_v47, 0.0  ;;  %v1897_v58 = vsel %vm1893_vm3, %v1888_v20, 0.0 }
 0x1fd   : > { %v1902_v37 = vadd.f32 %v1901_v34, %v1897_v58  ;;  %v1890_v35 = vmin.f32 %v1884_v9, 1.0 }
 0x1fe   : > { %v1889_v3 = vmin.f32 %v1883_v48, 1.0 }
 0x1ff   : > { %v1899_v62 = vsel %vm1893_vm3, %v1890_v35, 0.0 }
 0x200   : > { %v1898_v59 = vsel %vm1893_vm3, %v1889_v3, 0.0 }
 0x201   : > { %v1903_v43 = vadd.f32 %v1902_v37, %v1898_v59 }
 0x203   : > { %v1904_v40 = vadd.f32 %v1903_v43, %v1899_v62 }
 0x205   : > { %1905 = vadd.xlane.f32.xlu1 %v1904_v40 }
 0x28e   : > { %v1906_v39 = vpop.xlane.xlu1 %1905 }
 0x28f   : > { %v1907_v61 = vrot.slane %v1906_v39, 4 }
 0x291   : > { %v1908_v19 = vadd.f32 %v1907_v61, %v1906_v39 }
 0x293   : > { %v1909_v10 = vrot.slane %v1908_v19, 2 }
 0x295   : > { %v1910_v15 = vadd.f32 %v1909_v10, %v1908_v19 }
 0x297   : > { %v1911_v53 = vrot.slane %v1910_v15, 1 }
 0x299   : > { %v1912_v6 = vadd.f32 %v1911_v53, %v1910_v15 }
 0x29b   : > { %2068 = vpush %v1912_v6 }
 0x2cc   : > { %s2069_s23 = spop %2068 }
 0x2cd   : > { %v1921_v24 = vstv %s2069_s23 }
 0x2ce   : > { %v1922_v21 = vsel %vm1920_vm6, %v1921_v24, %v1919_v33 }
 0x2cf   : > { %1923 = vst [vmem:[%s240_s26] sm:$0xff] %v1922_v21 }
 0x2d0   : > { %2257 = shalt.err (!%p2254_p9)
}
 0x2d1   : > { %s2258_s6 = scalar_lea.hbm %s3915_s21, 128  ;;  %s2262_s5 = scalar_lea.hbm %s3955_s3, 256 }
 0x2d2   : > { %p2259_p13 = scmp.ne.s32.totalorder %s3915_s21, %s2258_s6  ;;  %p2263_p0 = scmp.lt.s32.totalorder %s3915_s21, %s3955_s3 }
 0x2d3   : > { %p2264_p3 = scmp.lt.s32.totalorder %s2262_s5, %s2258_s6 }
 0x2d4   : > { %p2260_p7 = pnand %p2259_p13, %p4051_p2 }
 0x2d5   : > { %p2265_p11 = por %p2264_p3, %p2263_p0 }
 0x2d6   : > { %p2261_p6 = pneg %p2260_p7 }
 0x2d8   : > { %p2266_p12 = pnand %p2265_p11, %p2261_p6 }
 0x2da   : > { %2269 = shalt.err (!%p2266_p12)
}
 0x2db   : > { %2078 = dma.vmem_to_hbm [thread:$0]  (%p4051_p2), %s1939_s18, 128, %s3915_s21, %s1925_s9  }
 0x2dc PF: > { %s1950_s10 = sand.u32 1, %s2300_s12   ;;  %p4052_p8 = scmp.ne.s32.totalorder %s3982_s29, 0 }
 0x2dd   : > { %p4053_p10 = scmp.ge.s32.totalorder %s2312_s15, 2  ;;  %s1951_s24 = scalar_lea.sflag [#allocation6], %s1950_s10 }
 0x2df   : > { %p2092_p1 = pnand %p4053_p10, %p4052_p8 }
 0x2e1   : > { %p2093_p4 = pneg %p2092_p1 }
 0x2e3   : > { %2295 = dma.done.wait (%p2093_p4), %s1951_s24, 128  }
 0x2e4   : > { %2297 = vsyncadd (%p2093_p4), %s1951_s24, 4294967168  ;;  %p17_p5 = scmp.ge.s32.totalorder %s2365_s16, 4   ;;  %s4054_s12 = smov %s2304_s13 }
 0x2e5   : > { %s4055_s13 = smov %s2308_s14  ;;  %s4056_s14 = smov %s2376_s19 }
 0x2e6   : > { %s4057_s15 = smov %s2365_s16  ;;  %19 = sbr.rel (!%p17_p5) target bundleno = 6 (0x6), region = 93 }
 0x2eb   :  { %1956 = vsyncpa [#allocation5], 1 }
 0x2ec   :  { %1958 = vsyncpa [#allocation5 + $0x1], 1 }
 0x2ed   :  { %1959 = vsyncpa [#allocation8], 1 }
 0x2ee   :  { %1961 = vsyncpa [#allocation8 + $0x1], 1 }
 0x2ef   :  { %1962 = vsyncpa [#allocation6], 1 }
 0x2f0   :  { %1964 = vsyncpa [#allocation6 + $0x1], 1 }

</bundles_post_ra>
